<compile_context>
chip_gen: v7x
topology: tpu7x:2x2x1
jax: 0.10.0
libtpu: 0.0.40
codegen_flags: <defaults>
</compile_context>

<pallas_src>
import math

import jax
import jax.numpy as jnp
from jax.experimental import pallas as pl
from jax.experimental.pallas import tpu as pltpu

# ---- small synthetic DINOv2-style config (real: 224 img / 14 patch / 1024 hidden) ----
BATCH = 2
CHANNELS = 3
IMG = 16
PATCH = 4
PATCH_K = CHANNELS * PATCH * PATCH       # 48   (real: 588; TODO(synk): pad to 128-mult)
N_PATCH = (IMG // PATCH) ** 2            # 16 patches      (real: 256)
SEQ = N_PATCH + 1                        # 17 = CLS+patches (real: 257)
SEQ_PAD = ((SEQ + 7) // 8) * 8           # 24 -> unmasked sublane tiles
HIDDEN = 128                             # lane-dense analogue of 1024
NUM_HEADS = 2
HEAD_DIM = HIDDEN // NUM_HEADS           # 64 (matches real DINOv2-large head_dim)
MLP_HIDDEN = 4 * HIDDEN                  # 512
NUM_LAYERS = 2
LN_EPS = 1e-6
ATTN_SCALE = 1.0 / math.sqrt(HEAD_DIM)


# ----------------------------- in-kernel math helpers ------------------------------
def _layer_norm(x, gamma, beta):
    mu = jnp.mean(x, axis=-1, keepdims=True)
    xc = x - mu
    var = jnp.mean(xc * xc, axis=-1, keepdims=True)
    return xc * jax.lax.rsqrt(var + LN_EPS) * gamma + beta


def _gelu(x):
    # TODO(synk): HF DINOv2 uses exact (erf) GELU; tanh approximation kept for Mosaic lowering safety.
    c = math.sqrt(2.0 / math.pi)
    return 0.5 * x * (1.0 + jnp.tanh(c * (x + 0.044715 * x * x * x)))


# --------------------------------- fused Pallas kernel ------------------------------
def _fused_encoder_kernel(patches_ref, pw_ref, pb_ref, clspos_ref, mask_ref,
                          ln1g_ref, ln1b_ref, wqkv_ref, bqkv_ref,
                          wo_ref, bo_ref, ls1_ref,
                          ln2g_ref, ln2b_ref, w1_ref, b1_ref, w2_ref, b2_ref, ls2_ref,
                          lnfg_ref, lnfb_ref, o_ref):
    layer = pl.program_id(0)
    last = pl.num_programs(0) - 1

    # ---- layer-0 prologue: patch embed + CLS + pos-embed + pad, assembled in VMEM ----
    @pl.when(layer == 0)
    def _():
        tok = (jnp.dot(patches_ref[...].astype(jnp.bfloat16), pw_ref[...],
                       preferred_element_type=jnp.float32)
               + pb_ref[...])                                   # [B*N_PATCH, HIDDEN]
        blocks = []
        for b in range(BATCH):
            rows = jnp.concatenate(
                [jnp.zeros((1, HIDDEN), jnp.float32),           # CLS slot (in clspos)
                 tok[b * N_PATCH:(b + 1) * N_PATCH, :],
                 jnp.zeros((SEQ_PAD - SEQ, HIDDEN), jnp.float32)], axis=0)
            blocks.append(rows + clspos_ref[...])               # cls folded into pos row 0
        o_ref[...] = jnp.concatenate(blocks, axis=0).astype(o_ref.dtype)

    x = o_ref[...]                                              # [B*SEQ_PAD, HIDDEN] f32

    # -------------------------- attention sub-block (pre-norm) ----------------------
    h = _layer_norm(x, ln1g_ref[0], ln1b_ref[0])
    qkv = (jnp.dot(h.astype(jnp.bfloat16), wqkv_ref[0],
                   preferred_element_type=jnp.float32)
           + bqkv_ref[0])                                       # [B*S, 3*HIDDEN]

    def head_stack(t):                                          # [B*S, H] -> [NH, B*S, D]
        return jnp.concatenate(
            [t[:, hh * HEAD_DIM:(hh + 1) * HEAD_DIM]
             .reshape(1, BATCH * SEQ_PAD, HEAD_DIM) for hh in range(NUM_HEADS)],
            axis=0)

    q = head_stack(qkv[:, :HIDDEN]).astype(jnp.bfloat16)
    k = head_stack(qkv[:, HIDDEN:2 * HIDDEN]).astype(jnp.bfloat16)
    v = head_stack(qkv[:, 2 * HIDDEN:]).astype(jnp.bfloat16)

    wo = wo_ref[0]                                              # [NH, D, HIDDEN] bf16
    mask = mask_ref[...].reshape(1, 1, SEQ_PAD)                 # padded keys -> -inf

    attn_blocks = []
    for b in range(BATCH):                                      # per-image attention
        r0, r1 = b * SEQ_PAD, (b + 1) * SEQ_PAD
        qb, kb, vb = q[:, r0:r1, :], k[:, r0:r1, :], v[:, r0:r1, :]
        s = jnp.einsum('hqd,hkd->hqk', qb, kb,
                       preferred_element_type=jnp.float32) * ATTN_SCALE
        s = s + mask
        s = s - jnp.max(s, axis=-1, keepdims=True)
        p = jnp.exp(s)
        inv = pl.reciprocal(jnp.sum(p, axis=-1, keepdims=True), approx=False)
        ctx = jnp.einsum('hqk,hkd->hqd', p.astype(jnp.bfloat16), vb,
                         preferred_element_type=jnp.float32) * inv    # [NH, S, D]
        # head-split output projection: per-head partial matmuls summed (no lane concat)
        ab = jnp.dot(ctx[0].astype(jnp.bfloat16), wo[0],
                     preferred_element_type=jnp.float32)
        for hh in range(1, NUM_HEADS):
            ab = ab + jnp.dot(ctx[hh].astype(jnp.bfloat16), wo[hh],
                              preferred_element_type=jnp.float32)
        attn_blocks.append(ab)
    attn = jnp.concatenate(attn_blocks, axis=0) + bo_ref[0]     # [B*S, HIDDEN]

    x = x + ls1_ref[0] * attn                                   # LayerScale + residual

    # ------------------------------ MLP sub-block (pre-norm) ------------------------
    h2 = _layer_norm(x, ln2g_ref[0], ln2b_ref[0])
    m = (jnp.dot(h2.astype(jnp.bfloat16), w1_ref[0],
                 preferred_element_type=jnp.float32) + b1_ref[0])
    m = _gelu(m)
    m = (jnp.dot(m.astype(jnp.bfloat16), w2_ref[0],
                 preferred_element_type=jnp.float32) + b2_ref[0])
    x = x + ls2_ref[0] * m                                      # LayerScale + residual

    # -------- single store per step; final LayerNorm folded into the last layer -----
    @pl.when(layer == last)
    def _():
        o_ref[...] = _layer_norm(x, lnfg_ref[...], lnfb_ref[...]).astype(o_ref.dtype)

    @pl.when(layer != last)
    def _():
        o_ref[...] = x.astype(o_ref.dtype)


# --------------------------------- kernel wrapper -----------------------------------
def encoder_forward(patches, params):
    """patches: [B*N_PATCH, PATCH_K] f32 -> [B*SEQ_PAD, HIDDEN] f32 (CLS+pos+layers+LN)."""
    m_rows = BATCH * SEQ_PAD
    key_mask = jnp.where(jnp.arange(SEQ_PAD)[None, :] >= SEQ,
                         jnp.float32(-1e30), jnp.float32(0.0))

    def per_layer(*dims):
        nd = len(dims)
        return pl.BlockSpec((1,) + dims, lambda l, _nd=nd: (l,) + (0,) * _nd)

    def shared(*dims):
        nd = len(dims)
        return pl.BlockSpec(dims, lambda l, _nd=nd: (0,) * _nd)

    in_specs = [
        shared(BATCH * N_PATCH, PATCH_K),                            # patches
        shared(PATCH_K, HIDDEN),                                     # patch conv weight
        shared(1, HIDDEN),                                           # patch conv bias
        shared(SEQ_PAD, HIDDEN),                                     # cls+pos (padded)
        shared(1, SEQ_PAD),                                          # key-padding mask
        per_layer(1, HIDDEN), per_layer(1, HIDDEN),                  # ln1 gamma/beta
        per_layer(HIDDEN, 3 * HIDDEN), per_layer(1, 3 * HIDDEN),     # qkv proj
        per_layer(NUM_HEADS, HEAD_DIM, HIDDEN), per_layer(1, HIDDEN),  # out proj (head-split)
        per_layer(1, HIDDEN),                                        # layerscale 1
        per_layer(1, HIDDEN), per_layer(1, HIDDEN),                  # ln2 gamma/beta
        per_layer(HIDDEN, MLP_HIDDEN), per_layer(1, MLP_HIDDEN),     # fc1
        per_layer(MLP_HIDDEN, HIDDEN), per_layer(1, HIDDEN),         # fc2
        per_layer(1, HIDDEN),                                        # layerscale 2
        shared(1, HIDDEN), shared(1, HIDDEN),                        # final LN gamma/beta
    ]

    # Output block index constant over the layer axis -> VMEM-resident residual stream.
    out_spec = pl.BlockSpec((m_rows, HIDDEN), lambda l: (0, 0))

    return pl.pallas_call(
        _fused_encoder_kernel,
        out_shape=jax.ShapeDtypeStruct((m_rows, HIDDEN), jnp.float32),
        grid=(NUM_LAYERS,),
        in_specs=in_specs,
        out_specs=out_spec,
        compiler_params=pltpu.CompilerParams(
            dimension_semantics=("arbitrary",),
            vmem_limit_bytes=48 * 1024 * 1024),
    )(patches,
      params['patch_w'], params['patch_b'], params['clspos'], key_mask,
      params['ln1_g'], params['ln1_b'],
      params['w_qkv'], params['b_qkv'],
      params['w_o'], params['b_o'], params['ls1'],
      params['ln2_g'], params['ln2_b'],
      params['w_fc1'], params['b_fc1'],
      params['w_fc2'], params['b_fc2'], params['ls2'],
      params['ln_f_g'], params['ln_f_b'])


# --------------------------------- parameters / forward -----------------------------
def init_params(key):
    ks = jax.random.split(key, 12)
    L, D, M = NUM_LAYERS, HIDDEN, MLP_HIDDEN

    def nrm(k, shape, scale=0.02):
        return scale * jax.random.normal(k, shape, dtype=jnp.float32)

    def bf(x):
        return x.astype(jnp.bfloat16)        # frozen matmul weights stored in bf16

    cls = nrm(ks[2], (1, D))
    pos = nrm(ks[3], (SEQ, D))
    clspos = pos.at[0:1, :].add(cls)                         # fold CLS into pos row 0
    clspos = jnp.pad(clspos, ((0, SEQ_PAD - SEQ), (0, 0)))   # [SEQ_PAD, D], zero pad rows

    return {
        # patch embedding (Conv2d kernel=stride=PATCH expressed as a matmul)
        'patch_w': bf(nrm(ks[0], (PATCH_K, D))),
        'patch_b': nrm(ks[1], (1, D)),
        'clspos': clspos,
        # per-layer weights, stacked along a leading layer axis
        'ln1_g': jnp.ones((L, 1, D), jnp.float32),
        'ln1_b': jnp.zeros((L, 1, D), jnp.float32),
        'w_qkv': bf(nrm(ks[4], (L, D, 3 * D))),
        'b_qkv': nrm(ks[5], (L, 1, 3 * D)),
        'w_o': bf(nrm(ks[6], (L, NUM_HEADS, HEAD_DIM, D))),   # head-split out projection
        'b_o': nrm(ks[7], (L, 1, D)),
        'ls1': jnp.ones((L, 1, D), jnp.float32),              # DINOv2 LayerScale init
        'ln2_g': jnp.ones((L, 1, D), jnp.float32),
        'ln2_b': jnp.zeros((L, 1, D), jnp.float32),
        'w_fc1': bf(nrm(ks[8], (L, D, M))),
        'b_fc1': nrm(ks[9], (L, 1, M)),
        'w_fc2': bf(nrm(ks[10], (L, M, D))),
        'b_fc2': nrm(ks[11], (L, 1, D)),
        'ls2': jnp.ones((L, 1, D), jnp.float32),
        # final LayerNorm
        'ln_f_g': jnp.ones((1, D), jnp.float32),
        'ln_f_b': jnp.zeros((1, D), jnp.float32),
    }


def vision_encoder_forward(images, params):
    """images: [B, C, H, W] (PyTorch NCHW) -> last_hidden_state [B, SEQ, HIDDEN]."""
    B, C, H, W = images.shape
    ph, pw = H // PATCH, W // PATCH

    # glue: extract non-overlapping patches; flatten in (C, kh, kw) order to match a
    # Conv2d(kernel=stride=PATCH) weight reshape followed by flatten(2).transpose(1, 2).
    patches = images.reshape(B, C, ph, PATCH, pw, PATCH)
    patches = patches.transpose(0, 2, 4, 1, 3, 5).reshape(B * ph * pw, C * PATCH * PATCH)

    y = encoder_forward(patches, params)                 # [B*SEQ_PAD, HIDDEN]
    y = y.reshape(B, SEQ_PAD, HIDDEN)[:, :SEQ, :]        # drop sublane padding
    return y


if __name__ == "__main__":
    key = jax.random.PRNGKey(0)
    k_img, k_par = jax.random.split(key)
    images = jax.random.normal(k_img, (BATCH, CHANNELS, IMG, IMG), dtype=jnp.float32)
    params = init_params(k_par)

    out = vision_encoder_forward(images, params)
    out = jax.block_until_ready(out)

    assert out.shape == (BATCH, SEQ, HIDDEN), out.shape
    assert bool(jnp.all(jnp.isfinite(out)))
    print("KERNEL_OK")
</pallas_src>

<mosaic_0001>
module attributes {stable_mosaic.version = 11 : i64} {
  func.func @_fused_encoder_kernel(%arg0: i32, %arg1: memref<32x48xf32, #tpu.memory_space<vmem>>, %arg2: memref<48x128xbf16, #tpu.memory_space<vmem>>, %arg3: memref<1x128xf32, #tpu.memory_space<vmem>>, %arg4: memref<24x128xf32, #tpu.memory_space<vmem>>, %arg5: memref<1x24xf32, #tpu.memory_space<vmem>>, %arg6: memref<1x1x128xf32, #tpu.memory_space<vmem>>, %arg7: memref<1x1x128xf32, #tpu.memory_space<vmem>>, %arg8: memref<1x128x384xbf16, #tpu.memory_space<vmem>>, %arg9: memref<1x1x384xf32, #tpu.memory_space<vmem>>, %arg10: memref<1x2x64x128xbf16, #tpu.memory_space<vmem>>, %arg11: memref<1x1x128xf32, #tpu.memory_space<vmem>>, %arg12: memref<1x1x128xf32, #tpu.memory_space<vmem>>, %arg13: memref<1x1x128xf32, #tpu.memory_space<vmem>>, %arg14: memref<1x1x128xf32, #tpu.memory_space<vmem>>, %arg15: memref<1x128x512xbf16, #tpu.memory_space<vmem>>, %arg16: memref<1x1x512xf32, #tpu.memory_space<vmem>>, %arg17: memref<1x512x128xbf16, #tpu.memory_space<vmem>>, %arg18: memref<1x1x128xf32, #tpu.memory_space<vmem>>, %arg19: memref<1x1x128xf32, #tpu.memory_space<vmem>>, %arg20: memref<1x128xf32, #tpu.memory_space<vmem>>, %arg21: memref<1x128xf32, #tpu.memory_space<vmem>>, %arg22: memref<48x128xf32, #tpu.memory_space<vmem>>) attributes {dimension_semantics = [#tpu.dimension_semantics<arbitrary>], iteration_bounds = array<i64: 2>, scalar_prefetch = 0 : i64, scratch_operands = 0 : i64, tpu.core_type = #tpu.core_type<tc>, window_params = [{pipeline_mode = #tpu.pipeline_mode<synchronous>, transform_indices = @transform_0, window_bounds = array<i64: 32, 48>}, {pipeline_mode = #tpu.pipeline_mode<synchronous>, transform_indices = @transform_1, window_bounds = array<i64: 48, 128>}, {pipeline_mode = #tpu.pipeline_mode<synchronous>, transform_indices = @transform_2, window_bounds = array<i64: 1, 128>}, {pipeline_mode = #tpu.pipeline_mode<synchronous>, transform_indices = @transform_3, window_bounds = array<i64: 24, 128>}, {pipeline_mode = #tpu.pipeline_mode<synchronous>, transform_indices = @transform_4, window_bounds = array<i64: 1, 24>}, {transform_indices = @transform_5, window_bounds = array<i64: 1, 1, 128>}, {transform_indices = @transform_6, window_bounds = array<i64: 1, 1, 128>}, {transform_indices = @transform_7, window_bounds = array<i64: 1, 128, 384>}, {transform_indices = @transform_8, window_bounds = array<i64: 1, 1, 384>}, {transform_indices = @transform_9, window_bounds = array<i64: 1, 2, 64, 128>}, {transform_indices = @transform_10, window_bounds = array<i64: 1, 1, 128>}, {transform_indices = @transform_11, window_bounds = array<i64: 1, 1, 128>}, {transform_indices = @transform_12, window_bounds = array<i64: 1, 1, 128>}, {transform_indices = @transform_13, window_bounds = array<i64: 1, 1, 128>}, {transform_indices = @transform_14, window_bounds = array<i64: 1, 128, 512>}, {transform_indices = @transform_15, window_bounds = array<i64: 1, 1, 512>}, {transform_indices = @transform_16, window_bounds = array<i64: 1, 512, 128>}, {transform_indices = @transform_17, window_bounds = array<i64: 1, 1, 128>}, {transform_indices = @transform_18, window_bounds = array<i64: 1, 1, 128>}, {pipeline_mode = #tpu.pipeline_mode<synchronous>, transform_indices = @transform_19, window_bounds = array<i64: 1, 128>}, {pipeline_mode = #tpu.pipeline_mode<synchronous>, transform_indices = @transform_20, window_bounds = array<i64: 1, 128>}, {pipeline_mode = #tpu.pipeline_mode<synchronous>, transform_indices = @transform_21, window_bounds = array<i64: 48, 128>}]} {
    %c0_i32 = arith.constant 0 : i32
    %0 = arith.cmpi eq, %arg0, %c0_i32 : i32
    %1 = arith.extui %0 : i1 to i32
    %c0_i32_0 = arith.constant 0 : i32
    %2 = arith.cmpi ne, %1, %c0_i32_0 : i32
    scf.if %2 {
      %c0_80 = arith.constant 0 : index
      %c0_81 = arith.constant 0 : index
      %201 = vector.load %arg1[%c0_80, %c0_81] : memref<32x48xf32, #tpu.memory_space<vmem>>, vector<32x48xf32>
      %202 = arith.truncf %201 : vector<32x48xf32> to vector<32x48xbf16>
      %c0_82 = arith.constant 0 : index
      %c0_83 = arith.constant 0 : index
      %203 = vector.load %arg2[%c0_82, %c0_83] : memref<48x128xbf16, #tpu.memory_space<vmem>>, vector<48x128xbf16>
      %cst_84 = arith.constant dense<0.000000e+00> : vector<32x128xf32>
      %204 = tpu.matmul %202, %203, %cst_84 {dimension_numbers = #tpu.dot_dimension_numbers<[1], [0], [0], [1], [0, 0, 1, 1], [], []>} : vector<32x48xbf16>, vector<48x128xbf16>, vector<32x128xf32> -> vector<32x128xf32>
      %c0_85 = arith.constant 0 : index
      %c0_86 = arith.constant 0 : index
      %205 = vector.load %arg3[%c0_85, %c0_86] : memref<1x128xf32, #tpu.memory_space<vmem>>, vector<1x128xf32>
      %206 = vector.broadcast %205 : vector<1x128xf32> to vector<32x128xf32>
      %207 = arith.addf %204, %206 : vector<32x128xf32>
      %cst_87 = arith.constant 0.000000e+00 : f32
      %208 = vector.broadcast %cst_87 : f32 to vector<1x128xf32>
      %209 = vector.extract_strided_slice %207 {offsets = [0, 0], sizes = [16, 128], strides = [1, 1]} : vector<32x128xf32> to vector<16x128xf32>
      %cst_88 = arith.constant 0.000000e+00 : f32
      %210 = vector.broadcast %cst_88 : f32 to vector<7x128xf32>
      %211 = tpu.concatenate %208, %209, %210 in 0 : vector<1x128xf32>, vector<16x128xf32>, vector<7x128xf32> -> vector<24x128xf32>
      %c0_89 = arith.constant 0 : index
      %c0_90 = arith.constant 0 : index
      %212 = vector.load %arg4[%c0_89, %c0_90] : memref<24x128xf32, #tpu.memory_space<vmem>>, vector<24x128xf32>
      %213 = arith.addf %211, %212 : vector<24x128xf32>
      %cst_91 = arith.constant 0.000000e+00 : f32
      %214 = vector.broadcast %cst_91 : f32 to vector<1x128xf32>
      %215 = vector.extract_strided_slice %207 {offsets = [16, 0], sizes = [16, 128], strides = [1, 1]} : vector<32x128xf32> to vector<16x128xf32>
      %cst_92 = arith.constant 0.000000e+00 : f32
      %216 = vector.broadcast %cst_92 : f32 to vector<7x128xf32>
      %217 = tpu.concatenate %214, %215, %216 in 0 : vector<1x128xf32>, vector<16x128xf32>, vector<7x128xf32> -> vector<24x128xf32>
      %c0_93 = arith.constant 0 : index
      %c0_94 = arith.constant 0 : index
      %218 = vector.load %arg4[%c0_93, %c0_94] : memref<24x128xf32, #tpu.memory_space<vmem>>, vector<24x128xf32>
      %219 = arith.addf %217, %218 : vector<24x128xf32>
      %220 = tpu.concatenate %213, %219 in 0 : vector<24x128xf32>, vector<24x128xf32> -> vector<48x128xf32>
      %c0_95 = arith.constant 0 : index
      %c0_96 = arith.constant 0 : index
      %221 = vector.load %arg22[%c0_95, %c0_96] : memref<48x128xf32, #tpu.memory_space<vmem>>, vector<48x128xf32>
      tpu.vector_store %arg22[%c0_95, %c0_96], %220 {strides = array<i32>} : memref<48x128xf32, #tpu.memory_space<vmem>>, vector<48x128xf32>,
    } else {
    }
    %c0 = arith.constant 0 : index
    %c0_1 = arith.constant 0 : index
    %3 = vector.load %arg22[%c0, %c0_1] : memref<48x128xf32, #tpu.memory_space<vmem>>, vector<48x128xf32>
    %c0_2 = arith.constant 0 : index
    %c0_3 = arith.constant 0 : index
    %c0_4 = arith.constant 0 : index
    %4 = vector.load %arg6[%c0_2, %c0_3, %c0_4] : memref<1x1x128xf32, #tpu.memory_space<vmem>>, vector<1x1x128xf32>
    %5 = vector.shape_cast %4 : vector<1x1x128xf32> to vector<1x128xf32>
    %c0_5 = arith.constant 0 : index
    %c0_6 = arith.constant 0 : index
    %c0_7 = arith.constant 0 : index
    %6 = vector.load %arg7[%c0_5, %c0_6, %c0_7] : memref<1x1x128xf32, #tpu.memory_space<vmem>>, vector<1x1x128xf32>
    %7 = vector.shape_cast %6 : vector<1x1x128xf32> to vector<1x128xf32>
    %cst = arith.constant dense<0.000000e+00> : vector<48xf32>
    %8 = vector.multi_reduction <add>, %3, %cst [1] : vector<48x128xf32> to vector<48xf32>
    %9 = vector.shape_cast %8 : vector<48xf32> to vector<48x1xf32>
    %cst_8 = arith.constant 1.280000e+02 : f32
    %10 = vector.broadcast %cst_8 : f32 to vector<48x1xf32>
    %11 = arith.divf %9, %10 : vector<48x1xf32>
    %12 = vector.broadcast %11 : vector<48x1xf32> to vector<48x128xf32>
    %13 = arith.subf %3, %12 : vector<48x128xf32>
    %14 = arith.mulf %13, %13 : vector<48x128xf32>
    %cst_9 = arith.constant dense<0.000000e+00> : vector<48xf32>
    %15 = vector.multi_reduction <add>, %14, %cst_9 [1] : vector<48x128xf32> to vector<48xf32>
    %16 = vector.shape_cast %15 : vector<48xf32> to vector<48x1xf32>
    %cst_10 = arith.constant 1.280000e+02 : f32
    %17 = vector.broadcast %cst_10 : f32 to vector<48x1xf32>
    %18 = arith.divf %16, %17 : vector<48x1xf32>
    %cst_11 = arith.constant 9.99999997E-7 : f32
    %19 = vector.broadcast %cst_11 : f32 to vector<48x1xf32>
    %20 = arith.addf %18, %19 : vector<48x1xf32>
    %21 = math.rsqrt %20 : vector<48x1xf32>
    %22 = vector.broadcast %21 : vector<48x1xf32> to vector<48x128xf32>
    %23 = arith.mulf %13, %22 : vector<48x128xf32>
    %24 = vector.broadcast %5 : vector<1x128xf32> to vector<48x128xf32>
    %25 = arith.mulf %23, %24 : vector<48x128xf32>
    %26 = vector.broadcast %7 : vector<1x128xf32> to vector<48x128xf32>
    %27 = arith.addf %25, %26 : vector<48x128xf32>
    %28 = arith.truncf %27 : vector<48x128xf32> to vector<48x128xbf16>
    %c0_12 = arith.constant 0 : index
    %c0_13 = arith.constant 0 : index
    %c0_14 = arith.constant 0 : index
    %29 = vector.load %arg8[%c0_12, %c0_13, %c0_14] : memref<1x128x384xbf16, #tpu.memory_space<vmem>>, vector<1x128x384xbf16>
    %30 = vector.shape_cast %29 : vector<1x128x384xbf16> to vector<128x384xbf16>
    %cst_15 = arith.constant dense<0.000000e+00> : vector<48x384xf32>
    %31 = tpu.matmul %28, %30, %cst_15 {dimension_numbers = #tpu.dot_dimension_numbers<[1], [0], [0], [1], [0, 0, 1, 1], [], []>} : vector<48x128xbf16>, vector<128x384xbf16>, vector<48x384xf32> -> vector<48x384xf32>
    %c0_16 = arith.constant 0 : index
    %c0_17 = arith.constant 0 : index
    %c0_18 = arith.constant 0 : index
    %32 = vector.load %arg9[%c0_16, %c0_17, %c0_18] : memref<1x1x384xf32, #tpu.memory_space<vmem>>, vector<1x1x384xf32>
    %33 = vector.shape_cast %32 : vector<1x1x384xf32> to vector<1x384xf32>
    %34 = vector.broadcast %33 : vector<1x384xf32> to vector<48x384xf32>
    %35 = arith.addf %31, %34 : vector<48x384xf32>
    %36 = vector.extract_strided_slice %35 {offsets = [0, 0], sizes = [48, 128], strides = [1, 1]} : vector<48x384xf32> to vector<48x128xf32>
    %37 = vector.extract_strided_slice %36 {offsets = [0, 0], sizes = [48, 64], strides = [1, 1]} : vector<48x128xf32> to vector<48x64xf32>
    %38 = vector.shape_cast %37 : vector<48x64xf32> to vector<1x48x64xf32>
    %39 = vector.extract_strided_slice %36 {offsets = [0, 64], sizes = [48, 64], strides = [1, 1]} : vector<48x128xf32> to vector<48x64xf32>
    %40 = vector.shape_cast %39 : vector<48x64xf32> to vector<1x48x64xf32>
    %41 = tpu.concatenate %38, %40 in 0 : vector<1x48x64xf32>, vector<1x48x64xf32> -> vector<2x48x64xf32>
    %42 = arith.truncf %41 : vector<2x48x64xf32> to vector<2x48x64xbf16>
    %43 = vector.extract_strided_slice %35 {offsets = [0, 128], sizes = [48, 128], strides = [1, 1]} : vector<48x384xf32> to vector<48x128xf32>
    %44 = vector.extract_strided_slice %43 {offsets = [0, 0], sizes = [48, 64], strides = [1, 1]} : vector<48x128xf32> to vector<48x64xf32>
    %45 = vector.shape_cast %44 : vector<48x64xf32> to vector<1x48x64xf32>
    %46 = vector.extract_strided_slice %43 {offsets = [0, 64], sizes = [48, 64], strides = [1, 1]} : vector<48x128xf32> to vector<48x64xf32>
    %47 = vector.shape_cast %46 : vector<48x64xf32> to vector<1x48x64xf32>
    %48 = tpu.concatenate %45, %47 in 0 : vector<1x48x64xf32>, vector<1x48x64xf32> -> vector<2x48x64xf32>
    %49 = arith.truncf %48 : vector<2x48x64xf32> to vector<2x48x64xbf16>
    %50 = vector.extract_strided_slice %35 {offsets = [0, 256], sizes = [48, 128], strides = [1, 1]} : vector<48x384xf32> to vector<48x128xf32>
    %51 = vector.extract_strided_slice %50 {offsets = [0, 0], sizes = [48, 64], strides = [1, 1]} : vector<48x128xf32> to vector<48x64xf32>
    %52 = vector.shape_cast %51 : vector<48x64xf32> to vector<1x48x64xf32>
    %53 = vector.extract_strided_slice %50 {offsets = [0, 64], sizes = [48, 64], strides = [1, 1]} : vector<48x128xf32> to vector<48x64xf32>
    %54 = vector.shape_cast %53 : vector<48x64xf32> to vector<1x48x64xf32>
    %55 = tpu.concatenate %52, %54 in 0 : vector<1x48x64xf32>, vector<1x48x64xf32> -> vector<2x48x64xf32>
    %56 = arith.truncf %55 : vector<2x48x64xf32> to vector<2x48x64xbf16>
    %c0_19 = arith.constant 0 : index
    %c0_20 = arith.constant 0 : index
    %c0_21 = arith.constant 0 : index
    %c0_22 = arith.constant 0 : index
    %57 = vector.load %arg10[%c0_19, %c0_20, %c0_21, %c0_22] : memref<1x2x64x128xbf16, #tpu.memory_space<vmem>>, vector<1x2x64x128xbf16>
    %58 = vector.shape_cast %57 : vector<1x2x64x128xbf16> to vector<2x64x128xbf16>
    %c0_23 = arith.constant 0 : index
    %c0_24 = arith.constant 0 : index
    %59 = vector.load %arg5[%c0_23, %c0_24] : memref<1x24xf32, #tpu.memory_space<vmem>>, vector<1x24xf32>
    %60 = vector.shape_cast %59 : vector<1x24xf32> to vector<1x1x24xf32>
    %61 = vector.extract_strided_slice %42 {offsets = [0, 0, 0], sizes = [2, 24, 64], strides = [1, 1, 1]} : vector<2x48x64xbf16> to vector<2x24x64xbf16>
    %62 = vector.extract_strided_slice %49 {offsets = [0, 0, 0], sizes = [2, 24, 64], strides = [1, 1, 1]} : vector<2x48x64xbf16> to vector<2x24x64xbf16>
    %63 = vector.extract_strided_slice %56 {offsets = [0, 0, 0], sizes = [2, 24, 64], strides = [1, 1, 1]} : vector<2x48x64xbf16> to vector<2x24x64xbf16>
    "tpu.trace_start"() <{level = 10 : i32, message = "hqd,hkd->hqk"}> : () -> ()
    %cst_25 = arith.constant dense<0.000000e+00> : vector<2x24x24xf32>
    %64 = tpu.matmul %61, %62, %cst_25 {dimension_numbers = #tpu.dot_dimension_numbers<[2], [2], [1], [1], [0, 0, 0, 1, 1, 1], [0], [0]>} : vector<2x24x64xbf16>, vector<2x24x64xbf16>, vector<2x24x24xf32> -> vector<2x24x24xf32>
    "tpu.trace_stop"() : () -> ()
    %cst_26 = arith.constant 1.250000e-01 : f32
    %65 = vector.broadcast %cst_26 : f32 to vector<2x24x24xf32>
    %66 = arith.mulf %64, %65 : vector<2x24x24xf32>
    %67 = vector.broadcast %60 : vector<1x1x24xf32> to vector<2x24x24xf32>
    %68 = arith.addf %66, %67 : vector<2x24x24xf32>
    %cst_27 = arith.constant dense<0xFF800000> : vector<2x24xf32>
    %69 = vector.multi_reduction <maximumf>, %68, %cst_27 [2] : vector<2x24x24xf32> to vector<2x24xf32>
    %70 = vector.shape_cast %69 : vector<2x24xf32> to vector<2x24x1xf32>
    %71 = vector.broadcast %70 : vector<2x24x1xf32> to vector<2x24x24xf32>
    %72 = arith.subf %68, %71 : vector<2x24x24xf32>
    %73 = math.exp %72 : vector<2x24x24xf32>
    %cst_28 = arith.constant dense<0.000000e+00> : vector<2x24xf32>
    %74 = vector.multi_reduction <add>, %73, %cst_28 [2] : vector<2x24x24xf32> to vector<2x24xf32>
    %75 = vector.shape_cast %74 : vector<2x24xf32> to vector<2x24x1xf32>
    %76 = tpu.reciprocal %75 : vector<2x24x1xf32> -> vector<2x24x1xf32>
    %77 = arith.truncf %73 : vector<2x24x24xf32> to vector<2x24x24xbf16>
    "tpu.trace_start"() <{level = 10 : i32, message = "hqk,hkd->hqd"}> : () -> ()
    %cst_29 = arith.constant dense<0.000000e+00> : vector<2x24x64xf32>
    %78 = tpu.matmul %77, %63, %cst_29 {dimension_numbers = #tpu.dot_dimension_numbers<[2], [1], [1], [2], [0, 0, 0, 1, 1, 2], [0], [0]>} : vector<2x24x24xbf16>, vector<2x24x64xbf16>, vector<2x24x64xf32> -> vector<2x24x64xf32>
    "tpu.trace_stop"() : () -> ()
    %79 = vector.broadcast %76 : vector<2x24x1xf32> to vector<2x24x64xf32>
    %80 = arith.mulf %78, %79 : vector<2x24x64xf32>
    %81 = vector.extract_strided_slice %80 {offsets = [0, 0, 0], sizes = [1, 24, 64], strides = [1, 1, 1]} : vector<2x24x64xf32> to vector<1x24x64xf32>
    %82 = vector.shape_cast %81 : vector<1x24x64xf32> to vector<24x64xf32>
    %83 = arith.truncf %82 : vector<24x64xf32> to vector<24x64xbf16>
    %84 = vector.extract_strided_slice %58 {offsets = [0, 0, 0], sizes = [1, 64, 128], strides = [1, 1, 1]} : vector<2x64x128xbf16> to vector<1x64x128xbf16>
    %85 = vector.shape_cast %84 : vector<1x64x128xbf16> to vector<64x128xbf16>
    %cst_30 = arith.constant dense<0.000000e+00> : vector<24x128xf32>
    %86 = tpu.matmul %83, %85, %cst_30 {dimension_numbers = #tpu.dot_dimension_numbers<[1], [0], [0], [1], [0, 0, 1, 1], [], []>} : vector<24x64xbf16>, vector<64x128xbf16>, vector<24x128xf32> -> vector<24x128xf32>
    %87 = vector.extract_strided_slice %80 {offsets = [1, 0, 0], sizes = [1, 24, 64], strides = [1, 1, 1]} : vector<2x24x64xf32> to vector<1x24x64xf32>
    %88 = vector.shape_cast %87 : vector<1x24x64xf32> to vector<24x64xf32>
    %89 = arith.truncf %88 : vector<24x64xf32> to vector<24x64xbf16>
    %90 = vector.extract_strided_slice %58 {offsets = [1, 0, 0], sizes = [1, 64, 128], strides = [1, 1, 1]} : vector<2x64x128xbf16> to vector<1x64x128xbf16>
    %91 = vector.shape_cast %90 : vector<1x64x128xbf16> to vector<64x128xbf16>
    %cst_31 = arith.constant dense<0.000000e+00> : vector<24x128xf32>
    %92 = tpu.matmul %89, %91, %cst_31 {dimension_numbers = #tpu.dot_dimension_numbers<[1], [0], [0], [1], [0, 0, 1, 1], [], []>} : vector<24x64xbf16>, vector<64x128xbf16>, vector<24x128xf32> -> vector<24x128xf32>
    %93 = arith.addf %86, %92 : vector<24x128xf32>
    %94 = vector.extract_strided_slice %42 {offsets = [0, 24, 0], sizes = [2, 24, 64], strides = [1, 1, 1]} : vector<2x48x64xbf16> to vector<2x24x64xbf16>
    %95 = vector.extract_strided_slice %49 {offsets = [0, 24, 0], sizes = [2, 24, 64], strides = [1, 1, 1]} : vector<2x48x64xbf16> to vector<2x24x64xbf16>
    %96 = vector.extract_strided_slice %56 {offsets = [0, 24, 0], sizes = [2, 24, 64], strides = [1, 1, 1]} : vector<2x48x64xbf16> to vector<2x24x64xbf16>
    "tpu.trace_start"() <{level = 10 : i32, message = "hqd,hkd->hqk"}> : () -> ()
    %cst_32 = arith.constant dense<0.000000e+00> : vector<2x24x24xf32>
    %97 = tpu.matmul %94, %95, %cst_32 {dimension_numbers = #tpu.dot_dimension_numbers<[2], [2], [1], [1], [0, 0, 0, 1, 1, 1], [0], [0]>} : vector<2x24x64xbf16>, vector<2x24x64xbf16>, vector<2x24x24xf32> -> vector<2x24x24xf32>
    "tpu.trace_stop"() : () -> ()
    %cst_33 = arith.constant 1.250000e-01 : f32
    %98 = vector.broadcast %cst_33 : f32 to vector<2x24x24xf32>
    %99 = arith.mulf %97, %98 : vector<2x24x24xf32>
    %100 = vector.broadcast %60 : vector<1x1x24xf32> to vector<2x24x24xf32>
    %101 = arith.addf %99, %100 : vector<2x24x24xf32>
    %cst_34 = arith.constant dense<0xFF800000> : vector<2x24xf32>
    %102 = vector.multi_reduction <maximumf>, %101, %cst_34 [2] : vector<2x24x24xf32> to vector<2x24xf32>
    %103 = vector.shape_cast %102 : vector<2x24xf32> to vector<2x24x1xf32>
    %104 = vector.broadcast %103 : vector<2x24x1xf32> to vector<2x24x24xf32>
    %105 = arith.subf %101, %104 : vector<2x24x24xf32>
    %106 = math.exp %105 : vector<2x24x24xf32>
    %cst_35 = arith.constant dense<0.000000e+00> : vector<2x24xf32>
    %107 = vector.multi_reduction <add>, %106, %cst_35 [2] : vector<2x24x24xf32> to vector<2x24xf32>
    %108 = vector.shape_cast %107 : vector<2x24xf32> to vector<2x24x1xf32>
    %109 = tpu.reciprocal %108 : vector<2x24x1xf32> -> vector<2x24x1xf32>
    %110 = arith.truncf %106 : vector<2x24x24xf32> to vector<2x24x24xbf16>
    "tpu.trace_start"() <{level = 10 : i32, message = "hqk,hkd->hqd"}> : () -> ()
    %cst_36 = arith.constant dense<0.000000e+00> : vector<2x24x64xf32>
    %111 = tpu.matmul %110, %96, %cst_36 {dimension_numbers = #tpu.dot_dimension_numbers<[2], [1], [1], [2], [0, 0, 0, 1, 1, 2], [0], [0]>} : vector<2x24x24xbf16>, vector<2x24x64xbf16>, vector<2x24x64xf32> -> vector<2x24x64xf32>
    "tpu.trace_stop"() : () -> ()
    %112 = vector.broadcast %109 : vector<2x24x1xf32> to vector<2x24x64xf32>
    %113 = arith.mulf %111, %112 : vector<2x24x64xf32>
    %114 = vector.extract_strided_slice %113 {offsets = [0, 0, 0], sizes = [1, 24, 64], strides = [1, 1, 1]} : vector<2x24x64xf32> to vector<1x24x64xf32>
    %115 = vector.shape_cast %114 : vector<1x24x64xf32> to vector<24x64xf32>
    %116 = arith.truncf %115 : vector<24x64xf32> to vector<24x64xbf16>
    %117 = vector.extract_strided_slice %58 {offsets = [0, 0, 0], sizes = [1, 64, 128], strides = [1, 1, 1]} : vector<2x64x128xbf16> to vector<1x64x128xbf16>
    %118 = vector.shape_cast %117 : vector<1x64x128xbf16> to vector<64x128xbf16>
    %cst_37 = arith.constant dense<0.000000e+00> : vector<24x128xf32>
    %119 = tpu.matmul %116, %118, %cst_37 {dimension_numbers = #tpu.dot_dimension_numbers<[1], [0], [0], [1], [0, 0, 1, 1], [], []>} : vector<24x64xbf16>, vector<64x128xbf16>, vector<24x128xf32> -> vector<24x128xf32>
    %120 = vector.extract_strided_slice %113 {offsets = [1, 0, 0], sizes = [1, 24, 64], strides = [1, 1, 1]} : vector<2x24x64xf32> to vector<1x24x64xf32>
    %121 = vector.shape_cast %120 : vector<1x24x64xf32> to vector<24x64xf32>
    %122 = arith.truncf %121 : vector<24x64xf32> to vector<24x64xbf16>
    %123 = vector.extract_strided_slice %58 {offsets = [1, 0, 0], sizes = [1, 64, 128], strides = [1, 1, 1]} : vector<2x64x128xbf16> to vector<1x64x128xbf16>
    %124 = vector.shape_cast %123 : vector<1x64x128xbf16> to vector<64x128xbf16>
    %cst_38 = arith.constant dense<0.000000e+00> : vector<24x128xf32>
    %125 = tpu.matmul %122, %124, %cst_38 {dimension_numbers = #tpu.dot_dimension_numbers<[1], [0], [0], [1], [0, 0, 1, 1], [], []>} : vector<24x64xbf16>, vector<64x128xbf16>, vector<24x128xf32> -> vector<24x128xf32>
    %126 = arith.addf %119, %125 : vector<24x128xf32>
    %127 = tpu.concatenate %93, %126 in 0 : vector<24x128xf32>, vector<24x128xf32> -> vector<48x128xf32>
    %c0_39 = arith.constant 0 : index
    %c0_40 = arith.constant 0 : index
    %c0_41 = arith.constant 0 : index
    %128 = vector.load %arg11[%c0_39, %c0_40, %c0_41] : memref<1x1x128xf32, #tpu.memory_space<vmem>>, vector<1x1x128xf32>
    %129 = vector.shape_cast %128 : vector<1x1x128xf32> to vector<1x128xf32>
    %130 = vector.broadcast %129 : vector<1x128xf32> to vector<48x128xf32>
    %131 = arith.addf %127, %130 : vector<48x128xf32>
    %c0_42 = arith.constant 0 : index
    %c0_43 = arith.constant 0 : index
    %c0_44 = arith.constant 0 : index
    %132 = vector.load %arg12[%c0_42, %c0_43, %c0_44] : memref<1x1x128xf32, #tpu.memory_space<vmem>>, vector<1x1x128xf32>
    %133 = vector.shape_cast %132 : vector<1x1x128xf32> to vector<1x128xf32>
    %134 = vector.broadcast %133 : vector<1x128xf32> to vector<48x128xf32>
    %135 = arith.mulf %134, %131 : vector<48x128xf32>
    %136 = arith.addf %3, %135 : vector<48x128xf32>
    %c0_45 = arith.constant 0 : index
    %c0_46 = arith.constant 0 : index
    %c0_47 = arith.constant 0 : index
    %137 = vector.load %arg13[%c0_45, %c0_46, %c0_47] : memref<1x1x128xf32, #tpu.memory_space<vmem>>, vector<1x1x128xf32>
    %138 = vector.shape_cast %137 : vector<1x1x128xf32> to vector<1x128xf32>
    %c0_48 = arith.constant 0 : index
    %c0_49 = arith.constant 0 : index
    %c0_50 = arith.constant 0 : index
    %139 = vector.load %arg14[%c0_48, %c0_49, %c0_50] : memref<1x1x128xf32, #tpu.memory_space<vmem>>, vector<1x1x128xf32>
    %140 = vector.shape_cast %139 : vector<1x1x128xf32> to vector<1x128xf32>
    %cst_51 = arith.constant dense<0.000000e+00> : vector<48xf32>
    %141 = vector.multi_reduction <add>, %136, %cst_51 [1] : vector<48x128xf32> to vector<48xf32>
    %142 = vector.shape_cast %141 : vector<48xf32> to vector<48x1xf32>
    %cst_52 = arith.constant 1.280000e+02 : f32
    %143 = vector.broadcast %cst_52 : f32 to vector<48x1xf32>
    %144 = arith.divf %142, %143 : vector<48x1xf32>
    %145 = vector.broadcast %144 : vector<48x1xf32> to vector<48x128xf32>
    %146 = arith.subf %136, %145 : vector<48x128xf32>
    %147 = arith.mulf %146, %146 : vector<48x128xf32>
    %cst_53 = arith.constant dense<0.000000e+00> : vector<48xf32>
    %148 = vector.multi_reduction <add>, %147, %cst_53 [1] : vector<48x128xf32> to vector<48xf32>
    %149 = vector.shape_cast %148 : vector<48xf32> to vector<48x1xf32>
    %cst_54 = arith.constant 1.280000e+02 : f32
    %150 = vector.broadcast %cst_54 : f32 to vector<48x1xf32>
    %151 = arith.divf %149, %150 : vector<48x1xf32>
    %cst_55 = arith.constant 9.99999997E-7 : f32
    %152 = vector.broadcast %cst_55 : f32 to vector<48x1xf32>
    %153 = arith.addf %151, %152 : vector<48x1xf32>
    %154 = math.rsqrt %153 : vector<48x1xf32>
    %155 = vector.broadcast %154 : vector<48x1xf32> to vector<48x128xf32>
    %156 = arith.mulf %146, %155 : vector<48x128xf32>
    %157 = vector.broadcast %138 : vector<1x128xf32> to vector<48x128xf32>
    %158 = arith.mulf %156, %157 : vector<48x128xf32>
    %159 = vector.broadcast %140 : vector<1x128xf32> to vector<48x128xf32>
    %160 = arith.addf %158, %159 : vector<48x128xf32>
    %161 = arith.truncf %160 : vector<48x128xf32> to vector<48x128xbf16>
    %c0_56 = arith.constant 0 : index
    %c0_57 = arith.constant 0 : index
    %c0_58 = arith.constant 0 : index
    %162 = vector.load %arg15[%c0_56, %c0_57, %c0_58] : memref<1x128x512xbf16, #tpu.memory_space<vmem>>, vector<1x128x512xbf16>
    %163 = vector.shape_cast %162 : vector<1x128x512xbf16> to vector<128x512xbf16>
    %cst_59 = arith.constant dense<0.000000e+00> : vector<48x512xf32>
    %164 = tpu.matmul %161, %163, %cst_59 {dimension_numbers = #tpu.dot_dimension_numbers<[1], [0], [0], [1], [0, 0, 1, 1], [], []>} : vector<48x128xbf16>, vector<128x512xbf16>, vector<48x512xf32> -> vector<48x512xf32>
    %c0_60 = arith.constant 0 : index
    %c0_61 = arith.constant 0 : index
    %c0_62 = arith.constant 0 : index
    %165 = vector.load %arg16[%c0_60, %c0_61, %c0_62] : memref<1x1x512xf32, #tpu.memory_space<vmem>>, vector<1x1x512xf32>
    %166 = vector.shape_cast %165 : vector<1x1x512xf32> to vector<1x512xf32>
    %167 = vector.broadcast %166 : vector<1x512xf32> to vector<48x512xf32>
    %168 = arith.addf %164, %167 : vector<48x512xf32>
    %cst_63 = arith.constant 5.000000e-01 : f32
    %169 = vector.broadcast %cst_63 : f32 to vector<48x512xf32>
    %170 = arith.mulf %169, %168 : vector<48x512xf32>
    %cst_64 = arith.constant 4.471500e-02 : f32
    %171 = vector.broadcast %cst_64 : f32 to vector<48x512xf32>
    %172 = arith.mulf %171, %168 : vector<48x512xf32>
    %173 = arith.mulf %172, %168 : vector<48x512xf32>
    %174 = arith.mulf %173, %168 : vector<48x512xf32>
    %175 = arith.addf %168, %174 : vector<48x512xf32>
    %cst_65 = arith.constant 0.797884583 : f32
    %176 = vector.broadcast %cst_65 : f32 to vector<48x512xf32>
    %177 = arith.mulf %176, %175 : vector<48x512xf32>
    %178 = math.tanh %177 : vector<48x512xf32>
    %cst_66 = arith.constant 1.000000e+00 : f32
    %179 = vector.broadcast %cst_66 : f32 to vector<48x512xf32>
    %180 = arith.addf %179, %178 : vector<48x512xf32>
    %181 = arith.mulf %170, %180 : vector<48x512xf32>
    %182 = arith.truncf %181 : vector<48x512xf32> to vector<48x512xbf16>
    %c0_67 = arith.constant 0 : index
    %c0_68 = arith.constant 0 : index
    %c0_69 = arith.constant 0 : index
    %183 = vector.load %arg17[%c0_67, %c0_68, %c0_69] : memref<1x512x128xbf16, #tpu.memory_space<vmem>>, vector<1x512x128xbf16>
    %184 = vector.shape_cast %183 : vector<1x512x128xbf16> to vector<512x128xbf16>
    %cst_70 = arith.constant dense<0.000000e+00> : vector<48x128xf32>
    %185 = tpu.matmul %182, %184, %cst_70 {dimension_numbers = #tpu.dot_dimension_numbers<[1], [0], [0], [1], [0, 0, 1, 1], [], []>} : vector<48x512xbf16>, vector<512x128xbf16>, vector<48x128xf32> -> vector<48x128xf32>
    %c0_71 = arith.constant 0 : index
    %c0_72 = arith.constant 0 : index
    %c0_73 = arith.constant 0 : index
    %186 = vector.load %arg18[%c0_71, %c0_72, %c0_73] : memref<1x1x128xf32, #tpu.memory_space<vmem>>, vector<1x1x128xf32>
    %187 = vector.shape_cast %186 : vector<1x1x128xf32> to vector<1x128xf32>
    %188 = vector.broadcast %187 : vector<1x128xf32> to vector<48x128xf32>
    %189 = arith.addf %185, %188 : vector<48x128xf32>
    %c0_74 = arith.constant 0 : index
    %c0_75 = arith.constant 0 : index
    %c0_76 = arith.constant 0 : index
    %190 = vector.load %arg19[%c0_74, %c0_75, %c0_76] : memref<1x1x128xf32, #tpu.memory_space<vmem>>, vector<1x1x128xf32>
    %191 = vector.shape_cast %190 : vector<1x1x128xf32> to vector<1x128xf32>
    %192 = vector.broadcast %191 : vector<1x128xf32> to vector<48x128xf32>
    %193 = arith.mulf %192, %189 : vector<48x128xf32>
    %194 = arith.addf %136, %193 : vector<48x128xf32>
    %c1_i32 = arith.constant 1 : i32
    %195 = arith.cmpi eq, %arg0, %c1_i32 : i32
    %196 = arith.extui %195 : i1 to i32
    %c0_i32_77 = arith.constant 0 : i32
    %197 = arith.cmpi ne, %196, %c0_i32_77 : i32
    scf.if %197 {
      %c0_80 = arith.constant 0 : index
      %c0_81 = arith.constant 0 : index
      %201 = vector.load %arg20[%c0_80, %c0_81] : memref<1x128xf32, #tpu.memory_space<vmem>>, vector<1x128xf32>
      %c0_82 = arith.constant 0 : index
      %c0_83 = arith.constant 0 : index
      %202 = vector.load %arg21[%c0_82, %c0_83] : memref<1x128xf32, #tpu.memory_space<vmem>>, vector<1x128xf32>
      %cst_84 = arith.constant dense<0.000000e+00> : vector<48xf32>
      %203 = vector.multi_reduction <add>, %194, %cst_84 [1] : vector<48x128xf32> to vector<48xf32>
      %204 = vector.shape_cast %203 : vector<48xf32> to vector<48x1xf32>
      %cst_85 = arith.constant 1.280000e+02 : f32
      %205 = vector.broadcast %cst_85 : f32 to vector<48x1xf32>
      %206 = arith.divf %204, %205 : vector<48x1xf32>
      %207 = vector.broadcast %206 : vector<48x1xf32> to vector<48x128xf32>
      %208 = arith.subf %194, %207 : vector<48x128xf32>
      %209 = arith.mulf %208, %208 : vector<48x128xf32>
      %cst_86 = arith.constant dense<0.000000e+00> : vector<48xf32>
      %210 = vector.multi_reduction <add>, %209, %cst_86 [1] : vector<48x128xf32> to vector<48xf32>
      %211 = vector.shape_cast %210 : vector<48xf32> to vector<48x1xf32>
      %cst_87 = arith.constant 1.280000e+02 : f32
      %212 = vector.broadcast %cst_87 : f32 to vector<48x1xf32>
      %213 = arith.divf %211, %212 : vector<48x1xf32>
      %cst_88 = arith.constant 9.99999997E-7 : f32
      %214 = vector.broadcast %cst_88 : f32 to vector<48x1xf32>
      %215 = arith.addf %213, %214 : vector<48x1xf32>
      %216 = math.rsqrt %215 : vector<48x1xf32>
      %217 = vector.broadcast %216 : vector<48x1xf32> to vector<48x128xf32>
      %218 = arith.mulf %208, %217 : vector<48x128xf32>
      %219 = vector.broadcast %201 : vector<1x128xf32> to vector<48x128xf32>
      %220 = arith.mulf %218, %219 : vector<48x128xf32>
      %221 = vector.broadcast %202 : vector<1x128xf32> to vector<48x128xf32>
      %222 = arith.addf %220, %221 : vector<48x128xf32>
      %c0_89 = arith.constant 0 : index
      %c0_90 = arith.constant 0 : index
      %223 = vector.load %arg22[%c0_89, %c0_90] : memref<48x128xf32, #tpu.memory_space<vmem>>, vector<48x128xf32>
      tpu.vector_store %arg22[%c0_89, %c0_90], %222 {strides = array<i32>} : memref<48x128xf32, #tpu.memory_space<vmem>>, vector<48x128xf32>,
    } else {
    }
    %c1_i32_78 = arith.constant 1 : i32
    %198 = arith.cmpi ne, %arg0, %c1_i32_78 : i32
    %199 = arith.extui %198 : i1 to i32
    %c0_i32_79 = arith.constant 0 : i32
    %200 = arith.cmpi ne, %199, %c0_i32_79 : i32
    scf.if %200 {
      %c0_80 = arith.constant 0 : index
      %c0_81 = arith.constant 0 : index
      %201 = vector.load %arg22[%c0_80, %c0_81] : memref<48x128xf32, #tpu.memory_space<vmem>>, vector<48x128xf32>
      tpu.vector_store %arg22[%c0_80, %c0_81], %194 {strides = array<i32>} : memref<48x128xf32, #tpu.memory_space<vmem>>, vector<48x128xf32>,
    } else {
    }
    return
  }
  func.func @transform_0(%arg0: i32) -> (i32, i32) {
    %c0_i32 = arith.constant 0 : i32
    %c0_i32_0 = arith.constant 0 : i32
    %c0_i32_1 = arith.constant 0 : i32
    return %c0_i32, %c0_i32_0 : i32, i32
  }
  func.func @transform_1(%arg0: i32) -> (i32, i32) {
    %c0_i32 = arith.constant 0 : i32
    %c0_i32_0 = arith.constant 0 : i32
    %c0_i32_1 = arith.constant 0 : i32
    return %c0_i32, %c0_i32_0 : i32, i32
  }
  func.func @transform_2(%arg0: i32) -> (i32, i32) {
    %c0_i32 = arith.constant 0 : i32
    %c0_i32_0 = arith.constant 0 : i32
    %c0_i32_1 = arith.constant 0 : i32
    return %c0_i32, %c0_i32_0 : i32, i32
  }
  func.func @transform_3(%arg0: i32) -> (i32, i32) {
    %c0_i32 = arith.constant 0 : i32
    %c0_i32_0 = arith.constant 0 : i32
    %c0_i32_1 = arith.constant 0 : i32
    return %c0_i32, %c0_i32_0 : i32, i32
  }
  func.func @transform_4(%arg0: i32) -> (i32, i32) {
    %c0_i32 = arith.constant 0 : i32
    %c0_i32_0 = arith.constant 0 : i32
    %c0_i32_1 = arith.constant 0 : i32
    return %c0_i32, %c0_i32_0 : i32, i32
  }
  func.func @transform_5(%arg0: i32) -> (i32, i32, i32) {
    %c0_i32 = arith.constant 0 : i32
    %c0_i32_0 = arith.constant 0 : i32
    %c0_i32_1 = arith.constant 0 : i32
    return %arg0, %c0_i32, %c0_i32_0 : i32, i32, i32
  }
  func.func @transform_6(%arg0: i32) -> (i32, i32, i32) {
    %c0_i32 = arith.constant 0 : i32
    %c0_i32_0 = arith.constant 0 : i32
    %c0_i32_1 = arith.constant 0 : i32
    return %arg0, %c0_i32, %c0_i32_0 : i32, i32, i32
  }
  func.func @transform_7(%arg0: i32) -> (i32, i32, i32) {
    %c0_i32 = arith.constant 0 : i32
    %c0_i32_0 = arith.constant 0 : i32
    %c0_i32_1 = arith.constant 0 : i32
    return %arg0, %c0_i32, %c0_i32_0 : i32, i32, i32
  }
  func.func @transform_8(%arg0: i32) -> (i32, i32, i32) {
    %c0_i32 = arith.constant 0 : i32
    %c0_i32_0 = arith.constant 0 : i32
    %c0_i32_1 = arith.constant 0 : i32
    return %arg0, %c0_i32, %c0_i32_0 : i32, i32, i32
  }
  func.func @transform_9(%arg0: i32) -> (i32, i32, i32, i32) {
    %c0_i32 = arith.constant 0 : i32
    %c0_i32_0 = arith.constant 0 : i32
    %c0_i32_1 = arith.constant 0 : i32
    %c0_i32_2 = arith.constant 0 : i32
    return %arg0, %c0_i32, %c0_i32_0, %c0_i32_1 : i32, i32, i32, i32
  }
  func.func @transform_10(%arg0: i32) -> (i32, i32, i32) {
    %c0_i32 = arith.constant 0 : i32
    %c0_i32_0 = arith.constant 0 : i32
    %c0_i32_1 = arith.constant 0 : i32
    return %arg0, %c0_i32, %c0_i32_0 : i32, i32, i32
  }
  func.func @transform_11(%arg0: i32) -> (i32, i32, i32) {
    %c0_i32 = arith.constant 0 : i32
    %c0_i32_0 = arith.constant 0 : i32
    %c0_i32_1 = arith.constant 0 : i32
    return %arg0, %c0_i32, %c0_i32_0 : i32, i32, i32
  }
  func.func @transform_12(%arg0: i32) -> (i32, i32, i32) {
    %c0_i32 = arith.constant 0 : i32
    %c0_i32_0 = arith.constant 0 : i32
    %c0_i32_1 = arith.constant 0 : i32
    return %arg0, %c0_i32, %c0_i32_0 : i32, i32, i32
  }
  func.func @transform_13(%arg0: i32) -> (i32, i32, i32) {
    %c0_i32 = arith.constant 0 : i32
    %c0_i32_0 = arith.constant 0 : i32
    %c0_i32_1 = arith.constant 0 : i32
    return %arg0, %c0_i32, %c0_i32_0 : i32, i32, i32
  }
  func.func @transform_14(%arg0: i32) -> (i32, i32, i32) {
    %c0_i32 = arith.constant 0 : i32
    %c0_i32_0 = arith.constant 0 : i32
    %c0_i32_1 = arith.constant 0 : i32
    return %arg0, %c0_i32, %c0_i32_0 : i32, i32, i32
  }
  func.func @transform_15(%arg0: i32) -> (i32, i32, i32) {
    %c0_i32 = arith.constant 0 : i32
    %c0_i32_0 = arith.constant 0 : i32
    %c0_i32_1 = arith.constant 0 : i32
    return %arg0, %c0_i32, %c0_i32_0 : i32, i32, i32
  }
  func.func @transform_16(%arg0: i32) -> (i32, i32, i32) {
    %c0_i32 = arith.constant 0 : i32
    %c0_i32_0 = arith.constant 0 : i32
    %c0_i32_1 = arith.constant 0 : i32
    return %arg0, %c0_i32, %c0_i32_0 : i32, i32, i32
  }
  func.func @transform_17(%arg0: i32) -> (i32, i32, i32) {
    %c0_i32 = arith.constant 0 : i32
    %c0_i32_0 = arith.constant 0 : i32
    %c0_i32_1 = arith.constant 0 : i32
    return %arg0, %c0_i32, %c0_i32_0 : i32, i32, i32
  }
  func.func @transform_18(%arg0: i32) -> (i32, i32, i32) {
    %c0_i32 = arith.constant 0 : i32
    %c0_i32_0 = arith.constant 0 : i32
    %c0_i32_1 = arith.constant 0 : i32
    return %arg0, %c0_i32, %c0_i32_0 : i32, i32, i32
  }
  func.func @transform_19(%arg0: i32) -> (i32, i32) {
    %c0_i32 = arith.constant 0 : i32
    %c0_i32_0 = arith.constant 0 : i32
    %c0_i32_1 = arith.constant 0 : i32
    return %c0_i32, %c0_i32_0 : i32, i32
  }
  func.func @transform_20(%arg0: i32) -> (i32, i32) {
    %c0_i32 = arith.constant 0 : i32
    %c0_i32_0 = arith.constant 0 : i32
    %c0_i32_1 = arith.constant 0 : i32
    return %c0_i32, %c0_i32_0 : i32, i32
  }
  func.func @transform_21(%arg0: i32) -> (i32, i32) {
    %c0_i32 = arith.constant 0 : i32
    %c0_i32_0 = arith.constant 0 : i32
    %c0_i32_1 = arith.constant 0 : i32
    return %c0_i32, %c0_i32_0 : i32, i32
  }
}

</mosaic_0001>

<bundles_post_ra>
// kernel: tpu_custom_call.1
= control target key start
LH: loop header
LB: loop body
LE: loop exit
PB: predicated region body
PF: predicated region fallthrough
CT: control target
= control target key end

     0   :  { %s6706_s0 = inlined_call_operand.hbm [shape: f32[32,48], index: 0, kind: input, shape index: {}]   ;;  %s6707_s1 = inlined_call_operand.hbm [shape: bf16[48,128], index: 1, kind: input, shape index: {}]   ;;  %s6708_s2 = inlined_call_operand.hbm [shape: f32[1,128], index: 2, kind: input, shape index: {}]   ;;  %s6709_s3 = inlined_call_operand.hbm [shape: f32[24,128], index: 3, kind: input, shape index: {}]   ;;  %s6710_s4 = inlined_call_operand.hbm [shape: f32[1,24], index: 4, kind: input, shape index: {}]   ;;  %s6711_s5 = inlined_call_operand.vmem [shape: f32[2,1,128], index: 5, kind: input, shape index: {}]   ;;  %s6712_s6 = inlined_call_operand.vmem [shape: f32[2,1,128], index: 6, kind: input, shape index: {}]   ;;  %s6713_s7 = inlined_call_operand.hbm [shape: bf16[2,128,384], index: 7, kind: input, shape index: {}]   ;;  %s6714_s8 = inlined_call_operand.vmem [shape: f32[2,1,384], index: 8, kind: input, shape index: {}]   ;;  %s6715_s9 = inlined_call_operand.hbm [shape: bf16[2,2,64,128], index: 9, kind: input, shape index: {}]   ;;  %s6716_s10 = inlined_call_operand.vmem [shape: f32[2,1,128], index: 10, kind: input, shape index: {}]   ;;  %s6717_s11 = inlined_call_operand.vmem [shape: f32[2,1,128], index: 11, kind: input, shape index: {}]   ;;  %s6718_s12 = inlined_call_operand.vmem [shape: f32[2,1,128], index: 12, kind: input, shape index: {}]   ;;  %s6719_s13 = inlined_call_operand.vmem [shape: f32[2,1,128], index: 13, kind: input, shape index: {}]   ;;  %s6720_s14 = inlined_call_operand.hbm [shape: bf16[2,128,512], index: 14, kind: input, shape index: {}]   ;;  %s6721_s15 = inlined_call_operand.vmem [shape: f32[2,1,512], index: 15, kind: input, shape index: {}]   ;;  %s6722_s16 = inlined_call_operand.hbm [shape: bf16[2,512,128], index: 16, kind: input, shape index: {}]   ;;  %s6723_s17 = inlined_call_operand.vmem [shape: f32[2,1,128], index: 17, kind: input, shape index: {}]   ;;  %s6724_s18 = inlined_call_operand.vmem [shape: f32[2,1,128], index: 18, kind: input, shape index: {}]   ;;  %s6725_s19 = inlined_call_operand.vmem [shape: f32[1,128], index: 19, kind: input, shape index: {}]   ;;  %s6726_s20 = inlined_call_operand.vmem [shape: f32[1,128], index: 20, kind: input, shape index: {}]   ;;  %s6727_s21 = inlined_call_operand.hbm [shape: f32[48,128], index: 21, kind: output, shape index: {}]  }
   0x1   :  { %6761 = sst [smem:[#allocation29_spill]] %s6706_s0 }
   0x2   :  { %6762 = sst [smem:[#allocation30_spill]] %s6707_s1 }
   0x3   :  { %6763 = sst [smem:[#allocation31_spill]] %s6708_s2 }
   0x4   :  { %6764 = sst [smem:[#allocation32_spill]] %s6709_s3 }
   0x5   :  { %6765 = sst [smem:[#allocation33_spill]] %s6710_s4 }
   0x6   :  { %6766 = sst [smem:[#allocation34_spill]] %s6711_s5 }
   0x7   :  { %6767 = sst [smem:[#allocation35_spill]] %s6712_s6 }
   0x8   :  { %6768 = sst [smem:[#allocation36_spill]] %s6713_s7 }
   0x9   :  { %6769 = sst [smem:[#allocation37_spill]] %s6714_s8 }
   0xa   :  { %6770 = sst [smem:[#allocation38_spill]] %s6715_s9 }
   0xb   :  { %6771 = sst [smem:[#allocation39_spill]] %s6716_s10 }
   0xc   :  { %6772 = sst [smem:[#allocation40_spill]] %s6717_s11 }
   0xd   :  { %6773 = sst [smem:[#allocation41_spill]] %s6718_s12 }
   0xe   :  { %6774 = sst [smem:[#allocation42_spill]] %s6719_s13 }
   0xf   :  { %6775 = sst [smem:[#allocation43_spill]] %s6720_s14 }
  0x10   :  { %6776 = sst [smem:[#allocation44_spill]] %s6721_s15 }
  0x11   :  { %6777 = sst [smem:[#allocation45_spill]] %s6723_s17 }
  0x12   :  { %6778 = sst [smem:[#allocation46_spill]] %s6724_s18 }
  0x13   :  { %6779 = sst [smem:[#allocation47_spill]] %s6725_s19 }
  0x14   :  { %6780 = sst [smem:[#allocation48_spill]] %s6726_s20 }
  0x15   :  { %6781 = sst [smem:[#allocation49_spill]] %s6727_s21 }
  0x16   :  { %26 = vsyncpa [#allocation3], 0 }
  0x17   :  { %27 = vsyncpa [#allocation6], 0 }
  0x18   :  { %28 = vsyncpa [#allocation9], 0 }
  0x19   :  { %29 = vsyncpa [#allocation12], 0 }
  0x1a   :  { %31 = vsyncpa [#allocation12 + $0x1], 0 }
  0x1b   :  { %32 = vsyncpa [#allocation15], 0 }
  0x1c   :  { %34 = vsyncpa [#allocation15 + $0x1], 0 }
  0x1d   :  { %35 = vsyncpa [#allocation4], 0  ;;  %s5438_s2 = smov 0   ;;  %s5440_s25 = smov 0  }
  0x1e   :  { %s5442_s26 = smov 0   ;;  %s5444_s27 = smov 0  }
  0x1f LB: > { %6782 = sst [smem:[#allocation24_spill]] %s5294_s25  ;;  %s5304_s3 = smov [#allocation5]   ;;  %s5302_s27 = sphi %s5444_s27, %s6846_s27   ;;  %s5298_s26 = sphi %s5442_s26, %s6849_s26   ;;  %s5294_s25 = sphi %s5440_s25, %s6848_s25   ;;  %s5290_s2 = sphi %s5438_s2, %s6847_s2  }
  0x20   : > { %6783 = sst [smem:[#allocation25_spill]] %s5298_s26  ;;  %s603_s28 = sshll.u32 %s5304_s3, 4  ;;  %s5465_s28 = int_to_ptr.vmem [resolvable:$true] %s603_s28 }
  0x21   : > { %s5459_s29 = sadd.s32 4294967295, %s5302_s27   ;;  %p4050_p0 = scmp.ge.s32.totalorder %s5302_s27, 1 }
  0x22   : > { %p6742_p1 = scmp.eq.s32.totalorder %s5459_s29, 0  ;;  %p578_p2 = scmp.lt.s32.totalorder %s5302_s27, 3 }
  0x23   : > { %s5305_s30 = smov [#allocation8]   ;;  %s6786_s1 = sld [smem:[#allocation30_spill]] }
  0x24   : > { %p5467_p4 = pnand %p4050_p0, %p578_p2  ;;  %s627_s5 = sshll.u32 %s5305_s30, 4  ;;  %s5479_s5 = int_to_ptr.vmem [resolvable:$true] %s627_s5 }
  0x26   : > { %s6784_s0 = scalar_select %p5467_p4, 1, 0 }
  0x27   : > { %p4562_p5 = pneg %p5467_p4 }
  0x29   : > { %p5475_p6 = pnand %p4562_p5, %p6742_p1  ;;  %s4962_s24 = scalar_lea.hbm %s6786_s1, 384 }
  0x2a   : > { %p4963_p7 = scmp.ne.s32.totalorder %s6786_s1, %s4962_s24  ;;  %p4969_p11 = scmp.lt.u32.totalorder %s4962_s24, %s6786_s1 }
  0x2b   : > { %s6785_s4 = scalar_select %p5475_p6, 1, 0 }
  0x2c   : > { %p5489_p8 = pneg %p5475_p6 }
  0x2e   : > { %s6787_s20 = scalar_select %p5489_p8, 1, 0 }
  0x2f   : > { %p4965_p9 = pnand %p5489_p8, %p4963_p7 }
  0x31   : > { %p4966_p10 = pneg %p4965_p9 }
  0x33   : > { %p4971_p12 = pnand %p4969_p11, %p4966_p10 }
  0x35   : > { %4974 = shalt.err (!%p4971_p12)
}
  0x36   : > { %s4975_s21 = scalar_lea.vmem %s5465_s28, 384  ;;  %p4983_p5 = scmp.lt.s32.totalorder %s5465_s28, %s5465_s28 }
  0x37   : > { %p4976_p13 = scmp.ne.s32.totalorder %s5465_s28, %s4975_s21  ;;  %p4984_p3 = scmp.lt.s32.totalorder %s4975_s21, %s4975_s21 }
  0x39   : > { %p4978_p0 = pnand %p4976_p13, %p5489_p8  ;;  %p4985_p7 = por %p4984_p3, %p4983_p5 }
  0x3b   : > { %p4979_p2 = pneg %p4978_p0 }
  0x3d   : > { %p4986_p9 = pnand %p4985_p7, %p4979_p2 }
  0x3f   : > { %4989 = shalt.err (!%p4986_p9)
}
  0x40   : > { %s6734_s22 = smov 64   ;;  %s6736_s19 = smov 4  }
  0x41   : > { %4568 = dma.hbm_to_vmem [thread:$0]  (!%p5475_p6), %s6786_s1, 384, %s5465_s28, [#allocation6], %s6734_s22, %s6734_s22, %s6736_s19  }
  0x42   : > { %s6788_s18 = sld [smem:[#allocation32_spill]] }
  0x48   : > { %s4990_s21 = scalar_lea.hbm %s6788_s18, 384 }
  0x49   : > { %p4991_p3 = scmp.ne.s32.totalorder %s6788_s18, %s4990_s21  ;;  %p4997_p12 = scmp.lt.u32.totalorder %s4990_s21, %s6788_s18 }
  0x4b   : > { %p4993_p10 = pnand %p4991_p3, %p5489_p8 }
  0x4d   : > { %p4994_p11 = pneg %p4993_p10 }
  0x4f   : > { %p4999_p13 = pnand %p4997_p12, %p4994_p11 }
  0x51   : > { %5002 = shalt.err (!%p4999_p13)
}
  0x52   : > { %s5003_s28 = scalar_lea.vmem %s5479_s5, 384  ;;  %p5011_p7 = scmp.lt.s32.totalorder %s5479_s5, %s5479_s5 }
  0x53   : > { %p5004_p0 = scmp.ne.s32.totalorder %s5479_s5, %s5003_s28  ;;  %p5012_p9 = scmp.lt.s32.totalorder %s5003_s28, %s5003_s28 }
  0x55   : > { %p5006_p2 = pnand %p5004_p0, %p5489_p8  ;;  %p5013_p3 = por %p5012_p9, %p5011_p7 }
  0x57   : > { %p5007_p5 = pneg %p5006_p2 }
  0x59   : > { %p5014_p10 = pnand %p5013_p3, %p5007_p5 }
  0x5b   : > { %5017 = shalt.err (!%p5014_p10)
}
  0x5c   : > { %s6738_s15 = smov 128   ;;  %s6739_s8 = smov 8  }
  0x5d   : > { %4574 = dma.hbm_to_vmem [thread:$0]  (!%p5475_p6), %s6788_s18, 384, %s5479_s5, [#allocation9], %s6738_s15, %s6738_s15, %s6739_s8  }
  0x5e   : > { %s5540_s23 = sadd.s32 1, %s5302_s27   ;;  %s205_s24 = sadd.s32 1, %s5298_s26 }
  0x5f   : > { %6789 = sst [smem:[#allocation26_spill]] %s5540_s23  ;;  %s202_s3 = ssub.s32 %s5302_s27, %s5540_s23 }
  0x60   : > { %p212_p11 = scmp.ne.s32.totalorder %s5298_s26, %s5294_s25  ;;  %p203_p12 = scmp.eq.s32.totalorder %s202_s3, 0 }
  0x61   : > { %p213_p13 = scmp.eq.s32.totalorder %s5302_s27, 0  ;;  %p218_p0 = scmp.ne.s32.totalorder %s5294_s25, %s5290_s2 }
  0x62   : > { %p4596_p2 = scmp.lt.s32.totalorder %s5302_s27, 2  ;;  %s6744_s5 = sand.u32 1, %s5302_s27  }
  0x63   : > { %s5552_s30 = scalar_select %p203_p12, %s5298_s26, %s205_s24  }
  0x64   : > { %p214_p5 = por %p213_p13, %p212_p11  ;;  %p5556_p7 = por %p6742_p1, %p218_p0 }
  0x65   : > { %6790 = sst [smem:[#allocation27_spill]] %s5552_s30  ;;  %s5562_s28 = sand.u32 1, %s5298_s26  }
  0x66   : > { %s6791_s21 = scalar_select %p5556_p7, 1, 0 }
  0x67   : > { %s4526_s13 = smul.u32 192, %s5562_s28  ;;  %p5566_p9 = pnand %p4596_p2, %p214_p5 }
  0x68   : > { %6792 = sst [smem:[#allocation28_spill]] %s6791_s21  ;;  %s4527_s17 = smul.u32 3072, %s5302_s27 }
  0x69   : > { %s6793_s3 = scalar_select %p5566_p9, 1, 0 }
  0x6a   : > { %s6794_s7 = sld [smem:[#allocation36_spill]]  ;;  %s674_s19 = scalar_lea.vmem [#allocation11], %s4526_s13 }
  0x6b   : > { %s681_s15 = sshll.u32 %s674_s19, 4  ;;  %s5579_s8 = scalar_lea.sflag [#allocation12], %s6744_s5  ;;  %s5575_s15 = int_to_ptr.vmem [resolvable:$true] %s681_s15 }
  0x6c   : > { %p5585_p10 = pneg %p5566_p9 }
  0x6e   : > { %s6795_s18 = scalar_select %p5585_p10, 1, 0 }
  0x70   : > { %s5573_s24 = scalar_lea.hbm %s6794_s7, %s4527_s17  ;;  %s5023_s19 = scalar_lea.hbm %s6794_s7, 6144 }
  0x71   : > { %s5018_s1 = scalar_lea.hbm %s5573_s24, 3072  ;;  %p5024_p13 = scmp.lt.u32.totalorder %s5573_s24, %s6794_s7 }
  0x72   : > { %p5019_p3 = scmp.ne.s32.totalorder %s5573_s24, %s5018_s1  ;;  %p5025_p0 = scmp.lt.u32.totalorder %s5023_s19, %s5018_s1 }
  0x73   : > { %p5027_p5 = scmp.lt.u32.totalorder %s5018_s1, %s5573_s24 }
  0x74   : > { %p5021_p11 = pnand %p5585_p10, %p5019_p3  ;;  %p5026_p2 = por %p5025_p0, %p5024_p13 }
  0x76   : > { %p5022_p12 = pneg %p5021_p11  ;;  %p5028_p1 = por %p5027_p5, %p5026_p2 }
  0x78   : > { %p5029_p7 = pnand %p5028_p1, %p5022_p12 }
  0x7a   : > { %5032 = shalt.err (!%p5029_p7)
}
  0x7b   : > { %s5033_s5 = scalar_lea.vmem %s5575_s15, 3072  ;;  %s5310_s22 = smov [#allocation11]  }
  0x7c   : > { %p5034_p3 = scmp.ne.s32.totalorder %s5575_s15, %s5033_s5  ;;  %s5038_s17 = sshll.u32 %s5310_s22, 4  ;;  %s5039_s17 = int_to_ptr.vmem [resolvable:$false] %s5038_s17 }
  0x7d   : > { %s5040_s13 = scalar_lea.vmem %s5039_s17, 6144  ;;  %p5041_p6 = scmp.lt.s32.totalorder %s5575_s15, %s5039_s17 }
  0x7e   : > { %p5036_p11 = pnand %p5034_p3, %p5585_p10  ;;  %p5042_p8 = scmp.lt.s32.totalorder %s5040_s13, %s5033_s5 }
  0x80   : > { %p5037_p4 = pneg %p5036_p11  ;;  %p5043_p13 = por %p5042_p8, %p5041_p6 }
  0x82   : > { %p5044_p0 = pnand %p5043_p13, %p5037_p4 }
  0x84   : > { %5047 = shalt.err (!%p5044_p0)
}
  0x85   : > { %s5311_s1 = smov 192   ;;  %s5312_s19 = smov 12  }
  0x86   : > { %4581 = dma.hbm_to_vmem [thread:$0]  (!%p5566_p9), %s5573_s24, 3072, %s5575_s15, %s5579_s8, %s5311_s1, %s5311_s1, %s5312_s19  }
  0x87   : > { %s4061_s2 = sshll.u32 %s5562_s28, 8  ;;  %s4222_s22 = sshll.u32 %s5302_s27, 12 }
  0x88   : > { %s6796_s14 = sld [smem:[#allocation43_spill]]  ;;  %s747_s7 = scalar_lea.vmem [#allocation14], %s4061_s2 }
  0x89   : > { %s754_s30 = sshll.u32 %s747_s7, 4  ;;  %s6797_s26 = sand.u32 1, %s5302_s27   ;;  %s5620_s30 = int_to_ptr.vmem [resolvable:$true] %s754_s30 }
  0x8a   : > { %s5624_s23 = scalar_lea.sflag [#allocation15], %s6797_s26 }
  0x8e   : > { %s5616_s13 = scalar_lea.hbm %s6796_s14, %s4222_s22  ;;  %s5053_s19 = scalar_lea.hbm %s6796_s14, 8192 }
  0x8f   : > { %s5048_s15 = scalar_lea.hbm %s5616_s13, 4096  ;;  %p5054_p8 = scmp.lt.u32.totalorder %s5616_s13, %s6796_s14 }
  0x90   : > { %p5049_p1 = scmp.ne.s32.totalorder %s5616_s13, %s5048_s15  ;;  %p5055_p7 = scmp.lt.u32.totalorder %s5053_s19, %s5048_s15 }
  0x91   : > { %p5057_p2 = scmp.lt.u32.totalorder %s5048_s15, %s5616_s13 }
  0x92   : > { %p5051_p4 = pnand %p5049_p1, %p5585_p10  ;;  %p5056_p12 = por %p5055_p7, %p5054_p8 }
  0x94   : > { %p5052_p6 = pneg %p5051_p4  ;;  %p5058_p5 = por %p5057_p2, %p5056_p12 }
  0x96   : > { %p5059_p3 = pnand %p5058_p5, %p5052_p6 }
  0x98   : > { %5062 = shalt.err (!%p5059_p3)
}
  0x99   : > { %s5063_s7 = scalar_lea.vmem %s5620_s30, 4096  ;;  %s5313_s26 = smov [#allocation14]  }
  0x9a   : > { %p5064_p11 = scmp.ne.s32.totalorder %s5620_s30, %s5063_s7  ;;  %s5068_s24 = sshll.u32 %s5313_s26, 4  ;;  %s5069_s24 = int_to_ptr.vmem [resolvable:$false] %s5068_s24 }
  0x9b   : > { %s5070_s1 = scalar_lea.vmem %s5069_s24, 8192  ;;  %p5071_p1 = scmp.lt.s32.totalorder %s5620_s30, %s5069_s24 }
  0x9c   : > { %p5066_p13 = pnand %p5064_p11, %p5585_p10  ;;  %p5072_p4 = scmp.lt.s32.totalorder %s5070_s1, %s5063_s7 }
  0x9e   : > { %p5067_p0 = pneg %p5066_p13  ;;  %p5073_p8 = por %p5072_p4, %p5071_p1 }
  0xa0   : > { %p5074_p7 = pnand %p5073_p8, %p5067_p0 }
  0xa2   : > { %5077 = shalt.err (!%p5074_p7)
}
  0xa3   : > { %s5314_s15 = smov 256   ;;  %s5315_s19 = smov 16  }
  0xa4   : > { %4587 = dma.hbm_to_vmem [thread:$0]  (!%p5566_p9), %s5616_s13, 4096, %s5620_s30, %s5624_s23, %s5314_s15, %s5314_s15, %s5315_s19  }
  0xa5   : > { %s5653_s26 = scalar_lea.hbm %s6722_s16, %s4222_s22  ;;  %s775_s7 = scalar_lea.vmem [#allocation16], %s4061_s2 }
  0xa6   : > { %s782_s24 = sshll.u32 %s775_s7, 4  ;;  %s5316_s1 = smov [#allocation2]   ;;  %s5657_s24 = int_to_ptr.vmem [resolvable:$true] %s782_s24 }
  0xa7   : > { %s590_s14 = sshll.u32 %s5316_s1, 4  ;;  %s6798_s10 = sld [smem:[#allocation29_spill]]  ;;  %s591_s14 = int_to_ptr.vmem [resolvable:$true] %s590_s14 }
  0xa8   : > { %p6799_p12 = scmp.ne.s32.totalorder %s6787_s20, 0 }
  0xad   : > { %s5078_s6 = scalar_lea.hbm %s6798_s10, 512 }
  0xae   : > { %p5079_p6 = scmp.ne.s32.totalorder %s6798_s10, %s5078_s6  ;;  %p5085_p3 = scmp.lt.u32.totalorder %s5078_s6, %s6798_s10 }
  0xb0   : > { %p5081_p2 = pnand %p5079_p6, %p6799_p12 }
  0xb2   : > { %p5082_p5 = pneg %p5081_p2 }
  0xb4   : > { %p5087_p11 = pnand %p5085_p3, %p5082_p5 }
  0xb6   : > { %5090 = shalt.err (!%p5087_p11)
}
  0xb7   : > { %s5091_s2 = scalar_lea.vmem %s591_s14, 512  ;;  %p5099_p4 = scmp.lt.s32.totalorder %s591_s14, %s591_s14 }
  0xb8   : > { %p5092_p13 = scmp.ne.s32.totalorder %s591_s14, %s5091_s2  ;;  %p5100_p8 = scmp.lt.s32.totalorder %s5091_s2, %s5091_s2 }
  0xba   : > { %p5094_p0 = pnand %p5092_p13, %p6799_p12  ;;  %p5101_p7 = por %p5100_p8, %p5099_p4 }
  0xbc   : > { %p5095_p1 = pneg %p5094_p0 }
  0xbe   : > { %p5102_p9 = pnand %p5101_p7, %p5095_p1 }
  0xc0   : > { %5105 = shalt.err (!%p5102_p9)
}
  0xc1   : > { %p6800_p6 = scmp.ne.s32.totalorder %s6785_s4, 0  ;;  %s6801_s11 = smov 8  }
  0xc2   : > { %s6802_s12 = smov 128   ;;  %s5317_s15 = smov [#allocation7]  }
  0xc3   : > { %4565 = dma.hbm_to_vmem [thread:$0]  (!%p6800_p6), %s6798_s10, 512, %s591_s14, [#allocation3], %s6802_s12, %s6802_s12, %s6801_s11  }
  0xc4   : > { %s617_s19 = sshll.u32 %s5317_s15, 4  ;;  %s5318_s5 = smov [#allocation10]   ;;  %s618_s19 = int_to_ptr.vmem [resolvable:$true] %s617_s19 }
  0xc5   : > { %s641_s17 = sshll.u32 %s5318_s5, 4  ;;  %s6803_s30 = sld [smem:[#allocation31_spill]]  ;;  %s642_s17 = int_to_ptr.vmem [resolvable:$true] %s641_s17 }
  0xcb   : > { %s5106_s22 = scalar_lea.hbm %s6803_s30, 16 }
  0xcc   : > { %p5107_p9 = scmp.ne.s32.totalorder %s6803_s30, %s5106_s22  ;;  %p5113_p3 = scmp.lt.u32.totalorder %s5106_s22, %s6803_s30 }
  0xce   : > { %p5109_p2 = pnand %p5107_p9, %p6799_p12 }
  0xd0   : > { %p5110_p5 = pneg %p5109_p2 }
  0xd2   : > { %p5115_p11 = pnand %p5113_p3, %p5110_p5 }
  0xd4   : > { %5118 = shalt.err (!%p5115_p11)
}
  0xd5   : > { %s5119_s14 = scalar_lea.vmem %s618_s19, 16  ;;  %s5126_s11 = scalar_lea.vmem %s618_s19, 32 }
  0xd6   : > { %p5120_p13 = scmp.ne.s32.totalorder %s618_s19, %s5119_s14  ;;  %p5127_p4 = scmp.lt.s32.totalorder %s618_s19, %s618_s19 }
  0xd7   : > { %p5128_p8 = scmp.lt.s32.totalorder %s5126_s11, %s5119_s14 }
  0xd8   : > { %p5122_p0 = pnand %p5120_p13, %p6799_p12 }
  0xd9   : > { %p5129_p7 = por %p5128_p8, %p5127_p4 }
  0xda   : > { %p5123_p1 = pneg %p5122_p0 }
  0xdc   : > { %p5130_p10 = pnand %p5129_p7, %p5123_p1 }
  0xde   : > { %5133 = shalt.err (!%p5130_p10)
}
  0xdf   : > { %4571 = dma.hbm_to_vmem [thread:$0]  (!%p6800_p6), %s6803_s30, 16, %s618_s19, [#allocation6]  }
  0xe0   : > { %s4058_s25 = sshll.u32 %s5562_s28, 6  ;;  %s6804_s7 = sld [smem:[#allocation33_spill]] }
  0xe6   : > { %s5134_s1 = scalar_lea.hbm %s6804_s7, 16 }
  0xe7   : > { %p5135_p9 = scmp.ne.s32.totalorder %s6804_s7, %s5134_s1  ;;  %p5141_p5 = scmp.lt.u32.totalorder %s5134_s1, %s6804_s7 }
  0xe9   : > { %p5137_p10 = pnand %p5135_p9, %p6799_p12 }
  0xeb   : > { %p5138_p2 = pneg %p5137_p10 }
  0xed   : > { %p5143_p3 = pnand %p5141_p5, %p5138_p2 }
  0xef   : > { %5146 = shalt.err (!%p5143_p3)
}
  0xf0   : > { %s5147_s19 = scalar_lea.vmem %s642_s17, 16  ;;  %s5154_s28 = scalar_lea.vmem %s642_s17, 32 }
  0xf1   : > { %p5148_p11 = scmp.ne.s32.totalorder %s642_s17, %s5147_s19  ;;  %p5155_p1 = scmp.lt.s32.totalorder %s642_s17, %s642_s17 }
  0xf2   : > { %p5156_p4 = scmp.lt.s32.totalorder %s5154_s28, %s5147_s19 }
  0xf3   : > { %p5150_p13 = pnand %p5148_p11, %p6799_p12 }
  0xf4   : > { %p5157_p8 = por %p5156_p4, %p5155_p1 }
  0xf5   : > { %p5151_p0 = pneg %p5150_p13 }
  0xf7   : > { %p5158_p7 = pnand %p5157_p8, %p5151_p0 }
  0xf9   : > { %5161 = shalt.err (!%p5158_p7)
}
  0xfa   : > { %4577 = dma.hbm_to_vmem [thread:$0]  (!%p6800_p6), %s6804_s7, 16, %s642_s17, [#allocation9]  }
  0xfb   : > { %s4221_s12 = sshll.u32 %s5302_s27, 10  ;;  %s6805_s9 = sld [smem:[#allocation38_spill]] }
  0xfc   : > { %s702_s5 = scalar_lea.vmem [#allocation13], %s4058_s25  ;;  %p6806_p9 = scmp.ne.s32.totalorder %s6795_s18, 0 }
  0xfd   : > { %s709_s1 = sshll.u32 %s702_s5, 4  ;;  %s5723_s1 = int_to_ptr.vmem [resolvable:$true] %s709_s1 }
 0x101   : > { %s5721_s20 = scalar_lea.hbm %s6805_s9, %s4221_s12  ;;  %s5167_s22 = scalar_lea.hbm %s6805_s9, 2048 }
 0x102   : > { %s5162_s4 = scalar_lea.hbm %s5721_s20, 1024  ;;  %p5168_p6 = scmp.lt.u32.totalorder %s5721_s20, %s6805_s9 }
 0x103   : > { %p5163_p12 = scmp.ne.s32.totalorder %s5721_s20, %s5162_s4  ;;  %p5169_p5 = scmp.lt.u32.totalorder %s5167_s22, %s5162_s4 }
 0x104   : > { %p5171_p11 = scmp.lt.u32.totalorder %s5162_s4, %s5721_s20 }
 0x105   : > { %p5165_p10 = pnand %p5163_p12, %p6806_p9  ;;  %p5170_p3 = por %p5169_p5, %p5168_p6 }
 0x107   : > { %p5166_p2 = pneg %p5165_p10  ;;  %p5172_p13 = por %p5171_p11, %p5170_p3 }
 0x109   : > { %p5173_p0 = pnand %p5172_p13, %p5166_p2 }
 0x10b   : > { %5176 = shalt.err (!%p5173_p0)
}
 0x10c   : > { %s5177_s25 = scalar_lea.vmem %s5723_s1, 1024  ;;  %s5319_s21 = smov [#allocation13]  }
 0x10d   : > { %p5178_p1 = scmp.ne.s32.totalorder %s5723_s1, %s5177_s25  ;;  %s5182_s19 = sshll.u32 %s5319_s21, 4  ;;  %s5183_s19 = int_to_ptr.vmem [resolvable:$false] %s5182_s19 }
 0x10e   : > { %s5184_s28 = scalar_lea.vmem %s5183_s19, 2048  ;;  %p5185_p7 = scmp.lt.s32.totalorder %s5723_s1, %s5183_s19 }
 0x10f   : > { %p5180_p4 = pnand %p5178_p1, %p6806_p9  ;;  %p5186_p12 = scmp.lt.s32.totalorder %s5184_s28, %s5177_s25 }
 0x111   : > { %p5181_p8 = pneg %p5180_p4  ;;  %p5187_p10 = por %p5186_p12, %p5185_p7 }
 0x113   : > { %p5188_p6 = pnand %p5187_p10, %p5181_p8 }
 0x115   : > { %5191 = shalt.err (!%p5188_p6)
}
 0x116   : > { %p6807_p2 = scmp.ne.s32.totalorder %s6793_s3, 0  ;;  %s6808_s14 = smov 4  }
 0x117   : > { %s6809_s11 = smov 64   ;;  %s5192_s12 = scalar_lea.hbm %s5653_s26, 4096 }
 0x118   : > { %4584 = dma.hbm_to_vmem [thread:$0]  (!%p6807_p2), %s5721_s20, 1024, %s5723_s1, %s5579_s8, %s6809_s11, %s6809_s11, %s6808_s14  }
 0x119   : > { %p5193_p5 = scmp.ne.s32.totalorder %s5653_s26, %s5192_s12  ;;  %s5197_s5 = scalar_lea.hbm %s6722_s16, 8192 }
 0x11a   : > { %p5198_p13 = scmp.lt.u32.totalorder %s5653_s26, %s6722_s16  ;;  %p5199_p0 = scmp.lt.u32.totalorder %s5197_s5, %s5192_s12 }
 0x11b   : > { %p5195_p3 = pnand %p5193_p5, %p6806_p9  ;;  %p5201_p4 = scmp.lt.u32.totalorder %s5192_s12, %s5653_s26 }
 0x11c   : > { %p5200_p1 = por %p5199_p0, %p5198_p13 }
 0x11d   : > { %p5196_p11 = pneg %p5195_p3 }
 0x11e   : > { %p5202_p8 = por %p5201_p4, %p5200_p1 }
 0x120   : > { %p5203_p7 = pnand %p5202_p8, %p5196_p11 }
 0x122   : > { %5206 = shalt.err (!%p5203_p7)
}
 0x123   : > { %s5207_s8 = scalar_lea.vmem %s5657_s24, 4096  ;;  %s5320_s20 = smov [#allocation16]  }
 0x124   : > { %p5208_p12 = scmp.ne.s32.totalorder %s5657_s24, %s5207_s8  ;;  %s5212_s1 = sshll.u32 %s5320_s20, 4  ;;  %s5213_s1 = int_to_ptr.vmem [resolvable:$false] %s5212_s1 }
 0x125   : > { %s5214_s27 = scalar_lea.vmem %s5213_s1, 8192  ;;  %p5215_p5 = scmp.lt.s32.totalorder %s5657_s24, %s5213_s1 }
 0x126   : > { %p5210_p10 = pnand %p5208_p12, %p6806_p9  ;;  %p5216_p3 = scmp.lt.s32.totalorder %s5214_s27, %s5207_s8 }
 0x128   : > { %p5211_p6 = pneg %p5210_p10  ;;  %p5217_p13 = por %p5216_p3, %p5215_p5 }
 0x12a   : > { %p5218_p0 = pnand %p5217_p13, %p5211_p6 }
 0x12c   : > { %5221 = shalt.err (!%p5218_p0)
}
 0x12d   : > { %4590 = dma.hbm_to_vmem [thread:$0]  (!%p6807_p2), %s5653_s26, 4096, %s5657_s24, %s5624_s23, %s6809_s11, %s6809_s11, %s6808_s14  }
 0x12e   : > { %p6810_p9 = scmp.ne.s32.totalorder %s6784_s0, 0 }
 0x12f   : > { %p6811_p11 = scmp.eq.s32.totalorder (!%p6810_p9), %s5459_s29, 0 }
 0x130   : > { %806 = sbr.rel (%p6810_p9) target bundleno = 3845 (0xf05), region = 104 }
 0x137   : > { %5265 = dma.done.wait (%p6811_p11), [#allocation3], 512   ;;  %p6812_p1 = pmov %p6811_p11 }
 0x139   : > { %5267 = vsyncadd (%p6812_p1), [#allocation3], 4294966784  ;;  %p6813_p4 = pmov %p6812_p1 }
 0x13a   : > { %p6814_p8 = pmov %p6812_p1 }
 0x13b   : > { %5269 = dma.done.wait (%p6813_p4), [#allocation6], 400  }
 0x13c   : > { %5271 = vsyncadd (%p6814_p8), [#allocation6], 4294966896  ;;  %p6815_p7 = pmov %p6812_p1 }
 0x13d   : > { %p6816_p2 = pmov %p6812_p1 }
 0x13e   : > { %5273 = dma.done.wait (%p6815_p7), [#allocation9], 400  }
 0x13f   : > { %5275 = vsyncadd (%p6816_p2), [#allocation9], 4294966896  ;;  %s6817_s18 = sld [smem:[#allocation24_spill]]  ;;  %s6818_s0 = sld [smem:[#allocation28_spill]] }
 0x140   : > { %s828_s23 = sand.u32 1, %s5459_s29  }
 0x141   : > { %s829_s24 = scalar_lea.sflag [#allocation12], %s828_s23 }
 0x145   : > { %s830_s3 = sand.u32 1, %s6817_s18   ;;  %p6819_p12 = scmp.ne.s32.totalorder %s6818_s0, 0 }
 0x146   : > { %s4528_s26 = smul.u32 192, %s830_s3 }
 0x148   : > { %s5791_s22 = scalar_lea.vmem [#allocation11], %s4528_s26 }
 0x149   : > { %5277 = dma.done.wait (%p6819_p12), %s829_s24, 4096  }
 0x14a   : > { %5279 = vsyncadd (%p6819_p12), %s829_s24, 4294963200  ;;  %s4073_s13 = sshll.u32 %s830_s3, 6  ;;  %s4074_s2 = sshll.u32 %s830_s3, 8 }
 0x14b   : > { %s5797_s25 = scalar_lea.vmem [#allocation13], %s4073_s13  ;;  %s847_s21 = scalar_lea.sflag [#allocation15], %s828_s23 }
 0x14c   : > { %s5799_s19 = scalar_lea.vmem [#allocation14], %s4074_s2 }
 0x14d   : > { %5281 = dma.done.wait (%p6819_p12), %s847_s21, 8192  }
 0x14e   : > { %5283 = vsyncadd (%p6819_p12), %s847_s21, 4294959104  ;;  %p960_p10 = scmp.lt.s32.totalorder %s5459_s29, 1  ;;  %s6824_s21 = sld [smem:[#allocation41_spill]] }
 0x14f   : > { %s6825_s12 = sld [smem:[#allocation37_spill]]  ;;  %s6826_s4 = sld [smem:[#allocation42_spill]] }
 0x150   : > { %s5807_s28 = scalar_select %p960_p10, %s5459_s29, 1 }
 0x151   : > { %s6827_s27 = sld [smem:[#allocation45_spill]]  ;;  %s6828_s3 = sld [smem:[#allocation44_spill]] }
 0x152   : > { %s4529_s8 = smul.u32 3, %s5807_s28  ;;  %s4076_s9 = sshll.u32 %s5807_s28, 2 }
 0x153   : > { %p6830_p6 = scmp.ne.s32.totalorder %s5459_s29, 0 }
 0x154   : > { %s978_s14 = scalar_lea.vmem %s6824_s21, %s5807_s28  ;;  %s6829_s21 = sld [smem:[#allocation46_spill]]  ;;  %v4656_v0 = vld [vmem:[#allocation5] sm:$0xff] (!%p6830_p6)   ;;  %v4657_v1 = vld [vmem:[#allocation5 + $0x8] sm:$0xff] (!%p6830_p6)   ;;  %vm1034_vm0 = vcmask (!%p6830_p6), 392192   ;;  %v4658_v4 = vld [vmem:[#allocation5 + $0x10] sm:$0xff] (!%p6830_p6)   ;;  %vm1092_vm1 = vcmask (!%p6830_p6), 1040384  }
 0x155   : > { %s5833_s6 = scalar_lea.vmem %s6825_s12, %s4529_s8  ;;  %s981_s17 = scalar_lea.vmem %s6826_s4, %s5807_s28  ;;  %4364 = vmatprep.subr.bf16.mxu0 (!%p6830_p6), %v4656_v0  ;;  %v997_v2 = vld [vmem:[#allocation2] sm:$0xff] (!%p6830_p6)  ;;  %v998_v3 = vld [vmem:[#allocation2 + $0x8] sm:$0xff] (!%p6830_p6)  ;;  %v999_v6 = vld [vmem:[#allocation2 + $0x10] sm:$0xff] (!%p6830_p6) }
 0x156   : > { %s5853_s8 = scalar_lea.vmem [#allocation16], %s4074_s2  ;;  %996 = sbr.rel (%p6830_p6) target bundleno = 576 (0x240), region = 144  ;;  %4365 = vmatpush3.bf16.msra.mxu0 (!%p6830_p6), %v4656_v0  ;;  %v1001_v5 = vpack.c.bf16 (!%p6830_p6), %v998_v3, %v997_v2  ;;  %v1000_v7 = vld [vmem:[#allocation2 + $0x18] sm:$0xff] (!%p6830_p6)  ;;  %v1102_v22 = vld [vmem:[#allocation8 + $0x8] sm:$0xff] (!%p6830_p6)  ;;  %v1103_v23 = vld [vmem:[#allocation8 + $0x10] sm:$0xff] (!%p6830_p6) }
 0x157   : > { %s988_s18 = scalar_lea.vmem %s6827_s27, %s5807_s28  ;;  %s5847_s26 = scalar_lea.vmem %s6828_s3, %s4076_s9  ;;  %4366 = vmatprep.subr.bf16.mxu0 (!%p6830_p6), %v4657_v1  ;;  %v1002_v8 = vpack.c.bf16 (!%p6830_p6), %v1000_v7, %v999_v6  ;;  %v4078_v9 = vld [vmem:[#allocation7] ss:$0 sm:$0xff] (!%p6830_p6)  ;;  %v1101_v15 = vld [vmem:[#allocation8] sm:$0xff] (!%p6830_p6) }
 0x158   : > { %4370 = vmatprep.mubr.msk.bf16.mxu0 (!%p6830_p6), %vm1034_vm0, %v1001_v5 }
 0x15a   : > { %s991_s7 = scalar_lea.vmem %s6829_s21, %s5807_s28  ;;  %4367 = vmatpush3.bf16.msra.mxu0 (!%p6830_p6), %v4657_v1 }
 0x15b   : > { %4368 = vmatprep.subr.bf16.mxu0 (!%p6830_p6), %v4658_v4 }
 0x15e   : > { %4369 = vmatpush3.bf16.msra.mxu0 %v4658_v4 }
 0x161   : > { %4371 = vmatmul.mubr.msk.bf16.vlgmr.msra.gmra.mrb[0].mxu0 %vm1034_vm0, %v1002_v8 }
 0x234   : > { %v4372_v10 = vpop.f32.mrb[0].mxu0 }
 0x235   : > { %v1084_v11 = vadd.f32 %v4372_v10, %v4078_v9  ;;  %v1075_v12 = vpop.f32.mrb[1].mxu0 }
 0x236   : > { %v1076_v13 = vadd.f32 %v4078_v9, %v1075_v12  ;;  %v4373_v14 = vpop.f32.mrb[2].mxu0 }
 0x237   : > { %v1109_v16 = vrot.slane %v1084_v11, 7  ;;  %v1087_v17 = vadd.f32 %v4373_v14, %v4078_v9  ;;  %v1078_v18 = vpop.f32.mrb[3].mxu0 }
 0x238   : > { %v1093_v19 = vrot.slane %v1076_v13, 7  ;;  %v1079_v20 = vadd.f32 %v4078_v9, %v1078_v18 }
 0x239   : > { %v1115_v21 = vsel %vm1092_vm1, 0.0, %v1109_v16  ;;  %v1110_v24 = vrot.slane %v1087_v17, 7 }
 0x23a   : > { %v1117_v25 = vadd.f32 %v1115_v21, %v1101_v15  ;;  %v1099_v26 = vsel %vm1092_vm1, 0.0, %v1093_v19  ;;  %v1094_v27 = vrot.slane %v1079_v20, 7 }
 0x23b   : > { %v1104_v28 = vadd.f32 %v1101_v15, %v1099_v26  ;;  %v1111_v29 = vsel %vm1092_vm1, %v1109_v16, %v1110_v24  ;;  %v1116_v30 = vsel %vm1092_vm1, %v1110_v24, 0.0 }
 0x23c   : > { %1123 = vst [vmem:[#allocation17 + $0x18] sm:$0xff] %v1117_v25  ;;  %v1118_v31 = vadd.f32 %v1111_v29, %v1102_v22  ;;  %v1119_v32 = vadd.f32 %v1116_v30, %v1103_v23  ;;  %v1095_v33 = vsel %vm1092_vm1, %v1093_v19, %v1094_v27  ;;  %v1100_v34 = vsel %vm1092_vm1, %v1094_v27, 0.0 }
 0x23d   : > { %1120 = vst [vmem:[#allocation17] sm:$0xff] %v1104_v28  ;;  %v1105_v35 = vadd.f32 %v1102_v22, %v1095_v33  ;;  %v1106_v36 = vadd.f32 %v1103_v23, %v1100_v34 }
 0x23e   : > { %1124 = vst [vmem:[#allocation17 + $0x20] sm:$0xff] %v1118_v31  ;;  %1125 = vst [vmem:[#allocation17 + $0x28] sm:$0xff] %v1119_v32 }
 0x23f   : > { %1121 = vst [vmem:[#allocation17 + $0x8] sm:$0xff] %v1105_v35  ;;  %1122 = vst [vmem:[#allocation17 + $0x10] sm:$0xff] %v1106_v36 }
 0x240 PF: > { %v4704_v41 = vld [vmem:[%s5791_s22 + $0x4] ss:$12 sps:$4 sm:$0xff]   ;;  %v4706_v42 = vld [vmem:[%s5791_s22] ss:$12 sps:$4 sm:$0xff]   ;;  %v5321_v43 = vmov 0.0   ;;  %v5322_v20 = vmov 0  }
 0x241   : > { %4374 = vmatprep.subr.bf16.mxu1 %v5321_v43  ;;  %v4707_v44 = vld [vmem:[%s5791_s22 + $0x8] ss:$12 sps:$4 sm:$0xff]   ;;  %1405 = vmatprep.subr.bf16.mxu0 %v4704_v41  ;;  %v4710_v0 = vld [vmem:[%s5791_s22 + $0x18] ss:$12 sps:$4 sm:$0xff]   ;;  %v4711_v1 = vld [vmem:[%s5791_s22 + $0x20] ss:$12 sps:$4 sm:$0xff]  }
 0x242   : > { %v4708_v45 = vld [vmem:[%s5791_s22 + $0x1c] ss:$12 sps:$4 sm:$0xff]   ;;  %1406 = vmatpush1.bf16.msra.mxu0 %v4706_v42  ;;  %4375 = vmatpush3.bf16.msra.mxu1 %v4707_v44  ;;  %v4712_v2 = vld [vmem:[%s5791_s22 + $0x34] ss:$12 sps:$4 sm:$0xff]   ;;  %v4715_v4 = vld [vmem:[%s5791_s22 + $0x38] ss:$12 sps:$4 sm:$0xff]  }
 0x243   : > { %v1129_v40 = vld [vmem:[#allocation17 + $0x18] sm:$0xff]  ;;  %1407 = vmatprep.subr.bf16.mxu0 %v4708_v45  ;;  %4376 = vmatprep.subr.bf16.mxu1 %v5321_v43  ;;  %v4718_v6 = vld [vmem:[%s5791_s22 + $0x48] ss:$12 sps:$4 sm:$0xff]   ;;  %v4720_v8 = vld [vmem:[%s5791_s22 + $0x64] ss:$12 sps:$4 sm:$0xff]   ;;  %vm5323_vm2 = vmmov 0  }
 0x244   : > { %v1126_v37 = vld [vmem:[#allocation17] sm:$0xff]  ;;  %v4714_v3 = vld [vmem:[%s5791_s22 + $0x30] ss:$12 sps:$4 sm:$0xff]   ;;  %v4716_v5 = vld [vmem:[%s5791_s22 + $0x4c] ss:$12 sps:$4 sm:$0xff]   ;;  %1437 = vmatprep.mubr.bf16.mxu0 %v5322_v20  ;;  %4390 = vmatprep.mubr.msk.bf16.mxu1 %vm5323_vm2, %v5321_v43  ;;  %s6831_s2 = sld [smem:[#allocation34_spill]] }
 0x245   : > { %1134 = vadd.xlane.f32.xlu0 %v1126_v37  ;;  %v5885_v62 = vld [vmem:[#allocation17 + $0x20] sm:$0xff]  ;;  %v5888_v63 = vld [vmem:[#allocation17 + $0x28] sm:$0xff]  ;;  %v4719_v7 = vld [vmem:[%s5791_s22 + $0x50] ss:$12 sps:$4 sm:$0xff]   ;;  %s6833_s5 = sld [smem:[#allocation35_spill]]  ;;  %vm1632_vm3 = vcmask 523264  }
 0x246   : > { %v1128_v38 = vld [vmem:[#allocation17 + $0x10] sm:$0xff]  ;;  %v1127_v39 = vld [vmem:[#allocation17 + $0x8] sm:$0xff]  ;;  %1408 = vmatpush1.bf16.msra.mxu0 %v4710_v0  ;;  %4377 = vmatpush3.bf16.msra.mxu1 %v4711_v1  ;;  %v4726_v12 = vld [vmem:[%s5791_s22 + $0x78] ss:$12 sps:$4 sm:$0xff]   ;;  %vm1842_vm4 = vcmask 1043456   ;;  %vm1771_vm5 = vcmask 195584  }
 0x247   : > { %1138 = vadd.xlane.f32.xlu1 %v1128_v38  ;;  %4378 = vmatprep.subr.bf16.mxu1 %v5321_v43  ;;  %v4722_v9 = vld [vmem:[%s5791_s22 + $0x60] ss:$12 sps:$4 sm:$0xff]   ;;  %v4723_v10 = vld [vmem:[%s5791_s22 + $0x68] ss:$12 sps:$4 sm:$0xff]   ;;  %v4730_v15 = vld [vmem:[%s5791_s22 + $0x90] ss:$12 sps:$4 sm:$0xff]  }
 0x248   : > { %1409 = vmatprep.subr.bf16.mxu0 %v4712_v2  ;;  %v4724_v11 = vld [vmem:[%s5791_s22 + $0x7c] ss:$12 sps:$4 sm:$0xff]   ;;  %v4727_v13 = vld [vmem:[%s5791_s22 + $0x80] ss:$12 sps:$4 sm:$0xff]   ;;  %v4731_v16 = vld [vmem:[%s5791_s22 + $0x98] ss:$12 sps:$4 sm:$0xff]  }
 0x249   : > { %1136 = vadd.xlane.f32.xlu0 %v1127_v39  ;;  %v4728_v14 = vld [vmem:[%s5791_s22 + $0x94] ss:$12 sps:$4 sm:$0xff]   ;;  %v4732_v17 = vld [vmem:[%s5791_s22 + $0xac] ss:$12 sps:$4 sm:$0xff]   ;;  %v4735_v19 = vld [vmem:[%s5791_s22 + $0xb0] ss:$12 sps:$4 sm:$0xff]  }
 0x24a   : > { %1410 = vmatpush1.bf16.msra.mxu0 %v4714_v3  ;;  %4379 = vmatpush3.bf16.msra.mxu1 %v4715_v4  ;;  %v4734_v18 = vld [vmem:[%s5791_s22 + $0xa8] ss:$12 sps:$4 sm:$0xff]   ;;  %s6832_s11 = scalar_lea.vmem %s6831_s2, %s5807_s28  ;;  %s6835_s1 = sld [smem:[#allocation39_spill]] }
 0x24b   : > { %1140 = vadd.xlane.f32.xlu1 %v1129_v40  ;;  %4380 = vmatprep.subr.bf16.mxu1 %v5321_v43  ;;  %v4084_v44 = vld [vmem:[%s6832_s11] ss:$0 sm:$0xff]  ;;  %s6834_s4 = scalar_lea.vmem %s6833_s5, %s5807_s28  ;;  %s6837_s3 = sld [smem:[#allocation40_spill]] }
 0x24c   : > { %1411 = vmatprep.subr.bf16.mxu0 %v4716_v5  ;;  %p4213_p5 = scmp.ne.s32.totalorder %s5459_s29, 1 }
 0x24e   : > { %1412 = vmatpush1.bf16.msra.mxu0 %v4718_v6  ;;  %4381 = vmatpush3.bf16.msra.mxu1 %v4719_v7 }
 0x24f   : > { %4382 = vmatprep.subr.bf16.mxu1 %v5321_v43  ;;  %1413 = vmatprep.subr.bf16.mxu0 %v4720_v8 }
 0x250   : > { %s6836_s27 = scalar_lea.vmem %s6835_s1, %s5807_s28 }
 0x251   : > { %s6838_s24 = scalar_lea.vmem %s6837_s3, %s5807_s28 }
 0x252   : > { %1414 = vmatpush1.bf16.msra.mxu0 %v4722_v9  ;;  %4383 = vmatpush3.bf16.msra.mxu1 %v4723_v10 }
 0x253   : > { %4384 = vmatprep.subr.bf16.mxu1 %v5321_v43  ;;  %1415 = vmatprep.subr.bf16.mxu0 %v4724_v11 }
 0x256   : > { %1416 = vmatpush1.bf16.msra.mxu0 %v4726_v12  ;;  %4385 = vmatpush3.bf16.msra.mxu1 %v4727_v13 }
 0x257   : > { %4386 = vmatprep.subr.bf16.mxu1 %v5321_v43  ;;  %1417 = vmatprep.subr.bf16.mxu0 %v4728_v14 }
 0x25a   : > { %1418 = vmatpush1.bf16.msra.mxu0 %v4730_v15  ;;  %4387 = vmatpush3.bf16.msra.mxu1 %v4731_v16  ;;  %v1260_v16 = vld [vmem:[%s5833_s6] sm:$0x7]  ;;  %s5324_s6 = smov 64  }
 0x25b   : > { %1419 = vmatprep.subr.bf16.mxu0 %v4732_v17  ;;  %4388 = vmatprep.subr.bf16.mxu1 %v5321_v43 }
 0x25e   : > { %1420 = vmatpush1.bf16.msra.mxu0 %v4734_v18  ;;  %4389 = vmatpush3.bf16.msra.mxu1 %v4735_v19 }
 0x2d2   : > { %v1135_v46 = vpop.xlane.xlu0 %1134 }
 0x2d3   : > { %v1147_v48 = vmul.f32 0.0078125, %v1135_v46 }
 0x2d4   : > { %v1139_v47 = vpop.xlane.xlu1 %1138 }
 0x2d5   : > { %v1149_v49 = vmul.f32 0.0078125, %v1139_v47  ;;  %v5869_v50 = vsub.f32 %v1126_v37, %v1147_v48 }
 0x2d6   : > { %v1137_v52 = vpop.xlane.xlu0 %1136 }
 0x2d7   : > { %v5871_v51 = vsub.f32 %v1128_v38, %v1149_v49  ;;  %v1148_v54 = vmul.f32 0.0078125, %v1137_v52  ;;  %v1159_v55 = vmul.f32 %v5869_v50, %v5869_v50  ;;  %v4085_v49 = vld [vmem:[%s6834_s4] ss:$0 sm:$0xff]  ;;  %s6844_s4 = sld [smem:[#allocation48_spill]] (!%p4213_p5) }
 0x2d8   : > { %v1141_v53 = vpop.xlane.xlu1 %1140 }
 0x2d9   : > { %v1150_v56 = vmul.f32 0.0078125, %v1141_v53  ;;  %v5875_v57 = vsub.f32 %v1127_v39, %v1148_v54  ;;  %1165 = vadd.xlane.f32.xlu0 %v1159_v55  ;;  %v1161_v59 = vmul.f32 %v5871_v51, %v5871_v51 }
 0x2db   : > { %v5877_v58 = vsub.f32 %v1129_v40, %v1150_v56  ;;  %v1160_v60 = vmul.f32 %v5875_v57, %v5875_v57 }
 0x2dd   : > { %1169 = vadd.xlane.f32.xlu0 %v1161_v59  ;;  %1167 = vadd.xlane.f32.xlu1 %v1160_v60  ;;  %v1162_v61 = vmul.f32 %v5877_v58, %v5877_v58 }
 0x2e1   : > { %1171 = vadd.xlane.f32.xlu1 %v1162_v61  ;;  %1142 = vadd.xlane.f32.xlu0 %v5885_v62 }
 0x2e5   : > { %1144 = vadd.xlane.f32.xlu1 %v5888_v63 }
 0x366   : > { %v1166_v21 = vpop.xlane.xlu0 %1165 }
 0x367   : > { %v1177_v22 = vmul.f32 0.0078125, %v1166_v21 }
 0x369   : > { %v1183_v23 = vadd.f32 1e-06, %v1177_v22 }
 0x36a   : > { %v1168_v24 = vpop.xlane.xlu1 %1167  ;;  %v1170_v25 = vpop.xlane.xlu0 %1169 }
 0x36b   : > { %4824 = vrsqrt.f32 %v1183_v23  ;;  %v1178_v26 = vmul.f32 0.0078125, %v1168_v24  ;;  %v1179_v27 = vmul.f32 0.0078125, %v1170_v25 }
 0x36d   : > { %v1184_v28 = vadd.f32 1e-06, %v1178_v26  ;;  %v1185_v29 = vadd.f32 1e-06, %v1179_v27 }
 0x36e   : > { %v1172_v30 = vpop.xlane.xlu1 %1171  ;;  %v1143_v31 = vpop.xlane.xlu0 %1142 }
 0x36f   : > { %4826 = vrsqrt.f32 %v1184_v28  ;;  %v1180_v32 = vmul.f32 0.0078125, %v1172_v30  ;;  %v1151_v33 = vmul.f32 0.0078125, %v1143_v31 }
 0x370   : > { %4828 = vrsqrt.f32 %v1185_v29 }
 0x371   : > { %v1186_v34 = vadd.f32 1e-06, %v1180_v32  ;;  %v1157_v35 = vsub.f32 %v5885_v62, %v1151_v33 }
 0x372   : > { %v1145_v36 = vpop.xlane.xlu1 %1144 }
 0x373   : > { %4830 = vrsqrt.f32 %v1186_v34  ;;  %v1152_v37 = vmul.f32 0.0078125, %v1145_v36  ;;  %v1163_v38 = vmul.f32 %v1157_v35, %v1157_v35 }
 0x375   : > { %v4825_v39 = vpop.eup %4824  ;;  %v1158_v40 = vsub.f32 %v5888_v63, %v1152_v37  ;;  %1173 = vadd.xlane.f32.xlu0 %v1163_v38 }
 0x376   : > { %v1195_v41 = vmul.f32 %v4825_v39, %v5869_v50 }
 0x377   : > { %v1164_v42 = vmul.f32 %v1158_v40, %v1158_v40 }
 0x378   : > { %v1207_v47 = vmul.f32 %v4084_v44, %v1195_v41 }
 0x379   : > { %v4827_v45 = vpop.eup %4826  ;;  %1175 = vadd.xlane.f32.xlu1 %v1164_v42 }
 0x37a   : > { %v1196_v46 = vmul.f32 %v4827_v45, %v5875_v57  ;;  %v4829_v48 = vpop.eup %4828  ;;  %v1219_v50 = vadd.f32 %v4085_v49, %v1207_v47 }
 0x37b   : > { %v1197_v55 = vmul.f32 %v4829_v48, %v5871_v51 }
 0x37c   : > { %v1208_v52 = vmul.f32 %v4084_v44, %v1196_v46 }
 0x37d   : > { %v4831_v53 = vpop.eup %4830  ;;  %v1209_v57 = vmul.f32 %v4084_v44, %v1197_v55 }
 0x37e   : > { %v1220_v54 = vadd.f32 %v4085_v49, %v1208_v52  ;;  %v1198_v56 = vmul.f32 %v4831_v53, %v5877_v58 }
 0x37f   : > { %v1221_v62 = vadd.f32 %v4085_v49, %v1209_v57 }
 0x380   : > { %v1225_v59 = vpack.c.bf16 %v1220_v54, %v1219_v50  ;;  %v1210_v60 = vmul.f32 %v4084_v44, %v1198_v56 }
 0x382   : > { %1438 = vmatmul.mubr.bf16.vlgmr.msra.gmra.mrb[0].mxu0 %v1225_v59  ;;  %4391 = vmatmul.mubr.bf16.vlgmr.msra.gmra.mrb[0].mxu1 %v1225_v59  ;;  %v1222_v61 = vadd.f32 %v4085_v49, %v1210_v60 }
 0x383   : > { %1447 = vmatprep.mubr.bf16.mxu0 %v5322_v20  ;;  %4394 = vmatprep.mubr.msk.bf16.mxu1 %vm5323_vm2, %v5321_v43 }
 0x384   : > { %v1226_v63 = vpack.c.bf16 %v1222_v61, %v1221_v62 }
 0x38a   : > { %1448 = vmatmul.mubr.bf16.gmra.mrb[4].mxu0 %v1226_v63  ;;  %4395 = vmatmul.mubr.bf16.gmra.mrb[4].mxu1 %v1226_v63 }
 0x38b   : > { %1457 = vmatprep.mubr.bf16.mxu0 %v5322_v20  ;;  %4398 = vmatprep.mubr.msk.bf16.mxu1 %vm5323_vm2, %v5321_v43  ;;  %v1262_v43 = vlaneseq }
 0x38d   : > { %v5942_v13 = vshrl.u32 %v1262_v43, 7 }
 0x38f   : > { %v1264_v14 = vsub.s32 0, %v5942_v13  ;;  %v1272_v15 = vsub.s32 2, %v5942_v13  ;;  %v1268_v17 = vsub.s32 1, %v5942_v13 }
 0x391   : > { %v5950_v18 = vrot.slane %v1260_v16, %v1264_v14  ;;  %v5954_v19 = vrot.slane %v1260_v16, %v1272_v15  ;;  %v5958_v23 = vrot.slane %v1260_v16, %v1268_v17 }
 0x402   : > { %v1174_v51 = vpop.xlane.xlu0 %1173 }
 0x403   : > { %v1181_v58 = vmul.f32 0.0078125, %v1174_v51 }
 0x405   : > { %v1187_v0 = vadd.f32 1e-06, %v1181_v58 }
 0x406   : > { %v1176_v1 = vpop.xlane.xlu1 %1175 }
 0x407   : > { %v1182_v2 = vmul.f32 0.0078125, %v1176_v1  ;;  %4832 = vrsqrt.f32 %v1187_v0 }
 0x409   : > { %v1188_v3 = vadd.f32 1e-06, %v1182_v2 }
 0x40b   : > { %4834 = vrsqrt.f32 %v1188_v3 }
 0x411   : > { %v4833_v4 = vpop.eup %4832 }
 0x412   : > { %v1199_v5 = vmul.f32 %v4833_v4, %v1157_v35 }
 0x414   : > { %v1211_v6 = vmul.f32 %v4084_v44, %v1199_v5 }
 0x415   : > { %v4835_v7 = vpop.eup %4834 }
 0x416   : > { %v1200_v8 = vmul.f32 %v4835_v7, %v1158_v40  ;;  %v1223_v10 = vadd.f32 %v4085_v49, %v1211_v6 }
 0x418   : > { %v1212_v9 = vmul.f32 %v4084_v44, %v1200_v8 }
 0x41a   : > { %v1224_v11 = vadd.f32 %v4085_v49, %v1212_v9 }
 0x41c   : > { %v1227_v12 = vpack.c.bf16 %v1224_v11, %v1223_v10 }
 0x41e   : > { %1458 = vmatmul.mubr.bf16.gmra.mrb[8].mxu0 %v1227_v12  ;;  %4399 = vmatmul.mubr.bf16.gmra.mrb[8].mxu1 %v1227_v12 }
 0x455   : > { %v1439_v21 = vpop.f32.mrb[0].mxu0  ;;  %v1502_v22 = vpop.f32.mrb[0].mxu1 }
 0x456   : > { %v1441_v24 = vpop.f32.mrb[1].mxu0  ;;  %v4392_v25 = vpop.f32.mrb[1].mxu1  ;;  %v1440_v28 = vadd.f32 %v1439_v21, %v5950_v18  ;;  %v5962_v29 = vadd.f32 %v1502_v22, %v5954_v19 }
 0x457   : > { %v1443_v26 = vpop.f32.mrb[2].mxu0  ;;  %v1505_v27 = vpop.f32.mrb[2].mxu1  ;;  %v1442_v34 = vadd.f32 %v1441_v24, %v5958_v23 }
 0x458   : > { %v1444_v30 = vadd.f32 %v1443_v26, %v5950_v18  ;;  %v5966_v31 = vadd.f32 %v1505_v27, %v5954_v19  ;;  %v1445_v32 = vpop.f32.mrb[3].mxu0  ;;  %v4393_v33 = vpop.f32.mrb[3].mxu1 }
 0x459   : > { %v1446_v35 = vadd.f32 %v1445_v32, %v5958_v23 }
 0x45a   : > { %v4669_v36 = vpack.i.bf16 %v1444_v30, %v1440_v28  ;;  %v1549_v37 = vpack.c.bf16 %v1444_v30, %v1440_v28  ;;  %v4679_v38 = vpack.i.bf16 %v5966_v31, %v5962_v29  ;;  %v1609_v39 = vpack.c.bf16 %v5966_v31, %v5962_v29  ;;  %v6102_v29 = vld [vmem:[%s5797_s25 + $0x30] sm:$0xff]   ;;  %v6107_v31 = vld [vmem:[%s5797_s25 + $0x38] sm:$0xff]  }
 0x45b   : > { %v4659_v40 = vpack.i.bf16 %v1446_v35, %v1442_v34  ;;  %v1579_v41 = vpack.c.bf16 %v1446_v35, %v1442_v34 }
 0x45c   : > { %4406 = vmatprep.mubr.msk.bf16.mxu0 %vm1632_vm3, %v1549_v37 }
 0x45d   : > { %v1449_v42 = vpop.f32.mrb[4].mxu0  ;;  %v1510_v44 = vpop.f32.mrb[4].mxu1  ;;  %4514 = vmatprep.subr.msk.bf16.mxu0 %vm1632_vm3, %v1579_v41  ;;  %4660 = vrot.lane.b32.xlu0 %v4659_v40, %s5324_s6  ;;  %v1640_v45 = vsel %vm1632_vm3, %v1579_v41, 0 }
 0x45e   : > { %v1451_v46 = vpop.f32.mrb[5].mxu0  ;;  %v4396_v47 = vpop.f32.mrb[5].mxu1  ;;  %4403 = vmatpush3.bf16.xpose.msra.mxu0 %v1640_v45  ;;  %v1450_v52 = vadd.f32 %v1449_v42, %v5950_v18  ;;  %v5980_v53 = vadd.f32 %v1510_v44, %v5954_v19 }
 0x45f   : > { %v1453_v48 = vpop.f32.mrb[6].mxu0  ;;  %v1513_v49 = vpop.f32.mrb[6].mxu1  ;;  %v1452_v59 = vadd.f32 %v1451_v46, %v5958_v23 }
 0x460   : > { %v1454_v50 = vadd.f32 %v1453_v48, %v5950_v18  ;;  %v5984_v54 = vadd.f32 %v1513_v49, %v5954_v19  ;;  %v1455_v55 = vpop.f32.mrb[7].mxu0  ;;  %v4397_v56 = vpop.f32.mrb[7].mxu1 }
 0x461   : > { %v1456_v60 = vadd.f32 %v1455_v55, %v5958_v23 }
 0x462   : > { %v4674_v57 = vpack.i.bf16 %v1454_v50, %v1450_v52  ;;  %v5988_v61 = vpack.c.bf16 %v1454_v50, %v1450_v52  ;;  %v4684_v62 = vpack.i.bf16 %v5984_v54, %v5980_v53  ;;  %v5994_v63 = vpack.c.bf16 %v5984_v54, %v5980_v53 }
 0x463   : > { %v4664_v51 = vpack.i.bf16 %v1456_v60, %v1452_v59  ;;  %v5996_v58 = vpack.c.bf16 %v1456_v60, %v1452_v59  ;;  %v6068_v60 = vld [vmem:[#allocation10] ss:$0 sm:$0xff] }
 0x464   : > { %v1844_v1 = vsel %vm1842_vm4, %v5994_v63, 0  ;;  %v2336_v50 = vrot.slane %v5994_v63, 4 }
 0x465   : > { %4665 = vrot.lane.b32.xlu1 %v4664_v51, %s5324_s6  ;;  %4515 = vmatprep.subr.msk.bf16.mxu0 %vm1632_vm3, %v5996_v58  ;;  %v1643_v0 = vsel %vm1632_vm3, %v5996_v58, 0 }
 0x466   : > { %4405 = vmatpush3.bf16.xpose.msra.mxu0 %v1643_v0 }
 0x467   : > { %4418 = vmatprep.subr.bf16.mxu0 %v1609_v39 }
 0x469   : > { %4670 = vrot.lane.b32.xlu1 %v4669_v36, %s5324_s6 }
 0x46d   : > { %4675 = vrot.lane.b32.xlu1 %v4674_v57, %s5324_s6  ;;  %4407 = vmatmul.mubr.msk.bf16.vlgmr.msra.gmra.mrb[12].mxu0 %vm1632_vm3, %v5988_v61 }
 0x46e   : > { %4419 = vmatpush3.bf16.msra.mxu0 %v1609_v39 }
 0x46f   : > { %4518 = vmatprep.subr.msk.bf16.mxu0 %vm1842_vm4, %v5994_v63 }
 0x472   : > { %4421 = vmatpush3.bf16.msra.mxu0 %v1844_v1 }
 0x4cf   : > { %v4661_v2 = vpop.permute.xlu0 %4660 }
 0x4d0   : > { %v4663_v3 = vunpack.i.h.bf16 %v4661_v2  ;;  %v4662_v4 = vunpack.i.l.bf16 %v4661_v2 }
 0x4d2   : > { %v1582_v5 = vpack.c.bf16 %v4663_v3, %v4662_v4 }
 0x4d4   : > { %4516 = vmatprep.subr.msk.bf16.mxu1 %vm1632_vm3, %v1582_v5  ;;  %v1700_v6 = vsel %vm1632_vm3, %v1582_v5, 0 }
 0x4d5   : > { %4411 = vmatpush3.bf16.xpose.msra.mxu1 %v1700_v6 }
 0x4d7   : > { %v4666_v7 = vpop.permute.xlu1 %4665 }
 0x4d8   : > { %v4668_v8 = vunpack.i.h.bf16 %v4666_v7  ;;  %v4667_v9 = vunpack.i.l.bf16 %v4666_v7 }
 0x4da   : > { %v6013_v10 = vpack.c.bf16 %v4668_v8, %v4667_v9  ;;  %v6077_v8 = vld [vmem:[%s5797_s25 + $0x20] sm:$0xff]  }
 0x4db   : > { %v4671_v11 = vpop.permute.xlu1 %4670  ;;  %4434 = vmatprep.subr.bf16.mxu0 %v6077_v8 }
 0x4dc   : > { %v4673_v12 = vunpack.i.h.bf16 %v4671_v11  ;;  %v4672_v43 = vunpack.i.l.bf16 %v4671_v11  ;;  %4517 = vmatprep.subr.msk.bf16.mxu1 %vm1632_vm3, %v6013_v10  ;;  %v1703_v16 = vsel %vm1632_vm3, %v6013_v10, 0 }
 0x4dd   : > { %4413 = vmatpush3.bf16.xpose.msra.mxu1 %v1703_v16 }
 0x4de   : > { %v1552_v21 = vpack.c.bf16 %v4673_v12, %v4672_v43 }
 0x4df   : > { %v4676_v22 = vpop.permute.xlu1 %4675 }
 0x4e0   : > { %v4678_v24 = vunpack.i.h.bf16 %v4676_v22  ;;  %v4677_v25 = vunpack.i.l.bf16 %v4676_v22  ;;  %4414 = vmatprep.mubr.msk.bf16.mxu1 %vm1632_vm3, %v1552_v21 }
 0x4e2   : > { %v6020_v26 = vpack.c.bf16 %v4678_v24, %v4677_v25 }
 0x4e4   : > { %4415 = vmatmul.mubr.msk.bf16.vlgmr.msra.gmra.mrb[12].mxu1 %vm1632_vm3, %v6020_v26 }
 0x4f1   : > { %v1459_v27 = vpop.f32.mrb[8].mxu0  ;;  %v1518_v28 = vpop.f32.mrb[8].mxu1 }
 0x4f2   : > { %v6025_v30 = vadd.f32 %v1459_v27, %v5950_v18  ;;  %v6028_v32 = vadd.f32 %v1518_v28, %v5954_v19  ;;  %v1461_v33 = vpop.f32.mrb[9].mxu0  ;;  %v4400_v34 = vpop.f32.mrb[9].mxu1 }
 0x4f3   : > { %v6031_v35 = vadd.f32 %v1461_v33, %v5958_v23  ;;  %v1463_v36 = vpop.f32.mrb[10].mxu0  ;;  %v1521_v37 = vpop.f32.mrb[10].mxu1 }
 0x4f4   : > { %v6034_v39 = vadd.f32 %v1463_v36, %v5950_v18  ;;  %v6037_v40 = vadd.f32 %v1521_v37, %v5954_v19  ;;  %v1465_v41 = vpop.f32.mrb[11].mxu0  ;;  %v4401_v42 = vpop.f32.mrb[11].mxu1 }
 0x4f5   : > { %v6040_v44 = vadd.f32 %v1465_v41, %v5958_v23  ;;  %v2120_v23 = vrot.slane %v5988_v61, 4 }
 0x4f6   : > { %v4694_v45 = vpack.i.bf16 %v6034_v39, %v6025_v30  ;;  %v1551_v46 = vpack.c.bf16 %v6034_v39, %v6025_v30  ;;  %v4699_v47 = vpack.i.bf16 %v6037_v40, %v6028_v32  ;;  %v1611_v18 = vpack.c.bf16 %v6037_v40, %v6028_v32 }
 0x4f7   : > { %v4689_v19 = vpack.i.bf16 %v6040_v44, %v6031_v35  ;;  %v1581_v48 = vpack.c.bf16 %v6040_v44, %v6031_v35 }
 0x4f8   : > { %v6055_v49 = vrot.slane %v1551_v46, 4  ;;  %v6057_v52 = vrot.slane %v1611_v18, 4 }
 0x4fa   : > { %v6062_v55 = vsel %vm1842_vm4, %v2120_v23, %v6055_v49  ;;  %v6066_v56 = vsel %vm1842_vm4, %v2336_v50, %v6057_v52 }
 0x540   : > { %v4408_v59 = vpop.f32.mrb[12].mxu0 }
 0x541   : > { %v1755_v57 = vmul.f32 0.125, %v4408_v59  ;;  %v1679_v61 = vpop.f32.mrb[13].mxu0 }
 0x542   : > { %v1753_v51 = vmul.f32 0.125, %v1679_v61  ;;  %v4409_v0 = vpop.f32.mrb[14].mxu0 }
 0x543   : > { %v1682_v1 = vpop.f32.mrb[15].mxu0  ;;  %v1767_v63 = vadd.f32 %v6068_v60, %v1755_v57  ;;  %v6113_v0 = vrot.slane %v1581_v48, 4 }
 0x544   : > { %v1754_v2 = vmul.f32 0.125, %v1682_v1  ;;  %v1765_v4 = vadd.f32 %v6068_v60, %v1753_v51  ;;  %v6095_v51 = vld [vmem:[%s5797_s25 + $0x28] sm:$0xff]   ;;  %v2125_v1 = vrot.slane %v5996_v58, 4 }
 0x545   : > { %v1778_v3 = vsel %vm1771_vm5, %v1767_v63, -inf }
 0x546   : > { %1779 = vmax.xlane.f32.xlu0 %v1778_v3  ;;  %v1766_v5 = vadd.f32 %v6068_v60, %v1754_v2  ;;  %v1772_v7 = vsel %vm1771_vm5, %v1765_v4, -inf  ;;  %v6122_v2 = vsel %vm1842_vm4, %v2125_v1, %v6113_v0 }
 0x548   : > { %v1775_v6 = vsel %vm1771_vm5, %v1766_v5, -inf }
 0x549   : > { %1776 = vmax.xlane.f32.xlu1 %v1775_v6 }
 0x54a   : > { %1773 = vmax.xlane.f32.xlu0 %v1772_v7 }
 0x5b7   : > { %v4416_v9 = vpop.f32.mrb[12].mxu1 }
 0x5b8   : > { %v1758_v11 = vmul.f32 0.125, %v4416_v9  ;;  %v1739_v12 = vpop.f32.mrb[13].mxu1 }
 0x5b9   : > { %v1756_v43 = vmul.f32 0.125, %v1739_v12  ;;  %v4417_v16 = vpop.f32.mrb[14].mxu1 }
 0x5ba   : > { %v1742_v21 = vpop.f32.mrb[15].mxu1  ;;  %v1770_v22 = vadd.f32 %v6068_v60, %v1758_v11 }
 0x5bb   : > { %v1757_v24 = vmul.f32 0.125, %v1742_v21  ;;  %v1768_v25 = vadd.f32 %v6068_v60, %v1756_v43 }
 0x5bc   : > { %v1787_v27 = vsel %vm1771_vm5, %v1770_v22, -inf }
 0x5bd   : > { %1788 = vmax.xlane.f32.xlu1 %v1787_v27  ;;  %v1781_v28 = vsel %vm1771_vm5, %v1768_v25, -inf  ;;  %v1769_v33 = vadd.f32 %v6068_v60, %v1757_v24 }
 0x5be   : > { %1782 = vmax.xlane.f32.xlu0 %v1781_v28 }
 0x5bf   : > { %v1784_v34 = vsel %vm1771_vm5, %v1769_v33, -inf }
 0x5c2   : > { %1785 = vmax.xlane.f32.xlu0 %v1784_v34 }
 0x5ce   : > { %4685 = vrot.lane.b32.xlu1 %v4684_v62, %s5324_s6 }
 0x5d3   : > { %v1780_v36 = vpop.xlane.xlu0 %1779 }
 0x5d4   : > { %v1792_v37 = vsub.f32 %v1767_v63, %v1780_v36 }
 0x5d6   : > { %v1800_v41 = vmul.f32 1.442695, %v1792_v37  ;;  %v1777_v42 = vpop.xlane.xlu1 %1776 }
 0x5d7   : > { %v1791_v46 = vsub.f32 %v1766_v5, %v1777_v42  ;;  %v1774_v18 = vpop.xlane.xlu0 %1773 }
 0x5d8   : > { %v1790_v23 = vsub.f32 %v1765_v4, %v1774_v18  ;;  %4680 = vrot.lane.b32.xlu0 %v4679_v38, %s5324_s6  ;;  %4836 = vpow2.f32 %v1800_v41 }
 0x5d9   : > { %v1798_v50 = vmul.f32 1.442695, %v1791_v46 }
 0x5da   : > { %v1796_v59 = vmul.f32 1.442695, %v1790_v23 }
 0x5db   : > { %4838 = vpow2.f32 %v1798_v50  ;;  %v6140_v50 = vld [vmem:[%s5797_s25 + $0x8] sm:$0xff]  }
 0x5dc   : > { %4840 = vpow2.f32 %v1796_v59 }
 0x5e2   : > { %v4837_v53 = vpop.eup %4836 }
 0x5e3   : > { %v1833_v61 = vpack.c.bf16 %v4837_v53, %v4837_v53  ;;  %v1814_v63 = vsel %vm1771_vm5, %v4837_v53, 0.0  ;;  %v6148_v53 = vld [vmem:[%s5797_s25 + $0x10] sm:$0xff]  }
 0x5e5   : > { %v4839_v54 = vpop.eup %4838 }
 0x5e6   : > { %v4841_v62 = vpop.eup %4840  ;;  %v1811_v48 = vsel %vm1771_vm5, %v4839_v54, 0.0 }
 0x5e7   : > { %v1832_v57 = vpack.c.bf16 %v4839_v54, %v4841_v62  ;;  %v1808_v38 = vsel %vm1771_vm5, %v4841_v62, 0.0  ;;  %v6153_v54 = vld [vmem:[%s5797_s25 + $0x18] sm:$0xff]  }
 0x5e9   : > { %4422 = vmatprep.mubr.msk.bf16.mxu0 %vm1771_vm5, %v1832_v57 }
 0x5ea   : > { %4423 = vmatmul.mubr.msk.bf16.vlgmr.msra.gmra.mrb[16].mxu0 %vm1771_vm5, %v1833_v61 }
 0x5eb   : > { %4435 = vmatpush3.bf16.msra.mxu0 %v6077_v8 }
 0x5ec   : > { %4436 = vmatprep.subr.bf16.mxu0 %v6095_v51 }
 0x5ef   : > { %4437 = vmatpush3.bf16.msra.mxu0 %v6095_v51 }
 0x5f0   : > { %4438 = vmatprep.subr.bf16.mxu0 %v6102_v29 }
 0x5f2   : > { %1809 = vadd.xlane.f32.xlu1 %v1808_v38 }
 0x5f3   : > { %4439 = vmatpush3.bf16.msra.mxu0 %v6102_v29 }
 0x5f4   : > { %4440 = vmatprep.subr.bf16.mxu0 %v6107_v31 }
 0x5f7   : > { %4441 = vmatpush3.bf16.msra.mxu0 %v6107_v31  ;;  %1815 = vadd.xlane.f32.xlu0 %v1814_v63 }
 0x5f8   : > { %4520 = vmatprep.subr.msk.bf16.mxu0 %vm1632_vm3, %v6122_v2 }
 0x5fb   : > { %1812 = vadd.xlane.f32.xlu0 %v1811_v48 }
 0x64a   : > { %v1789_v3 = vpop.xlane.xlu1 %1788 }
 0x64b   : > { %v1795_v4 = vsub.f32 %v1770_v22, %v1789_v3  ;;  %v1783_v5 = vpop.xlane.xlu0 %1782 }
 0x64c   : > { %v1793_v6 = vsub.f32 %v1768_v25, %v1783_v5  ;;  %v6132_v25 = vld [vmem:[%s5797_s25] sm:$0xff]  }
 0x64d   : > { %v1806_v7 = vmul.f32 1.442695, %v1795_v4 }
 0x64e   : > { %v1802_v58 = vmul.f32 1.442695, %v1793_v6  ;;  %v4686_v11 = vpop.permute.xlu1 %4685 }
 0x64f   : > { %v1786_v9 = vpop.xlane.xlu0 %1785  ;;  %v4688_v16 = vunpack.i.h.bf16 %v4686_v11  ;;  %v4687_v24 = vunpack.i.l.bf16 %v4686_v11 }
 0x650   : > { %4842 = vpow2.f32 %v1802_v58  ;;  %v1794_v12 = vsub.f32 %v1769_v33, %v1786_v9 }
 0x651   : > { %4844 = vpow2.f32 %v1806_v7  ;;  %v6127_v36 = vpack.c.bf16 %v4688_v16, %v4687_v24  ;;  %v2195_v16 = vrot.slane %v6013_v10, 4 }
 0x652   : > { %v1804_v43 = vmul.f32 1.442695, %v1794_v12 }
 0x653   : > { %v4681_v21 = vpop.permute.xlu0 %4680  ;;  %v1901_v37 = vsel %vm1842_vm4, %v6127_v36, 0 }
 0x654   : > { %4846 = vpow2.f32 %v1804_v43  ;;  %v4683_v27 = vunpack.i.h.bf16 %v4681_v21  ;;  %v4682_v28 = vunpack.i.l.bf16 %v4681_v21 }
 0x656   : > { %v1612_v34 = vpack.c.bf16 %v4683_v27, %v4682_v28 }
 0x658   : > { %4426 = vmatprep.subr.bf16.mxu1 %v1612_v34 }
 0x659   : > { %4427 = vmatpush3.bf16.msra.mxu1 %v1612_v34 }
 0x65a   : > { %v4843_v22 = vpop.eup %4842  ;;  %4519 = vmatprep.subr.msk.bf16.mxu1 %vm1842_vm4, %v6127_v36 }
 0x65b   : > { %v1817_v33 = vsel %vm1771_vm5, %v4843_v22, 0.0  ;;  %v4845_v41 = vpop.eup %4844 }
 0x65c   : > { %1818 = vadd.xlane.f32.xlu0 %v1817_v33  ;;  %v1835_v23 = vpack.c.bf16 %v4845_v41, %v4845_v41  ;;  %v1823_v59 = vsel %vm1771_vm5, %v4845_v41, 0.0  ;;  %v2190_v33 = vrot.slane %v6020_v26, 4 }
 0x65d   : > { %4429 = vmatpush3.bf16.msra.mxu1 %v1901_v37 }
 0x65e   : > { %v4847_v42 = vpop.eup %4846  ;;  %4446 = vmatprep.subr.bf16.mxu1 %v6132_v25 }
 0x65f   : > { %v1820_v46 = vsel %vm1771_vm5, %v4847_v42, 0.0  ;;  %v1834_v18 = vpack.c.bf16 %v4847_v42, %v4843_v22 }
 0x660   : > { %1821 = vadd.xlane.f32.xlu1 %v1820_v46 }
 0x661   : > { %4430 = vmatprep.mubr.msk.bf16.mxu1 %vm1771_vm5, %v1834_v18 }
 0x662   : > { %4431 = vmatmul.mubr.msk.bf16.vlgmr.msra.gmra.mrb[16].mxu1 %vm1771_vm5, %v1835_v23 }
 0x663   : > { %4447 = vmatpush3.bf16.msra.mxu1 %v6132_v25 }
 0x664   : > { %1824 = vadd.xlane.f32.xlu1 %v1823_v59  ;;  %4448 = vmatprep.subr.bf16.mxu1 %v6140_v50 }
 0x667   : > { %4449 = vmatpush3.bf16.msra.mxu1 %v6140_v50 }
 0x668   : > { %4450 = vmatprep.subr.bf16.mxu1 %v6148_v53 }
 0x66b   : > { %4451 = vmatpush3.bf16.msra.mxu1 %v6148_v53 }
 0x66c   : > { %4452 = vmatprep.subr.bf16.mxu1 %v6153_v54 }
 0x66f   : > { %4453 = vmatpush3.bf16.msra.mxu1 %v6153_v54 }
 0x672   : > { %4690 = vrot.lane.b32.xlu0 %v4689_v19, %s5324_s6 }
 0x675   : > { %4695 = vrot.lane.b32.xlu1 %v4694_v45, %s5324_s6 }
 0x67f   : > { %v1810_v57 = vpop.xlane.xlu1 %1809 }
 0x680   : > { %4848 = vrcp.f32 %v1810_v57 }
 0x684   : > { %v1816_v62 = vpop.xlane.xlu0 %1815 }
 0x685   : > { %4850 = vrcp.f32 %v1816_v62 }
 0x688   : > { %v1813_v61 = vpop.xlane.xlu0 %1812 }
 0x689   : > { %4852 = vrcp.f32 %v1813_v61 }
 0x68a   : > { %v4849_v1 = vpop.eup %4848 }
 0x68f   : > { %v4851_v48 = vpop.eup %4850 }
 0x693   : > { %v4853_v4 = vpop.eup %4852 }
 0x6bd   : > { %v4424_v38 = vpop.f32.mrb[16].mxu0 }
 0x6be   : > { %v1880_v63 = vpop.f32.mrb[17].mxu0  ;;  %v1953_v5 = vmul.f32 %v4851_v48, %v4424_v38  ;;  %v2135_v48 = vsel %vm1632_vm3, %v6122_v2, 0 }
 0x6bf   : > { %v4425_v3 = vpop.f32.mrb[18].mxu0  ;;  %v1951_v44 = vmul.f32 %v4849_v1, %v1880_v63 }
 0x6c0   : > { %v1883_v35 = vpop.f32.mrb[19].mxu0  ;;  %v1958_v58 = vpack.c.bf16 %v1953_v5, %v1953_v5  ;;  %v2138_v3 = vsel %vm1632_vm3, %v6113_v0, 0 }
 0x6c1   : > { %v1952_v19 = vmul.f32 %v4853_v4, %v1883_v35 }
 0x6c3   : > { %v1957_v6 = vpack.c.bf16 %v1952_v19, %v1951_v44 }
 0x6c5   : > { %4454 = vmatprep.mubr.msk.bf16.mxu1 %vm1632_vm3, %v1957_v6 }
 0x6c6   : > { %4455 = vmatmul.mubr.msk.bf16.vlgmr.msra.gmra.mrb[20].mxu1 %vm1632_vm3, %v1958_v58 }
 0x6e9   : > { %v1819_v30 = vpop.xlane.xlu0 %1818 }
 0x6ea   : > { %4854 = vrcp.f32 %v1819_v30 }
 0x6ed   : > { %v1822_v39 = vpop.xlane.xlu1 %1821  ;;  %v4691_v45 = vpop.permute.xlu0 %4690 }
 0x6ee   : > { %v4693_v7 = vunpack.i.h.bf16 %v4691_v45  ;;  %v4692_v9 = vunpack.i.l.bf16 %v4691_v45 }
 0x6f0   : > { %v1584_v11 = vpack.c.bf16 %v4693_v7, %v4692_v9 }
 0x6f1   : > { %v1825_v12 = vpop.xlane.xlu1 %1824 }
 0x6f2   : > { %v2196_v43 = vrot.slane %v1584_v11, 4  ;;  %4856 = vrcp.f32 %v1825_v12 }
 0x6f3   : > { %4858 = vrcp.f32 %v1822_v39 }
 0x6f4   : > { %v2197_v21 = vsel %vm1842_vm4, %v2195_v16, %v2196_v43  ;;  %v2208_v10 = vsel %vm1632_vm3, %v2196_v43, 0  ;;  %v4855_v46 = vpop.eup %4854 }
 0x6f5   : > { %v4696_v24 = vpop.permute.xlu1 %4695  ;;  %4522 = vmatprep.subr.msk.bf16.mxu1 %vm1632_vm3, %v2197_v21  ;;  %v2205_v27 = vsel %vm1632_vm3, %v2197_v21, 0 }
 0x6f6   : > { %v4698_v28 = vunpack.i.h.bf16 %v4696_v24  ;;  %v4697_v34 = vunpack.i.l.bf16 %v4696_v24  ;;  %4467 = vmatpush3.bf16.xpose.msra.mxu1 %v2205_v27 }
 0x6f7   : > { %4523 = vmatprep.subr.msk.bf16.mxu1 %vm1632_vm3, %v2196_v43 }
 0x6f8   : > { %v1554_v22 = vpack.c.bf16 %v4698_v28, %v4697_v34 }
 0x6fa   : > { %v2191_v37 = vrot.slane %v1554_v22, 4 }
 0x6fc   : > { %v2192_v41 = vsel %vm1842_vm4, %v2190_v33, %v2191_v37  ;;  %v4857_v23 = vpop.eup %4856 }
 0x6fd   : > { %4470 = vmatprep.mubr.msk.bf16.mxu1 %vm1632_vm3, %v2192_v41  ;;  %v4859_v26 = vpop.eup %4858 }
 0x6fe   : > { %4469 = vmatpush3.bf16.xpose.msra.mxu1 %v2208_v10 }
 0x705   : > { %4471 = vmatmul.mubr.msk.bf16.vlgmr.msra.gmra.mrb[24].mxu1 %vm1632_vm3, %v2191_v37 }
 0x735   : > { %v4432_v42 = vpop.f32.mrb[16].mxu1 }
 0x736   : > { %v1937_v18 = vpop.f32.mrb[17].mxu1  ;;  %v1956_v57 = vmul.f32 %v4857_v23, %v4432_v42 }
 0x737   : > { %v1954_v59 = vmul.f32 %v4855_v46, %v1937_v18  ;;  %v4433_v62 = vpop.f32.mrb[18].mxu1 }
 0x738   : > { %v1940_v61 = vpop.f32.mrb[19].mxu1  ;;  %v1960_v63 = vpack.c.bf16 %v1956_v57, %v1956_v57  ;;  %v6230_v57 = vld [vmem:[%s6838_s24] ss:$0 sm:$0xff] }
 0x739   : > { %v1955_v38 = vmul.f32 %v4859_v26, %v1940_v61  ;;  %v6222_v26 = vld [vmem:[%s6836_s27] ss:$0 sm:$0xff] }
 0x73b   : > { %v1959_v1 = vpack.c.bf16 %v1955_v38, %v1954_v59  ;;  %v4944_v38 = vld [vmem:[#allocation17] sm:$0xff] }
 0x73d   : > { %4442 = vmatprep.mubr.msk.bf16.mxu0 %vm1632_vm3, %v1959_v1 }
 0x73e   : > { %4443 = vmatmul.mubr.msk.bf16.vlgmr.msra.gmra.mrb[20].mxu0 %vm1632_vm3, %v1960_v63 }
 0x73f   : > { %4459 = vmatpush3.bf16.xpose.msra.mxu0 %v2135_v48  ;;  %4462 = vmatprep.mubr.msk.bf16.mxu0 %vm1632_vm3, %v6062_v55  ;;  %v2347_v55 = vsel %vm1842_vm4, %v6057_v52, 0 }
 0x740   : > { %4521 = vmatprep.subr.msk.bf16.mxu0 %vm1632_vm3, %v6113_v0 }
 0x747   : > { %4461 = vmatpush3.bf16.xpose.msra.mxu0 %v2138_v3 }
 0x748   : > { %4474 = vmatprep.subr.bf16.mxu0 %v6066_v56 }
 0x74e   : > { %4463 = vmatmul.mubr.msk.bf16.vlgmr.msra.gmra.mrb[24].mxu0 %vm1632_vm3, %v6055_v49 }
 0x74f   : > { %4475 = vmatpush3.bf16.msra.mxu0 %v6066_v56 }
 0x750   : > { %4524 = vmatprep.subr.msk.bf16.mxu0 %vm1842_vm4, %v6057_v52 }
 0x753   : > { %4477 = vmatpush3.bf16.msra.mxu0 %v2347_v55 }
 0x754   : > { %4490 = vmatprep.subr.bf16.mxu0 %v6077_v8 }
 0x799   : > { %v4456_v2 = vpop.f32.mrb[20].mxu1 }
 0x79a   : > { %v2103_v4 = vpop.f32.mrb[21].mxu1 }
 0x79b   : > { %v4457_v0 = vpop.f32.mrb[22].mxu1 }
 0x79c   : > { %v2106_v5 = vpop.f32.mrb[23].mxu1 }
 0x7d8   : > { %v4472_v35 = vpop.f32.mrb[24].mxu1 }
 0x7d9   : > { %v2244_v44 = vpop.f32.mrb[25].mxu1  ;;  %v2263_v28 = vmul.f32 0.125, %v4472_v35 }
 0x7da   : > { %v2261_v19 = vmul.f32 0.125, %v2244_v44  ;;  %v4473_v6 = vpop.f32.mrb[26].mxu1 }
 0x7db   : > { %v2247_v49 = vpop.f32.mrb[27].mxu1  ;;  %v2269_v23 = vadd.f32 %v6068_v60, %v2263_v28 }
 0x7dc   : > { %v2262_v58 = vmul.f32 0.125, %v2247_v49  ;;  %v2267_v56 = vadd.f32 %v6068_v60, %v2261_v19 }
 0x7dd   : > { %v2285_v62 = vsel %vm1771_vm5, %v2269_v23, -inf }
 0x7de   : > { %v2279_v30 = vsel %vm1771_vm5, %v2267_v56, -inf  ;;  %v2268_v39 = vadd.f32 %v6068_v60, %v2262_v58 }
 0x7df   : > { %2280 = vmax.xlane.f32.xlu0 %v2279_v30 }
 0x7e0   : > { %v2282_v52 = vsel %vm1771_vm5, %v2268_v39, -inf }
 0x7e1   : > { %2283 = vmax.xlane.f32.xlu1 %v2282_v52 }
 0x811   : > { %v4444_v45 = vpop.f32.mrb[20].mxu0 }
 0x812   : > { %v6201_v7 = vadd.f32 %v4456_v2, %v4444_v45  ;;  %v2025_v9 = vpop.f32.mrb[21].mxu0 }
 0x813   : > { %v2104_v11 = vadd.f32 %v2103_v4, %v2025_v9  ;;  %v4445_v12 = vpop.f32.mrb[22].mxu0 }
 0x814   : > { %v2028_v43 = vpop.f32.mrb[23].mxu0 }
 0x815   : > { %v6203_v16 = vadd.f32 %v2106_v5, %v2028_v43 }
 0x821   : > { %v4464_v21 = vpop.f32.mrb[24].mxu0 }
 0x822   : > { %v2260_v24 = vmul.f32 0.125, %v4464_v21  ;;  %v2174_v27 = vpop.f32.mrb[25].mxu0 }
 0x823   : > { %v2258_v34 = vmul.f32 0.125, %v2174_v27  ;;  %v4465_v22 = vpop.f32.mrb[26].mxu0  ;;  %v2399_v27 = vrot.slane %v6127_v36, 4 }
 0x824   : > { %v2177_v33 = vpop.f32.mrb[27].mxu0  ;;  %v2266_v37 = vadd.f32 %v6068_v60, %v2260_v24 }
 0x825   : > { %v2259_v41 = vmul.f32 0.125, %v2177_v33  ;;  %v2264_v10 = vadd.f32 %v6068_v60, %v2258_v34 }
 0x826   : > { %v2276_v42 = vsel %vm1771_vm5, %v2266_v37, -inf }
 0x827   : > { %2277 = vmax.xlane.f32.xlu0 %v2276_v42  ;;  %v2270_v46 = vsel %vm1771_vm5, %v2264_v10, -inf  ;;  %v2265_v18 = vadd.f32 %v6068_v60, %v2259_v41  ;;  %v2585_v60 = vadd.f32 %v6222_v26, %v2104_v11 }
 0x828   : > { %2271 = vmax.xlane.f32.xlu1 %v2270_v46 }
 0x829   : > { %v2273_v59 = vsel %vm1771_vm5, %v2265_v18, -inf  ;;  %v2598_v61 = vmul.f32 %v6230_v57, %v2585_v60 }
 0x82b   : > { %2274 = vmax.xlane.f32.xlu0 %v2273_v59  ;;  %v6233_v1 = vadd.f32 %v4944_v38, %v2598_v61 }
 0x82c   : > { %2286 = vmax.xlane.f32.xlu1 %v2285_v62  ;;  %v2587_v62 = vadd.f32 %v6222_v26, %v6201_v7 }
 0x841   : > { %4700 = vrot.lane.b32.xlu0 %v4699_v47, %s5324_s6 }
 0x860   : > { %2612 = vadd.xlane.f32.xlu0 %v6233_v1 }
 0x86c   : > { %v2281_v32 = vpop.xlane.xlu0 %2280 }
 0x86d   : > { %v2291_v40 = vsub.f32 %v2267_v56, %v2281_v32 }
 0x86e   : > { %v2284_v47 = vpop.xlane.xlu1 %2283 }
 0x86f   : > { %v2300_v63 = vmul.f32 1.442695, %v2291_v40  ;;  %v2292_v48 = vsub.f32 %v2268_v39, %v2284_v47 }
 0x871   : > { %4860 = vpow2.f32 %v2300_v63  ;;  %v2302_v3 = vmul.f32 1.442695, %v2292_v48 }
 0x873   : > { %4862 = vpow2.f32 %v2302_v3 }
 0x87b   : > { %v4861_v55 = vpop.eup %4860 }
 0x87c   : > { %v2315_v2 = vsel %vm1771_vm5, %v4861_v55, 0.0 }
 0x87d   : > { %v4863_v4 = vpop.eup %4862  ;;  %2316 = vadd.xlane.f32.xlu1 %v2315_v2 }
 0x87e   : > { %v2332_v0 = vpack.c.bf16 %v4863_v4, %v4861_v55  ;;  %v2318_v5 = vsel %vm1771_vm5, %v4863_v4, 0.0 }
 0x880   : > { %4486 = vmatprep.mubr.msk.bf16.mxu1 %vm1771_vm5, %v2332_v0 }
 0x881   : > { %2319 = vadd.xlane.f32.xlu1 %v2318_v5 }
 0x8b4   : > { %v2278_v35 = vpop.xlane.xlu0 %2277 }
 0x8b5   : > { %v2290_v44 = vsub.f32 %v2266_v37, %v2278_v35  ;;  %v2272_v19 = vpop.xlane.xlu1 %2271 }
 0x8b6   : > { %v2288_v6 = vsub.f32 %v2264_v10, %v2272_v19 }
 0x8b7   : > { %v2298_v49 = vmul.f32 1.442695, %v2290_v44 }
 0x8b8   : > { %v2294_v58 = vmul.f32 1.442695, %v2288_v6  ;;  %v2275_v56 = vpop.xlane.xlu0 %2274 }
 0x8b9   : > { %4864 = vpow2.f32 %v2298_v49  ;;  %v2289_v30 = vsub.f32 %v2265_v18, %v2275_v56  ;;  %v2287_v39 = vpop.xlane.xlu1 %2286 }
 0x8ba   : > { %v2293_v52 = vsub.f32 %v2269_v23, %v2287_v39  ;;  %4866 = vpow2.f32 %v2294_v58  ;;  %v2586_v23 = vadd.f32 %v6222_v26, %v6203_v16 }
 0x8bb   : > { %v2296_v45 = vmul.f32 1.442695, %v2289_v30 }
 0x8bc   : > { %v2304_v9 = vmul.f32 1.442695, %v2293_v52  ;;  %v4701_v11 = vpop.permute.xlu0 %4700  ;;  %v2599_v16 = vmul.f32 %v6230_v57, %v2586_v23  ;;  %v4947_v23 = vld [vmem:[#allocation17 + $0x18] sm:$0xff] }
 0x8bd   : > { %4868 = vpow2.f32 %v2296_v45  ;;  %v4703_v12 = vunpack.i.h.bf16 %v4701_v11  ;;  %v4702_v43 = vunpack.i.l.bf16 %v4701_v11 }
 0x8be   : > { %4870 = vpow2.f32 %v2304_v9 }
 0x8bf   : > { %v1614_v21 = vpack.c.bf16 %v4703_v12, %v4702_v43 }
 0x8c1   : > { %v2400_v24 = vrot.slane %v1614_v21, 4 }
 0x8c3   : > { %v4865_v28 = vpop.eup %4864  ;;  %v2401_v34 = vsel %vm1842_vm4, %v2399_v27, %v2400_v24  ;;  %v2410_v42 = vsel %vm1842_vm4, %v2400_v24, 0 }
 0x8c4   : > { %4482 = vmatprep.subr.bf16.mxu1 %v2401_v34  ;;  %v2312_v22 = vsel %vm1771_vm5, %v4865_v28, 0.0  ;;  %v4867_v33 = vpop.eup %4866  ;;  %v2331_v36 = vpack.c.bf16 %v4865_v28, %v4865_v28 }
 0x8c5   : > { %2313 = vadd.xlane.f32.xlu1 %v2312_v22  ;;  %4483 = vmatpush3.bf16.msra.mxu1 %v2401_v34  ;;  %v2306_v10 = vsel %vm1771_vm5, %v4867_v33, 0.0 }
 0x8c6   : > { %4525 = vmatprep.subr.msk.bf16.mxu1 %vm1842_vm4, %v2400_v24 }
 0x8c7   : > { %v4869_v37 = vpop.eup %4868 }
 0x8c8   : > { %v4871_v41 = vpop.eup %4870  ;;  %v2330_v46 = vpack.c.bf16 %v4869_v37, %v4867_v33  ;;  %v2309_v59 = vsel %vm1771_vm5, %v4869_v37, 0.0 }
 0x8c9   : > { %2307 = vadd.xlane.f32.xlu1 %v2306_v10  ;;  %4485 = vmatpush3.bf16.msra.mxu1 %v2410_v42  ;;  %v2333_v18 = vpack.c.bf16 %v4871_v41, %v4871_v41  ;;  %v2321_v60 = vsel %vm1771_vm5, %v4871_v41, 0.0 }
 0x8ca   : > { %4478 = vmatprep.mubr.msk.bf16.mxu0 %vm1771_vm5, %v2330_v46  ;;  %4502 = vmatprep.subr.bf16.mxu1 %v6132_v25 }
 0x8cb   : > { %4479 = vmatmul.mubr.msk.bf16.vlgmr.msra.gmra.mrb[28].mxu0 %vm1771_vm5, %v2331_v36 }
 0x8cc   : > { %4487 = vmatmul.mubr.msk.bf16.vlgmr.msra.gmra.mrb[28].mxu1 %vm1771_vm5, %v2333_v18  ;;  %4491 = vmatpush3.bf16.msra.mxu0 %v6077_v8  ;;  %v2600_v8 = vmul.f32 %v6230_v57, %v2587_v62 }
 0x8cd   : > { %2310 = vadd.xlane.f32.xlu1 %v2309_v59  ;;  %4503 = vmatpush3.bf16.msra.mxu1 %v6132_v25  ;;  %v4945_v25 = vld [vmem:[#allocation17 + $0x8] sm:$0xff] }
 0x8ce   : > { %4504 = vmatprep.subr.bf16.mxu1 %v6140_v50  ;;  %4492 = vmatprep.subr.bf16.mxu0 %v6095_v51  ;;  %v6265_v61 = vadd.f32 %v4945_v25, %v2599_v16  ;;  %v4948_v25 = vld [vmem:[#allocation17 + $0x20] sm:$0xff] }
 0x8d0   : > { %4493 = vmatpush3.bf16.msra.mxu0 %v6095_v51  ;;  %v4946_v51 = vld [vmem:[#allocation17 + $0x10] sm:$0xff] }
 0x8d1   : > { %2322 = vadd.xlane.f32.xlu1 %v2321_v60  ;;  %4505 = vmatpush3.bf16.msra.mxu1 %v6140_v50  ;;  %v6272_v50 = vadd.f32 %v4946_v51, %v2600_v8 }
 0x8d2   : > { %4506 = vmatprep.subr.bf16.mxu1 %v6148_v53  ;;  %4494 = vmatprep.subr.bf16.mxu0 %v6102_v29 }
 0x8d4   : > { %4495 = vmatpush3.bf16.msra.mxu0 %v6102_v29 }
 0x8d5   : > { %2614 = vadd.xlane.f32.xlu1 %v6265_v61  ;;  %4507 = vmatpush3.bf16.msra.mxu1 %v6148_v53 }
 0x8d6   : > { %4508 = vmatprep.subr.bf16.mxu1 %v6153_v54  ;;  %4496 = vmatprep.subr.bf16.mxu0 %v6107_v31 }
 0x8d8   : > { %4497 = vmatpush3.bf16.msra.mxu0 %v6107_v31 }
 0x8d9   : > { %2616 = vadd.xlane.f32.xlu1 %v6272_v50  ;;  %4509 = vmatpush3.bf16.msra.mxu1 %v6153_v54 }
 0x8ed   : > { %v2613_v62 = vpop.xlane.xlu0 %2612 }
 0x8ee   : > { %v2624_v60 = vmul.f32 0.0078125, %v2613_v62 }
 0x90a   : > { %v2317_v7 = vpop.xlane.xlu1 %2316 }
 0x90b   : > { %4872 = vrcp.f32 %v2317_v7 }
 0x90e   : > { %v2320_v38 = vpop.xlane.xlu1 %2319 }
 0x915   : > { %v4873_v47 = vpop.eup %4872 }
 0x952   : > { %v2314_v29 = vpop.xlane.xlu1 %2313 }
 0x953   : > { %4874 = vrcp.f32 %v2314_v29 }
 0x956   : > { %v2308_v32 = vpop.xlane.xlu1 %2307 }
 0x957   : > { %4876 = vrcp.f32 %v2308_v32 }
 0x95a   : > { %v2311_v40 = vpop.xlane.xlu1 %2310 }
 0x95b   : > { %4878 = vrcp.f32 %v2311_v40 }
 0x95d   : > { %v4875_v63 = vpop.eup %4874 }
 0x95e   : > { %v2323_v53 = vpop.xlane.xlu1 %2322 }
 0x95f   : > { %4880 = vrcp.f32 %v2323_v53 }
 0x960   : > { %4882 = vrcp.f32 %v2320_v38  ;;  %v4949_v38 = vld [vmem:[#allocation17 + $0x28] sm:$0xff] }
 0x961   : > { %v4877_v31 = vpop.eup %4876 }
 0x962   : > { %v2615_v16 = vpop.xlane.xlu1 %2614 }
 0x963   : > { %v2625_v7 = vmul.f32 0.0078125, %v2615_v16 }
 0x965   : > { %v4879_v2 = vpop.eup %4878 }
 0x966   : > { %v2617_v32 = vpop.xlane.xlu1 %2616 }
 0x967   : > { %v2626_v40 = vmul.f32 0.0078125, %v2617_v32 }
 0x969   : > { %v4881_v0 = vpop.eup %4880 }
 0x96a   : > { %v4883_v19 = vpop.eup %4882 }
 0x99e   : > { %v4480_v48 = vpop.f32.mrb[28].mxu0 }
 0x99f   : > { %v2383_v3 = vpop.f32.mrb[29].mxu0  ;;  %v4488_v55 = vpop.f32.mrb[28].mxu1  ;;  %v2462_v5 = vmul.f32 %v4875_v63, %v4480_v48 }
 0x9a0   : > { %v4481_v54 = vpop.f32.mrb[30].mxu0  ;;  %v2446_v4 = vpop.f32.mrb[29].mxu1  ;;  %v2460_v6 = vmul.f32 %v4877_v31, %v2383_v3  ;;  %v2465_v49 = vmul.f32 %v4881_v0, %v4488_v55  ;;  %v4746_v31 = vld [vmem:[%s5799_s19 + $0x4] ss:$16 sps:$4 sm:$0xff]   ;;  %v4749_v3 = vld [vmem:[%s5799_s19 + $0xc] ss:$16 sps:$4 sm:$0xff]  }
 0x9a1   : > { %v2386_v35 = vpop.f32.mrb[31].mxu0  ;;  %v4489_v44 = vpop.f32.mrb[30].mxu1  ;;  %v2463_v30 = vmul.f32 %v4873_v47, %v2446_v4  ;;  %v2467_v45 = vpack.c.bf16 %v2462_v5, %v2462_v5  ;;  %v6307_v47 = vsub.f32 %v6272_v50, %v2626_v40  ;;  %v4744_v55 = vld [vmem:[%s5799_s19] ss:$16 sps:$4 sm:$0xff]   ;;  %2919 = vmatprep.subr.bf16.mxu0 %v4746_v31  ;;  %2982 = vmatprep.subr.bf16.mxu1 %v4749_v3  ;;  %v4752_v54 = vld [vmem:[%s5799_s19 + $0x24] ss:$16 sps:$4 sm:$0xff]  }
 0x9a2   : > { %v2461_v58 = vmul.f32 %v4879_v2, %v2386_v35  ;;  %v2449_v56 = vpop.f32.mrb[31].mxu1  ;;  %v2469_v11 = vpack.c.bf16 %v2465_v49, %v2465_v49  ;;  %v4747_v2 = vld [vmem:[%s5799_s19 + $0x8] ss:$16 sps:$4 sm:$0xff]   ;;  %v4755_v4 = vld [vmem:[%s5799_s19 + $0x2c] ss:$16 sps:$4 sm:$0xff]  }
 0x9a3   : > { %v2464_v39 = vmul.f32 %v4883_v19, %v2449_v56  ;;  %v2638_v48 = vmul.f32 %v6307_v47, %v6307_v47  ;;  %v4750_v0 = vld [vmem:[%s5799_s19 + $0x20] ss:$16 sps:$4 sm:$0xff]   ;;  %v4753_v5 = vld [vmem:[%s5799_s19 + $0x28] ss:$16 sps:$4 sm:$0xff]   ;;  %v4758_v35 = vld [vmem:[%s5799_s19 + $0x44] ss:$16 sps:$4 sm:$0xff]  }
 0x9a4   : > { %v2466_v52 = vpack.c.bf16 %v2461_v58, %v2460_v6  ;;  %v4761_v44 = vld [vmem:[%s5799_s19 + $0x4c] ss:$16 sps:$4 sm:$0xff]   ;;  %v4756_v19 = vld [vmem:[%s5799_s19 + $0x40] ss:$16 sps:$4 sm:$0xff]   ;;  %v4759_v6 = vld [vmem:[%s5799_s19 + $0x48] ss:$16 sps:$4 sm:$0xff]  }
 0x9a5   : > { %v2468_v9 = vpack.c.bf16 %v2464_v39, %v2463_v30  ;;  %v4764_v49 = vld [vmem:[%s5799_s19 + $0x64] ss:$16 sps:$4 sm:$0xff]   ;;  %v4767_v58 = vld [vmem:[%s5799_s19 + $0x6c] ss:$16 sps:$4 sm:$0xff]   ;;  %v4762_v56 = vld [vmem:[%s5799_s19 + $0x60] ss:$16 sps:$4 sm:$0xff]  }
 0x9a6   : > { %4510 = vmatprep.mubr.msk.bf16.mxu1 %vm1632_vm3, %v2466_v52  ;;  %v4765_v30 = vld [vmem:[%s5799_s19 + $0x68] ss:$16 sps:$4 sm:$0xff]   ;;  %v4770_v39 = vld [vmem:[%s5799_s19 + $0x84] ss:$16 sps:$4 sm:$0xff]   ;;  %v4773_v52 = vld [vmem:[%s5799_s19 + $0x8c] ss:$16 sps:$4 sm:$0xff]  }
 0x9a7   : > { %4498 = vmatprep.mubr.msk.bf16.mxu0 %vm1632_vm3, %v2468_v9  ;;  %4511 = vmatmul.mubr.msk.bf16.vlgmr.msra.gmra.mrb[32].mxu1 %vm1632_vm3, %v2467_v45  ;;  %v4768_v45 = vld [vmem:[%s5799_s19 + $0x80] ss:$16 sps:$4 sm:$0xff]   ;;  %v4771_v9 = vld [vmem:[%s5799_s19 + $0x88] ss:$16 sps:$4 sm:$0xff]  }
 0x9a8   : > { %4499 = vmatmul.mubr.msk.bf16.vlgmr.msra.gmra.mrb[32].mxu0 %vm1632_vm3, %v2469_v11  ;;  %3014 = vmatprep.mubr.bf16.mxu1 %v5322_v20  ;;  %v4776_v11 = vld [vmem:[%s5799_s19 + $0xa4] ss:$16 sps:$4 sm:$0xff]  }
 0x9a9   : > { %2951 = vmatprep.mubr.bf16.mxu0 %v5322_v20  ;;  %2920 = vmatpush1.bf16.msra.mxu0 %v4744_v55  ;;  %v6366_v55 = vld [vmem:[%s978_s14] ss:$0 sm:$0xff] }
 0x9aa   : > { %2983 = vmatpush1.bf16.msra.mxu1 %v4747_v2  ;;  %2921 = vmatprep.subr.bf16.mxu0 %v4752_v54 }
 0x9ab   : > { %2984 = vmatprep.subr.bf16.mxu1 %v4755_v4 }
 0x9ad   : > { %2922 = vmatpush1.bf16.msra.mxu0 %v4750_v0  ;;  %v6375_v0 = vld [vmem:[%s981_s17] ss:$0 sm:$0xff] }
 0x9ae   : > { %2985 = vmatpush1.bf16.msra.mxu1 %v4753_v5  ;;  %2923 = vmatprep.subr.bf16.mxu0 %v4758_v35 }
 0x9af   : > { %2986 = vmatprep.subr.bf16.mxu1 %v4761_v44 }
 0x9b1   : > { %2924 = vmatpush1.bf16.msra.mxu0 %v4756_v19  ;;  %v4793_v19 = vld [vmem:[%s5853_s8 + $0xc0] sm:$0xff]  }
 0x9b2   : > { %2987 = vmatpush1.bf16.msra.mxu1 %v4759_v6  ;;  %2925 = vmatprep.subr.bf16.mxu0 %v4764_v49  ;;  %v4794_v6 = vld [vmem:[%s5853_s8] sm:$0xff]  }
 0x9b3   : > { %2988 = vmatprep.subr.bf16.mxu1 %v4767_v58  ;;  %v4795_v49 = vld [vmem:[%s5853_s8 + $0x80] sm:$0xff]   ;;  %v4796_v58 = vld [vmem:[%s5853_s8 + $0x48] sm:$0xff]  }
 0x9b5   : > { %2926 = vmatpush1.bf16.msra.mxu0 %v4762_v56  ;;  %v4797_v56 = vld [vmem:[%s5853_s8 + $0xc8] sm:$0xff]  }
 0x9b6   : > { %2989 = vmatpush1.bf16.msra.mxu1 %v4765_v30  ;;  %2927 = vmatprep.subr.bf16.mxu0 %v4770_v39  ;;  %v4798_v30 = vld [vmem:[%s5853_s8 + $0x8] sm:$0xff]  }
 0x9b7   : > { %2990 = vmatprep.subr.bf16.mxu1 %v4773_v52  ;;  %v4799_v39 = vld [vmem:[%s5853_s8 + $0x88] sm:$0xff]   ;;  %v4800_v52 = vld [vmem:[%s5853_s8 + $0x50] sm:$0xff]  }
 0x9b9   : > { %2928 = vmatpush1.bf16.msra.mxu0 %v4768_v45  ;;  %v4801_v45 = vld [vmem:[%s5853_s8 + $0xd0] sm:$0xff]  }
 0x9ba   : > { %2991 = vmatpush1.bf16.msra.mxu1 %v4771_v9  ;;  %2929 = vmatprep.subr.bf16.mxu0 %v4776_v11  ;;  %v4802_v9 = vld [vmem:[%s5853_s8 + $0x10] sm:$0xff]  }
 0x9bb   : > { %v4803_v11 = vld [vmem:[%s5853_s8 + $0x90] sm:$0xff]  }
 0xa7a   : > { %v4512_v12 = vpop.f32.mrb[32].mxu1 }
 0xa7b   : > { %v4500_v43 = vpop.f32.mrb[32].mxu0  ;;  %v2564_v21 = vpop.f32.mrb[33].mxu1 }
 0xa7c   : > { %v2573_v24 = vadd.f32 %v4512_v12, %v4500_v43  ;;  %v2510_v27 = vpop.f32.mrb[33].mxu0  ;;  %v4513_v28 = vpop.f32.mrb[34].mxu1  ;;  %v4779_v12 = vld [vmem:[%s5799_s19 + $0xac] ss:$16 sps:$4 sm:$0xff]   ;;  %v4774_v43 = vld [vmem:[%s5799_s19 + $0xa0] ss:$16 sps:$4 sm:$0xff]  }
 0xa7d   : > { %v2565_v34 = vadd.f32 %v2564_v21, %v2510_v27  ;;  %v4501_v22 = vpop.f32.mrb[34].mxu0  ;;  %v2567_v33 = vpop.f32.mrb[35].mxu1  ;;  %v4777_v21 = vld [vmem:[%s5799_s19 + $0xa8] ss:$16 sps:$4 sm:$0xff]   ;;  %2992 = vmatprep.subr.bf16.mxu1 %v4779_v12  ;;  %2930 = vmatpush1.bf16.msra.mxu0 %v4774_v43  ;;  %v4785_v27 = vld [vmem:[%s5799_s19 + $0xcc] ss:$16 sps:$4 sm:$0xff]  }
 0xa7e   : > { %v2513_v37 = vpop.f32.mrb[35].mxu0  ;;  %v2590_v36 = vadd.f32 %v6222_v26, %v2573_v24  ;;  %2993 = vmatpush1.bf16.msra.mxu1 %v4777_v21  ;;  %v4782_v24 = vld [vmem:[%s5799_s19 + $0xc4] ss:$16 sps:$4 sm:$0xff]   ;;  %v4780_v28 = vld [vmem:[%s5799_s19 + $0xc0] ss:$16 sps:$4 sm:$0xff]   ;;  %v4804_v43 = vld [vmem:[%s5853_s8 + $0x58] sm:$0xff]  }
 0xa7f   : > { %v2588_v41 = vadd.f32 %v6222_v26, %v2565_v34  ;;  %v2568_v10 = vadd.f32 %v2567_v33, %v2513_v37  ;;  %v4783_v34 = vld [vmem:[%s5799_s19 + $0xc8] ss:$16 sps:$4 sm:$0xff]   ;;  %2931 = vmatprep.subr.bf16.mxu0 %v4782_v24  ;;  %2994 = vmatprep.subr.bf16.mxu1 %v4785_v27  ;;  %v4788_v22 = vld [vmem:[%s5799_s19 + $0xe4] ss:$16 sps:$4 sm:$0xff]   ;;  %v4786_v33 = vld [vmem:[%s5799_s19 + $0xe0] ss:$16 sps:$4 sm:$0xff]  }
 0xa80   : > { %v2603_v8 = vmul.f32 %v6230_v57, %v2590_v36  ;;  %v4789_v37 = vld [vmem:[%s5799_s19 + $0xe8] ss:$16 sps:$4 sm:$0xff]  }
 0xa81   : > { %v2601_v42 = vmul.f32 %v6230_v57, %v2588_v41  ;;  %v2589_v46 = vadd.f32 %v6222_v26, %v2568_v10  ;;  %v6296_v26 = vsub.f32 %v6233_v1, %v2624_v60  ;;  %2932 = vmatpush1.bf16.msra.mxu0 %v4780_v28  ;;  %v4791_v41 = vld [vmem:[%s5799_s19 + $0xec] ss:$16 sps:$4 sm:$0xff]  }
 0xa82   : > { %v6298_v29 = vadd.f32 %v4949_v38, %v2603_v8  ;;  %2995 = vmatpush1.bf16.msra.mxu1 %v4783_v34  ;;  %2933 = vmatprep.subr.bf16.mxu0 %v4788_v22  ;;  %v4805_v21 = vld [vmem:[%s5853_s8 + $0xd8] sm:$0xff]   ;;  %v4808_v34 = vld [vmem:[%s5853_s8 + $0x60] sm:$0xff]  }
 0xa83   : > { %v2602_v18 = vmul.f32 %v6230_v57, %v2589_v46  ;;  %v6288_v59 = vadd.f32 %v4947_v23, %v2601_v42  ;;  %v6302_v57 = vsub.f32 %v6265_v61, %v2625_v7  ;;  %v2636_v53 = vmul.f32 %v6296_v26, %v6296_v26  ;;  %2996 = vmatprep.subr.bf16.mxu1 %v4791_v41  ;;  %v4806_v27 = vld [vmem:[%s5853_s8 + $0x18] sm:$0xff]   ;;  %v4809_v22 = vld [vmem:[%s5853_s8 + $0xe0] sm:$0xff]   ;;  %v4812_v41 = vld [vmem:[%s5853_s8 + $0x68] sm:$0xff]  }
 0xa84   : > { %v4807_v28 = vld [vmem:[%s5853_s8 + $0x98] sm:$0xff]  }
 0xa85   : > { %2618 = vadd.xlane.f32.xlu1 %v6288_v59  ;;  %v6292_v51 = vadd.f32 %v4948_v25, %v2602_v18  ;;  %v2637_v63 = vmul.f32 %v6302_v57, %v6302_v57  ;;  %2934 = vmatpush1.bf16.msra.mxu0 %v4786_v33  ;;  %v4810_v33 = vld [vmem:[%s5853_s8 + $0x20] sm:$0xff]  }
 0xa86   : > { %2997 = vmatpush1.bf16.msra.mxu1 %v4789_v37  ;;  %v4811_v37 = vld [vmem:[%s5853_s8 + $0xa0] sm:$0xff]  }
 0xa87   : > { %4330 = vmatprep.subr.bf16.mxu1 %v4793_v19 }
 0xa89   : > { %2620 = vadd.xlane.f32.xlu1 %v6292_v51 }
 0xa8d   : > { %2622 = vadd.xlane.f32.xlu1 %v6298_v29 }
 0xa91   : > { %2642 = vadd.xlane.f32.xlu1 %v2636_v53 }
 0xa95   : > { %2644 = vadd.xlane.f32.xlu1 %v2637_v63 }
 0xa99   : > { %2646 = vadd.xlane.f32.xlu1 %v2638_v48 }
 0xb12   : > { %v2619_v10 = vpop.xlane.xlu1 %2618 }
 0xb13   : > { %v2627_v42 = vmul.f32 0.0078125, %v2619_v10  ;;  %v4813_v10 = vld [vmem:[%s5853_s8 + $0xe8] sm:$0xff]  }
 0xb15   : > { %v6346_v46 = vsub.f32 %v6288_v59, %v2627_v42 }
 0xb16   : > { %v2621_v36 = vpop.xlane.xlu1 %2620 }
 0xb17   : > { %v2628_v18 = vmul.f32 0.0078125, %v2621_v36  ;;  %v2639_v23 = vmul.f32 %v6346_v46, %v6346_v46  ;;  %v4814_v36 = vld [vmem:[%s5853_s8 + $0x28] sm:$0xff]  }
 0xb19   : > { %v6351_v62 = vsub.f32 %v6292_v51, %v2628_v18  ;;  %2648 = vadd.xlane.f32.xlu0 %v2639_v23  ;;  %v4815_v18 = vld [vmem:[%s5853_s8 + $0xa8] sm:$0xff]   ;;  %v4816_v23 = vld [vmem:[%s5853_s8 + $0x70] sm:$0xff]  }
 0xb1a   : > { %v2623_v16 = vpop.xlane.xlu1 %2622 }
 0xb1b   : > { %v2629_v60 = vmul.f32 0.0078125, %v2623_v16  ;;  %v2640_v8 = vmul.f32 %v6351_v62, %v6351_v62  ;;  %v4817_v16 = vld [vmem:[%s5853_s8 + $0xf0] sm:$0xff]  }
 0xb1d   : > { %v6356_v25 = vsub.f32 %v6298_v29, %v2629_v60  ;;  %2650 = vadd.xlane.f32.xlu1 %v2640_v8 }
 0xb1e   : > { %v2643_v7 = vpop.xlane.xlu1 %2642 }
 0xb1f   : > { %v2654_v38 = vmul.f32 0.0078125, %v2643_v7  ;;  %v2641_v32 = vmul.f32 %v6356_v25, %v6356_v25  ;;  %v4818_v7 = vld [vmem:[%s5853_s8 + $0x30] sm:$0xff]  }
 0xb21   : > { %v2660_v40 = vadd.f32 1e-06, %v2654_v38  ;;  %2652 = vadd.xlane.f32.xlu0 %v2641_v32  ;;  %v4819_v38 = vld [vmem:[%s5853_s8 + $0xb0] sm:$0xff]   ;;  %v4820_v32 = vld [vmem:[%s5853_s8 + $0x78] sm:$0xff]  }
 0xb22   : > { %v2645_v53 = vpop.xlane.xlu1 %2644 }
 0xb23   : > { %4884 = vrsqrt.f32 %v2660_v40  ;;  %v2655_v63 = vmul.f32 0.0078125, %v2645_v53  ;;  %v4821_v40 = vld [vmem:[%s5853_s8 + $0xf8] sm:$0xff]  }
 0xb25   : > { %v2661_v48 = vadd.f32 1e-06, %v2655_v63 }
 0xb26   : > { %v2647_v12 = vpop.xlane.xlu1 %2646 }
 0xb27   : > { %4886 = vrsqrt.f32 %v2661_v48  ;;  %v2656_v24 = vmul.f32 0.0078125, %v2647_v12 }
 0xb29   : > { %v2662_v42 = vadd.f32 1e-06, %v2656_v24 }
 0xb2b   : > { %4888 = vrsqrt.f32 %v2662_v42 }
 0xb2d   : > { %v4885_v31 = vpop.eup %4884 }
 0xb2e   : > { %v2672_v3 = vmul.f32 %v4885_v31, %v6296_v26  ;;  %v4822_v31 = vld [vmem:[%s5853_s8 + $0x38] sm:$0xff]  }
 0xb30   : > { %v2684_v4 = vmul.f32 %v6366_v55, %v2672_v3  ;;  %v4823_v3 = vld [vmem:[%s5853_s8 + $0xb8] sm:$0xff]  }
 0xb31   : > { %v4887_v2 = vpop.eup %4886 }
 0xb32   : > { %v2673_v54 = vmul.f32 %v4887_v2, %v6302_v57  ;;  %v2696_v5 = vadd.f32 %v6375_v0, %v2684_v4  ;;  %v4792_v57 = vld [vmem:[%s5853_s8 + $0x40] sm:$0xff]  }
 0xb33   : > { %4296 = vmatprep.subr.bf16.mxu0 %v4792_v57 }
 0xb34   : > { %v2685_v26 = vmul.f32 %v6366_v55, %v2673_v54 }
 0xb35   : > { %v4889_v4 = vpop.eup %4888 }
 0xb36   : > { %v2697_v35 = vadd.f32 %v6375_v0, %v2685_v26 }
 0xb38   : > { %v2702_v44 = vpack.c.bf16 %v2697_v35, %v2696_v5  ;;  %v2674_v35 = vmul.f32 %v4889_v4, %v6307_v47 }
 0xb3a   : > { %2952 = vmatmul.mubr.bf16.vlgmr.msra.gmra.mrb[36].mxu0 %v2702_v44  ;;  %3015 = vmatmul.mubr.bf16.vlgmr.msra.gmra.mrb[36].mxu1 %v2702_v44  ;;  %v2686_v19 = vmul.f32 %v6366_v55, %v2674_v35 }
 0xb3b   : > { %2961 = vmatprep.mubr.bf16.mxu0 %v5322_v20  ;;  %3024 = vmatprep.mubr.bf16.mxu1 %v5322_v20 }
 0xb3c   : > { %4297 = vmatpush3.bf16.msra.mxu0 %v4794_v6  ;;  %4331 = vmatpush3.bf16.msra.mxu1 %v4795_v49 }
 0xb3d   : > { %4298 = vmatprep.subr.bf16.mxu0 %v4796_v58  ;;  %4332 = vmatprep.subr.bf16.mxu1 %v4797_v56  ;;  %v2698_v58 = vadd.f32 %v6375_v0, %v2686_v19 }
 0xb40   : > { %4299 = vmatpush3.bf16.msra.mxu0 %v4798_v30  ;;  %4333 = vmatpush3.bf16.msra.mxu1 %v4799_v39 }
 0xb41   : > { %4300 = vmatprep.subr.bf16.mxu0 %v4800_v52  ;;  %4334 = vmatprep.subr.bf16.mxu1 %v4801_v45 }
 0xb44   : > { %4301 = vmatpush3.bf16.msra.mxu0 %v4802_v9  ;;  %4335 = vmatpush3.bf16.msra.mxu1 %v4803_v11 }
 0xb45   : > { %4302 = vmatprep.subr.bf16.mxu0 %v4804_v43  ;;  %4336 = vmatprep.subr.bf16.mxu1 %v4805_v21  ;;  %v2753_v43 = vsub.s32 3, %v5942_v13 }
 0xb48   : > { %4303 = vmatpush3.bf16.msra.mxu0 %v4806_v27  ;;  %4337 = vmatpush3.bf16.msra.mxu1 %v4807_v28 }
 0xb49   : > { %4304 = vmatprep.subr.bf16.mxu0 %v4808_v34  ;;  %4338 = vmatprep.subr.bf16.mxu1 %v4809_v22 }
 0xb4c   : > { %4305 = vmatpush3.bf16.msra.mxu0 %v4810_v33  ;;  %4339 = vmatpush3.bf16.msra.mxu1 %v4811_v37 }
 0xb4d   : > { %4306 = vmatprep.subr.bf16.mxu0 %v4812_v41  ;;  %4340 = vmatprep.subr.bf16.mxu1 %v4813_v10 }
 0xb50   : > { %4307 = vmatpush3.bf16.msra.mxu0 %v4814_v36  ;;  %4341 = vmatpush3.bf16.msra.mxu1 %v4815_v18 }
 0xb51   : > { %4308 = vmatprep.subr.bf16.mxu0 %v4816_v23  ;;  %4342 = vmatprep.subr.bf16.mxu1 %v4817_v16 }
 0xb54   : > { %4309 = vmatpush3.bf16.msra.mxu0 %v4818_v7  ;;  %4343 = vmatpush3.bf16.msra.mxu1 %v4819_v38 }
 0xb55   : > { %4310 = vmatprep.subr.bf16.mxu0 %v4820_v32  ;;  %4344 = vmatprep.subr.bf16.mxu1 %v4821_v40 }
 0xb58   : > { %4311 = vmatpush3.bf16.msra.mxu0 %v4822_v31  ;;  %4345 = vmatpush3.bf16.msra.mxu1 %v4823_v3 }
 0xba6   : > { %v2649_v60 = vpop.xlane.xlu0 %2648 }
 0xba7   : > { %v2657_v8 = vmul.f32 0.0078125, %v2649_v60 }
 0xba9   : > { %v2663_v53 = vadd.f32 1e-06, %v2657_v8 }
 0xbaa   : > { %v2651_v63 = vpop.xlane.xlu1 %2650 }
 0xbab   : > { %4890 = vrsqrt.f32 %v2663_v53  ;;  %v2658_v48 = vmul.f32 0.0078125, %v2651_v63 }
 0xbad   : > { %v2664_v2 = vadd.f32 1e-06, %v2658_v48 }
 0xbae   : > { %v2653_v54 = vpop.xlane.xlu0 %2652 }
 0xbaf   : > { %4892 = vrsqrt.f32 %v2664_v2  ;;  %v2659_v26 = vmul.f32 0.0078125, %v2653_v54 }
 0xbb1   : > { %v2665_v5 = vadd.f32 1e-06, %v2659_v26 }
 0xbb3   : > { %4894 = vrsqrt.f32 %v2665_v5 }
 0xbb5   : > { %v4891_v44 = vpop.eup %4890 }
 0xbb6   : > { %v2675_v57 = vmul.f32 %v4891_v44, %v6346_v46 }
 0xbb8   : > { %v2687_v6 = vmul.f32 %v6366_v55, %v2675_v57 }
 0xbb9   : > { %v4893_v49 = vpop.eup %4892 }
 0xbba   : > { %v2699_v56 = vadd.f32 %v6375_v0, %v2687_v6  ;;  %v2676_v30 = vmul.f32 %v4893_v49, %v6351_v62  ;;  %v2737_v62 = vld [vmem:[%s5847_s26] sm:$0xf] }
 0xbbb   : > { %v6436_v21 = vrot.slane %v2737_v62, %v1272_v15 }
 0xbbc   : > { %v2703_v39 = vpack.c.bf16 %v2699_v56, %v2698_v58  ;;  %v2688_v46 = vmul.f32 %v6366_v55, %v2676_v30 }
 0xbbd   : > { %v4895_v52 = vpop.eup %4894 }
 0xbbe   : > { %2962 = vmatmul.mubr.bf16.gmra.mrb[40].mxu0 %v2703_v39  ;;  %3025 = vmatmul.mubr.bf16.gmra.mrb[40].mxu1 %v2703_v39  ;;  %v2677_v47 = vmul.f32 %v4895_v52, %v6356_v25  ;;  %v2700_v9 = vadd.f32 %v6375_v0, %v2688_v46  ;;  %v6432_v25 = vrot.slane %v2737_v62, %v1264_v14 }
 0xbbf   : > { %2971 = vmatprep.mubr.bf16.mxu0 %v5322_v20  ;;  %3034 = vmatprep.mubr.bf16.mxu1 %v5322_v20  ;;  %v6440_v20 = vrot.slane %v2737_v62, %v1268_v17 }
 0xbc0   : > { %v2689_v45 = vmul.f32 %v6366_v55, %v2677_v47  ;;  %v6442_v55 = vrot.slane %v2737_v62, %v2753_v43 }
 0xbc2   : > { %v2701_v11 = vadd.f32 %v6375_v0, %v2689_v45 }
 0xbc4   : > { %v2704_v12 = vpack.c.bf16 %v2701_v11, %v2700_v9 }
 0xbc6   : > { %2972 = vmatmul.mubr.bf16.gmra.mrb[44].mxu0 %v2704_v12  ;;  %3035 = vmatmul.mubr.bf16.gmra.mrb[44].mxu1 %v2704_v12 }
 0xc0d   : > { %v2953_v0 = vpop.f32.mrb[36].mxu0  ;;  %v3016_v24 = vpop.f32.mrb[36].mxu1 }
 0xc0e   : > { %v6445_v27 = vadd.f32 %v2953_v0, %v6432_v25  ;;  %v6448_v28 = vadd.f32 %v3016_v24, %v6436_v21  ;;  %v2955_v14 = vpop.f32.mrb[37].mxu0  ;;  %v3018_v34 = vpop.f32.mrb[37].mxu1 }
 0xc0f   : > { %v6451_v22 = vadd.f32 %v2955_v14, %v6440_v20  ;;  %v6454_v15 = vadd.f32 %v3018_v34, %v6442_v55  ;;  %v2957_v13 = vpop.f32.mrb[38].mxu0  ;;  %v3020_v17 = vpop.f32.mrb[38].mxu1 }
 0xc10   : > { %v3069_v33 = vmul.f32 0.044715, %v6445_v27  ;;  %v3071_v37 = vmul.f32 0.044715, %v6448_v28  ;;  %v2958_v42 = vadd.f32 %v2957_v13, %v6432_v25  ;;  %v3021_v36 = vadd.f32 %v3020_v17, %v6436_v21  ;;  %v2959_v18 = vpop.f32.mrb[39].mxu0  ;;  %v3022_v23 = vpop.f32.mrb[39].mxu1 }
 0xc11   : > { %v3070_v41 = vmul.f32 0.044715, %v6451_v22  ;;  %v3072_v10 = vmul.f32 0.044715, %v6454_v15  ;;  %v2960_v8 = vadd.f32 %v2959_v18, %v6440_v20  ;;  %v6466_v7 = vadd.f32 %v3022_v23, %v6442_v55 }
 0xc12   : > { %v3093_v16 = vmul.f32 %v3069_v33, %v6445_v27  ;;  %v3095_v60 = vmul.f32 %v3071_v37, %v6448_v28  ;;  %v3073_v40 = vmul.f32 0.044715, %v2958_v42  ;;  %v3075_v48 = vmul.f32 0.044715, %v3021_v36 }
 0xc13   : > { %v3094_v38 = vmul.f32 %v3070_v41, %v6451_v22  ;;  %v3096_v32 = vmul.f32 %v3072_v10, %v6454_v15  ;;  %v3074_v2 = vmul.f32 0.044715, %v2960_v8  ;;  %v3076_v5 = vmul.f32 0.044715, %v6466_v7 }
 0xc14   : > { %v3117_v53 = vmul.f32 %v3093_v16, %v6445_v27  ;;  %v3119_v63 = vmul.f32 %v3095_v60, %v6448_v28  ;;  %v3097_v3 = vmul.f32 %v3073_v40, %v2958_v42  ;;  %v3099_v26 = vmul.f32 %v3075_v48, %v3021_v36 }
 0xc15   : > { %v3118_v31 = vmul.f32 %v3094_v38, %v6451_v22  ;;  %v3120_v35 = vmul.f32 %v3096_v32, %v6454_v15  ;;  %v3098_v57 = vmul.f32 %v3074_v2, %v2960_v8  ;;  %v3100_v58 = vmul.f32 %v3076_v5, %v6466_v7 }
 0xc16   : > { %v3141_v54 = vadd.f32 %v3117_v53, %v6445_v27  ;;  %v3143_v4 = vadd.f32 %v3119_v63, %v6448_v28  ;;  %v3121_v44 = vmul.f32 %v3097_v3, %v2958_v42  ;;  %v3123_v49 = vmul.f32 %v3099_v26, %v3021_v36 }
 0xc17   : > { %v3122_v30 = vmul.f32 %v3098_v57, %v2960_v8  ;;  %v3142_v39 = vadd.f32 %v3118_v31, %v6451_v22  ;;  %v3124_v47 = vmul.f32 %v3100_v58, %v6466_v7  ;;  %v3144_v12 = vadd.f32 %v3120_v35, %v6454_v15 }
 0xc18   : > { %v3165_v19 = vmul.f32 0.7978846, %v3141_v54  ;;  %v3167_v6 = vmul.f32 0.7978846, %v3143_v4  ;;  %v3145_v56 = vadd.f32 %v3121_v44, %v2958_v42  ;;  %v3147_v52 = vadd.f32 %v3123_v49, %v3021_v36 }
 0xc19   : > { %v3146_v45 = vadd.f32 %v3122_v30, %v2960_v8  ;;  %v3166_v9 = vmul.f32 0.7978846, %v3142_v39  ;;  %v3148_v62 = vadd.f32 %v3124_v47, %v6466_v7  ;;  %v3168_v0 = vmul.f32 0.7978846, %v3144_v12 }
 0xc1a   : > { %4896 = vtanh.f32 %v3165_v19  ;;  %v3169_v46 = vmul.f32 0.7978846, %v3145_v56  ;;  %v3171_v11 = vmul.f32 0.7978846, %v3147_v52  ;;  %v3045_v41 = vmul.f32 0.5, %v6445_v27 }
 0xc1b   : > { %4898 = vtanh.f32 %v3167_v6  ;;  %v3170_v43 = vmul.f32 0.7978846, %v3146_v45  ;;  %v3172_v24 = vmul.f32 0.7978846, %v3148_v62  ;;  %v3049_v10 = vmul.f32 0.5, %v2958_v42 }
 0xc1c   : > { %4900 = vtanh.f32 %v3169_v46  ;;  %v3047_v16 = vmul.f32 0.5, %v6448_v28  ;;  %v3051_v60 = vmul.f32 0.5, %v3021_v36  ;;  %v3046_v40 = vmul.f32 0.5, %v6451_v22 }
 0xc1d   : > { %4902 = vtanh.f32 %v3171_v11  ;;  %v3050_v3 = vmul.f32 0.5, %v2960_v8  ;;  %v3048_v27 = vmul.f32 0.5, %v6454_v15  ;;  %v3052_v42 = vmul.f32 0.5, %v6466_v7 }
 0xc1e   : > { %4904 = vtanh.f32 %v3166_v9 }
 0xc1f   : > { %4906 = vtanh.f32 %v3170_v43 }
 0xc20   : > { %4908 = vtanh.f32 %v3168_v0 }
 0xc21   : > { %4910 = vtanh.f32 %v3172_v24 }
 0xc24   : > { %v4897_v14 = vpop.eup %4896 }
 0xc25   : > { %v4899_v34 = vpop.eup %4898  ;;  %v3213_v13 = vadd.f32 1.0, %v4897_v14 }
 0xc26   : > { %v4901_v17 = vpop.eup %4900  ;;  %v3215_v33 = vadd.f32 1.0, %v4899_v34 }
 0xc27   : > { %v4903_v37 = vpop.eup %4902  ;;  %v3217_v18 = vadd.f32 1.0, %v4901_v17  ;;  %v3237_v63 = vmul.f32 %v3213_v13, %v3045_v41 }
 0xc28   : > { %v4905_v23 = vpop.eup %4904  ;;  %v3219_v38 = vadd.f32 1.0, %v4903_v37  ;;  %v3239_v54 = vmul.f32 %v3215_v33, %v3047_v16 }
 0xc29   : > { %v4907_v32 = vpop.eup %4906  ;;  %v3214_v53 = vadd.f32 1.0, %v4905_v23  ;;  %v3241_v48 = vmul.f32 %v3217_v18, %v3049_v10 }
 0xc2a   : > { %v4909_v31 = vpop.eup %4908  ;;  %v3218_v2 = vadd.f32 1.0, %v4907_v32  ;;  %v3243_v4 = vmul.f32 %v3219_v38, %v3051_v60 }
 0xc2b   : > { %v4911_v26 = vpop.eup %4910  ;;  %v3216_v5 = vadd.f32 1.0, %v4909_v31  ;;  %v3261_v28 = vpack.c.bf16 %v3241_v48, %v3237_v63  ;;  %v3238_v36 = vmul.f32 %v3214_v53, %v3046_v40 }
 0xc2c   : > { %v3242_v35 = vmul.f32 %v3218_v2, %v3050_v3  ;;  %v3220_v44 = vadd.f32 1.0, %v4911_v26  ;;  %v3263_v57 = vpack.c.bf16 %v3243_v4, %v3239_v54 }
 0xc2d   : > { %v3240_v19 = vmul.f32 %v3216_v5, %v3048_v27 }
 0xc2e   : > { %v3262_v22 = vpack.c.bf16 %v3242_v35, %v3238_v36  ;;  %v3244_v6 = vmul.f32 %v3220_v44, %v3052_v42 }
 0xc30   : > { %3568 = vmatprep.mubr.bf16.mxu0 %v3262_v22  ;;  %v3264_v49 = vpack.c.bf16 %v3244_v6, %v3240_v19 }
 0xc31   : > { %3569 = vmatmul.mubr.bf16.vlgmr.msra.gmra.mrb[48].mxu0 %v3261_v28 }
 0xc32   : > { %3625 = vmatprep.mubr.bf16.mxu1 %v3264_v49 }
 0xc33   : > { %3626 = vmatmul.mubr.bf16.vlgmr.msra.gmra.mrb[48].mxu1 %v3263_v57 }
 0xc91   : > { %v2963_v8 = vpop.f32.mrb[40].mxu0  ;;  %v3026_v58 = vpop.f32.mrb[40].mxu1 }
 0xc92   : > { %v6488_v15 = vadd.f32 %v2963_v8, %v6432_v25  ;;  %v2965_v7 = vpop.f32.mrb[41].mxu0  ;;  %v3028_v56 = vpop.f32.mrb[41].mxu1  ;;  %v6491_v30 = vadd.f32 %v3026_v58, %v6436_v21 }
 0xc93   : > { %v6494_v39 = vadd.f32 %v2965_v7, %v6440_v20  ;;  %v2967_v52 = vpop.f32.mrb[42].mxu0  ;;  %v3030_v47 = vpop.f32.mrb[42].mxu1  ;;  %v6497_v46 = vadd.f32 %v3028_v56, %v6442_v55 }
 0xc94   : > { %v2969_v45 = vpop.f32.mrb[43].mxu0  ;;  %v3032_v9 = vpop.f32.mrb[43].mxu1  ;;  %v3077_v11 = vmul.f32 0.044715, %v6488_v15  ;;  %v6501_v12 = vadd.f32 %v2967_v52, %v6432_v25  ;;  %v6511_v24 = vadd.f32 %v3030_v47, %v6436_v21  ;;  %v3079_v14 = vmul.f32 0.044715, %v6491_v30 }
 0xc95   : > { %v6504_v62 = vadd.f32 %v2969_v45, %v6440_v20  ;;  %v6507_v43 = vadd.f32 %v3032_v9, %v6442_v55  ;;  %v3078_v0 = vmul.f32 0.044715, %v6494_v39  ;;  %v3080_v13 = vmul.f32 0.044715, %v6497_v46 }
 0xc96   : > { %v3101_v33 = vmul.f32 %v3077_v11, %v6488_v15  ;;  %v3081_v37 = vmul.f32 0.044715, %v6501_v12  ;;  %v3083_v23 = vmul.f32 0.044715, %v6511_v24  ;;  %v3103_v40 = vmul.f32 %v3079_v14, %v6491_v30 }
 0xc97   : > { %v3082_v34 = vmul.f32 0.044715, %v6504_v62  ;;  %v3084_v17 = vmul.f32 0.044715, %v6507_v43  ;;  %v3102_v18 = vmul.f32 %v3078_v0, %v6494_v39  ;;  %v3104_v2 = vmul.f32 %v3080_v13, %v6497_v46 }
 0xc98   : > { %v3105_v5 = vmul.f32 %v3081_v37, %v6501_v12  ;;  %v3125_v7 = vmul.f32 %v3101_v33, %v6488_v15  ;;  %v3127_v56 = vmul.f32 %v3103_v40, %v6491_v30 }
 0xc99   : > { %v2973_v41 = vpop.f32.mrb[44].mxu0  ;;  %v3036_v10 = vpop.f32.mrb[44].mxu1  ;;  %v3106_v53 = vmul.f32 %v3082_v34, %v6504_v62  ;;  %v3108_v54 = vmul.f32 %v3084_v17, %v6507_v43  ;;  %v3126_v44 = vmul.f32 %v3102_v18, %v6494_v39  ;;  %v3128_v49 = vmul.f32 %v3104_v2, %v6497_v46 }
 0xc9a   : > { %v6522_v16 = vadd.f32 %v2973_v41, %v6432_v25  ;;  %v6525_v60 = vadd.f32 %v3036_v10, %v6436_v21  ;;  %v2975_v38 = vpop.f32.mrb[45].mxu0  ;;  %v3038_v32 = vpop.f32.mrb[45].mxu1  ;;  %v3129_v45 = vmul.f32 %v3105_v5, %v6501_v12 }
 0xc9b   : > { %v6530_v63 = vadd.f32 %v2975_v38, %v6440_v20  ;;  %v6533_v48 = vadd.f32 %v3038_v32, %v6442_v55  ;;  %v2977_v31 = vpop.f32.mrb[46].mxu0  ;;  %v3040_v3 = vpop.f32.mrb[46].mxu1  ;;  %v3130_v22 = vmul.f32 %v3106_v53, %v6504_v62  ;;  %v3150_v13 = vadd.f32 %v3126_v44, %v6494_v39 }
 0xc9c   : > { %v6538_v4 = vadd.f32 %v2977_v31, %v6432_v25  ;;  %v6541_v26 = vadd.f32 %v3040_v3, %v6436_v21  ;;  %v2979_v27 = vpop.f32.mrb[47].mxu0  ;;  %v3042_v42 = vpop.f32.mrb[47].mxu1  ;;  %v3107_v25 = vmul.f32 %v3083_v23, %v6511_v24  ;;  %v3085_v57 = vmul.f32 0.044715, %v6522_v16 }
 0xc9d   : > { %v3086_v28 = vmul.f32 0.044715, %v6530_v63  ;;  %v6546_v36 = vadd.f32 %v2979_v27, %v6440_v20  ;;  %v6549_v35 = vadd.f32 %v3042_v42, %v6442_v55  ;;  %v3087_v21 = vmul.f32 0.044715, %v6525_v60 }
 0xc9e   : > { %v3088_v19 = vmul.f32 0.044715, %v6533_v48  ;;  %v3132_v55 = vmul.f32 %v3108_v54, %v6507_v43  ;;  %v3089_v8 = vmul.f32 0.044715, %v6538_v4  ;;  %v3091_v58 = vmul.f32 0.044715, %v6541_v26 }
 0xc9f   : > { %v3090_v6 = vmul.f32 0.044715, %v6546_v36  ;;  %v3092_v20 = vmul.f32 0.044715, %v6549_v35  ;;  %v3110_v52 = vmul.f32 %v3086_v28, %v6530_v63  ;;  %v3131_v9 = vmul.f32 %v3107_v25, %v6511_v24 }
 0xca0   : > { %v3109_v11 = vmul.f32 %v3085_v57, %v6522_v16  ;;  %v3111_v0 = vmul.f32 %v3087_v21, %v6525_v60  ;;  %v3112_v14 = vmul.f32 %v3088_v19, %v6533_v48  ;;  %v3154_v17 = vadd.f32 %v3130_v22, %v6504_v62 }
 0xca1   : > { %v3114_v47 = vmul.f32 %v3090_v6, %v6546_v36  ;;  %v3116_v34 = vmul.f32 %v3092_v20, %v6549_v35  ;;  %v3113_v33 = vmul.f32 %v3089_v8, %v6538_v4  ;;  %v3115_v37 = vmul.f32 %v3091_v58, %v6541_v26 }
 0xca2   : > { %v3152_v41 = vadd.f32 %v3128_v49, %v6497_v46  ;;  %v3156_v10 = vadd.f32 %v3132_v55, %v6507_v43  ;;  %v3134_v18 = vmul.f32 %v3110_v52, %v6530_v63  ;;  %v3174_v38 = vmul.f32 0.7978846, %v3150_v13 }
 0xca3   : > { %v3138_v23 = vmul.f32 %v3114_v47, %v6546_v36  ;;  %v3178_v32 = vmul.f32 0.7978846, %v3154_v17  ;;  %v3149_v31 = vadd.f32 %v3125_v7, %v6488_v15  ;;  %v3153_v3 = vadd.f32 %v3129_v45, %v6501_v12 }
 0xca4   : > { %v3176_v40 = vmul.f32 0.7978846, %v3152_v41  ;;  %v3180_v53 = vmul.f32 0.7978846, %v3156_v10  ;;  %v3136_v2 = vmul.f32 %v3112_v14, %v6533_v48  ;;  %v3140_v54 = vmul.f32 %v3116_v34, %v6549_v35 }
 0xca5   : > { %4912 = vtanh.f32 %v3174_v38  ;;  %v3151_v27 = vadd.f32 %v3127_v56, %v6491_v30  ;;  %v3173_v42 = vmul.f32 0.7978846, %v3149_v31  ;;  %v3177_v5 = vmul.f32 0.7978846, %v3153_v3 }
 0xca6   : > { %4914 = vtanh.f32 %v3178_v32  ;;  %v3155_v28 = vadd.f32 %v3131_v9, %v6511_v24  ;;  %v3133_v44 = vmul.f32 %v3109_v11, %v6522_v16  ;;  %v3137_v25 = vmul.f32 %v3113_v33, %v6538_v4 }
 0xca7   : > { %4916 = vtanh.f32 %v3176_v40  ;;  %v3175_v57 = vmul.f32 0.7978846, %v3151_v27  ;;  %v3158_v22 = vadd.f32 %v3134_v18, %v6530_v63  ;;  %v3162_v19 = vadd.f32 %v3138_v23, %v6546_v36 }
 0xca8   : > { %4918 = vtanh.f32 %v3180_v53  ;;  %v3179_v21 = vmul.f32 0.7978846, %v3155_v28  ;;  %v3135_v6 = vmul.f32 %v3111_v0, %v6525_v60  ;;  %v3139_v20 = vmul.f32 %v3115_v37, %v6541_v26 }
 0xca9   : > { %4920 = vtanh.f32 %v3173_v42  ;;  %v3160_v49 = vadd.f32 %v3136_v2, %v6533_v48  ;;  %v3182_v55 = vmul.f32 0.7978846, %v3158_v22  ;;  %v3186_v8 = vmul.f32 0.7978846, %v3162_v19 }
 0xcaa   : > { %4922 = vtanh.f32 %v3177_v5  ;;  %v3164_v58 = vadd.f32 %v3140_v54, %v6549_v35  ;;  %v3157_v52 = vadd.f32 %v3133_v44, %v6522_v16  ;;  %v3161_v47 = vadd.f32 %v3137_v25, %v6538_v4 }
 0xcab   : > { %4924 = vtanh.f32 %v3175_v57  ;;  %v3184_v7 = vmul.f32 0.7978846, %v3160_v49  ;;  %v3159_v45 = vadd.f32 %v3135_v6, %v6525_v60  ;;  %v3163_v0 = vadd.f32 %v3139_v20, %v6541_v26 }
 0xcac   : > { %4926 = vtanh.f32 %v3179_v21  ;;  %v3188_v56 = vmul.f32 0.7978846, %v3164_v58  ;;  %v3181_v9 = vmul.f32 0.7978846, %v3157_v52  ;;  %v3185_v11 = vmul.f32 0.7978846, %v3161_v47 }
 0xcad   : > { %4928 = vtanh.f32 %v3182_v55  ;;  %v3183_v34 = vmul.f32 0.7978846, %v3159_v45  ;;  %v3187_v33 = vmul.f32 0.7978846, %v3163_v0  ;;  %v3054_v41 = vmul.f32 0.5, %v6494_v39 }
 0xcae   : > { %4930 = vtanh.f32 %v3186_v8  ;;  %v3058_v10 = vmul.f32 0.5, %v6504_v62  ;;  %v3056_v38 = vmul.f32 0.5, %v6497_v46  ;;  %v3060_v32 = vmul.f32 0.5, %v6507_v43 }
 0xcaf   : > { %v4913_v14 = vpop.eup %4912  ;;  %4932 = vtanh.f32 %v3184_v7  ;;  %v3053_v27 = vmul.f32 0.5, %v6488_v15  ;;  %v3057_v39 = vmul.f32 0.5, %v6501_v12  ;;  %v3055_v25 = vmul.f32 0.5, %v6491_v30 }
 0xcb0   : > { %v4915_v13 = vpop.eup %4914  ;;  %v3222_v17 = vadd.f32 1.0, %v4913_v14  ;;  %4934 = vtanh.f32 %v3188_v56  ;;  %v3059_v57 = vmul.f32 0.5, %v6511_v24  ;;  %v3062_v49 = vmul.f32 0.5, %v6530_v63 }
 0xcb1   : > { %v4917_v37 = vpop.eup %4916  ;;  %v3226_v18 = vadd.f32 1.0, %v4915_v13  ;;  %4936 = vtanh.f32 %v3181_v9  ;;  %v3066_v55 = vmul.f32 0.5, %v6546_v36  ;;  %v3064_v47 = vmul.f32 0.5, %v6533_v48 }
 0xcb2   : > { %v4919_v23 = vpop.eup %4918  ;;  %v3224_v40 = vadd.f32 1.0, %v4917_v37  ;;  %4938 = vtanh.f32 %v3185_v11  ;;  %v3246_v31 = vmul.f32 %v3222_v17, %v3054_v41  ;;  %v3068_v45 = vmul.f32 0.5, %v6549_v35 }
 0xcb3   : > { %v4921_v53 = vpop.eup %4920  ;;  %v3250_v3 = vmul.f32 %v3226_v18, %v3058_v10  ;;  %v3228_v2 = vadd.f32 1.0, %v4919_v23  ;;  %4940 = vtanh.f32 %v3183_v34  ;;  %v3061_v13 = vmul.f32 0.5, %v6522_v16 }
 0xcb4   : > { %v4923_v54 = vpop.eup %4922  ;;  %v3221_v62 = vadd.f32 1.0, %v4921_v53  ;;  %4942 = vtanh.f32 %v3187_v33  ;;  %v3248_v28 = vmul.f32 %v3224_v40, %v3056_v38  ;;  %v3065_v17 = vmul.f32 0.5, %v6538_v4 }
 0xcb5   : > { %v4925_v42 = vpop.eup %4924  ;;  %v3266_v5 = vpack.c.bf16 %v3250_v3, %v3246_v31  ;;  %v3252_v46 = vmul.f32 %v3228_v2, %v3060_v32  ;;  %v3225_v44 = vadd.f32 1.0, %v4923_v54  ;;  %v3063_v23 = vmul.f32 0.5, %v6525_v60  ;;  %v4179_v60 = vld [vmem:[%s988_s18] ss:$0 sm:$0xff] }
 0xcb6   : > { %v4927_v43 = vpop.eup %4926  ;;  %v3223_v21 = vadd.f32 1.0, %v4925_v42  ;;  %v3245_v6 = vmul.f32 %v3221_v62, %v3053_v27  ;;  %v3067_v38 = vmul.f32 0.5, %v6541_v26 }
 0xcb7   : > { %v4929_v22 = vpop.eup %4928  ;;  %3576 = vmatprep.mubr.bf16.mxu0 %v3266_v5  ;;  %v3268_v19 = vpack.c.bf16 %v3252_v46, %v3248_v28  ;;  %v3249_v15 = vmul.f32 %v3225_v44, %v3057_v39  ;;  %v3227_v20 = vadd.f32 1.0, %v4927_v43 }
 0xcb8   : > { %v4931_v12 = vpop.eup %4930  ;;  %v3230_v8 = vadd.f32 1.0, %v4929_v22  ;;  %v3247_v56 = vmul.f32 %v3223_v21, %v3055_v25 }
 0xcb9   : > { %v4933_v58 = vpop.eup %4932  ;;  %3633 = vmatprep.mubr.bf16.mxu1 %v3268_v19  ;;  %v3265_v7 = vpack.c.bf16 %v3249_v15, %v3245_v6  ;;  %v3251_v30 = vmul.f32 %v3227_v20, %v3059_v57  ;;  %v3234_v52 = vadd.f32 1.0, %v4931_v12  ;;  %v4212_v57 = vld [vmem:[%s991_s7] ss:$0 sm:$0xff]  ;;  %s6843_s7 = sld [smem:[#allocation47_spill]] (!%p4213_p5) }
 0xcba   : > { %v4935_v24 = vpop.eup %4934  ;;  %v3232_v9 = vadd.f32 1.0, %v4933_v58  ;;  %v3254_v14 = vmul.f32 %v3230_v8, %v3062_v49 }
 0xcbb   : > { %v4937_v11 = vpop.eup %4936  ;;  %3577 = vmatmul.mubr.bf16.gmra.mrb[52].mxu0 %v3265_v7  ;;  %v3267_v0 = vpack.c.bf16 %v3251_v30, %v3247_v56  ;;  %v3258_v63 = vmul.f32 %v3234_v52, %v3066_v55  ;;  %v3236_v34 = vadd.f32 1.0, %v4935_v24 }
 0xcbc   : > { %v4939_v36 = vpop.eup %4938  ;;  %v3229_v33 = vadd.f32 1.0, %v4937_v11  ;;  %v3256_v10 = vmul.f32 %v3232_v9, %v3064_v47 }
 0xcbd   : > { %v4941_v37 = vpop.eup %4940  ;;  %3634 = vmatmul.mubr.bf16.gmra.mrb[52].mxu1 %v3267_v0  ;;  %v3270_v41 = vpack.c.bf16 %v3258_v63, %v3254_v14  ;;  %v3260_v48 = vmul.f32 %v3236_v34, %v3068_v45  ;;  %v3233_v18 = vadd.f32 1.0, %v4939_v36 }
 0xcbe   : > { %v4943_v35 = vpop.eup %4942  ;;  %v3231_v32 = vadd.f32 1.0, %v4941_v37  ;;  %v3253_v53 = vmul.f32 %v3229_v33, %v3061_v13 }
 0xcbf   : > { %3584 = vmatprep.mubr.bf16.mxu0 %v3270_v41  ;;  %v3272_v40 = vpack.c.bf16 %v3260_v48, %v3256_v10  ;;  %v3257_v16 = vmul.f32 %v3233_v18, %v3065_v17  ;;  %v3235_v31 = vadd.f32 1.0, %v4943_v35 }
 0xcc0   : > { %v3255_v3 = vmul.f32 %v3231_v32, %v3063_v23 }
 0xcc1   : > { %3641 = vmatprep.mubr.bf16.mxu1 %v3272_v40  ;;  %v3269_v4 = vpack.c.bf16 %v3257_v16, %v3253_v53  ;;  %v3259_v2 = vmul.f32 %v3235_v31, %v3067_v38 }
 0xcc3   : > { %3585 = vmatmul.mubr.bf16.gmra.mrb[56].mxu0 %v3269_v4  ;;  %v3271_v54 = vpack.c.bf16 %v3259_v2, %v3255_v3 }
 0xcc5   : > { %3642 = vmatmul.mubr.bf16.gmra.mrb[56].mxu1 %v3271_v54 }
 0xd04   : > { %v4312_v27 = vpop.f32.mrb[48].mxu0 }
 0xd05   : > { %v4313_v26 = vpop.f32.mrb[49].mxu0 }
 0xd06   : > { %v4346_v39 = vpop.f32.mrb[48].mxu1  ;;  %v4314_v62 = vadd.f32 %v4313_v26, %v4312_v27  ;;  %v4315_v42 = vpop.f32.mrb[50].mxu0 }
 0xd07   : > { %v4347_v5 = vpop.f32.mrb[49].mxu1  ;;  %v4316_v28 = vpop.f32.mrb[51].mxu0 }
 0xd08   : > { %v3571_v46 = vadd.f32 %v4314_v62, %v4179_v60  ;;  %v4348_v44 = vadd.f32 %v4347_v5, %v4346_v39  ;;  %v4349_v43 = vpop.f32.mrb[50].mxu1  ;;  %v4317_v25 = vadd.f32 %v4316_v28, %v4315_v42 }
 0xd09   : > { %v4350_v21 = vpop.f32.mrb[51].mxu1 }
 0xd0a   : > { %v3628_v22 = vadd.f32 %v4348_v44, %v3571_v46  ;;  %v3574_v19 = vadd.f32 %v4317_v25, %v4179_v60  ;;  %v4351_v6 = vadd.f32 %v4350_v21, %v4349_v43 }
 0xd0c   : > { %v3657_v15 = vmul.f32 %v4212_v57, %v3628_v22  ;;  %v3631_v20 = vadd.f32 %v4351_v6, %v3574_v19 }
 0xd0e   : > { %v6626_v12 = vadd.f32 %v3657_v15, %v6233_v1  ;;  %v3658_v49 = vmul.f32 %v4212_v57, %v3631_v20 }
 0xd10   : > { %v6629_v55 = vadd.f32 %v3658_v49, %v6265_v61  ;;  %3675 = vadd.xlane.f32.xlu0 (!%p4213_p5), %v6626_v12 }
 0xd14   : > { %3677 = vadd.xlane.f32.xlu0 (!%p4213_p5), %v6629_v55 }
 0xd8e   : > { %v4318_v8 = vpop.f32.mrb[52].mxu0 }
 0xd8f   : > { %v4319_v58 = vpop.f32.mrb[53].mxu0 }
 0xd90   : > { %v4352_v7 = vpop.f32.mrb[52].mxu1  ;;  %v4320_v56 = vadd.f32 %v4319_v58, %v4318_v8  ;;  %v4321_v30 = vpop.f32.mrb[54].mxu0 }
 0xd91   : > { %v4353_v52 = vpop.f32.mrb[53].mxu1  ;;  %v4322_v24 = vpop.f32.mrb[55].mxu0 }
 0xd92   : > { %v3579_v47 = vadd.f32 %v4320_v56, %v4179_v60  ;;  %v4354_v45 = vadd.f32 %v4353_v52, %v4352_v7  ;;  %v4355_v9 = vpop.f32.mrb[54].mxu1  ;;  %v4323_v11 = vadd.f32 %v4322_v24, %v4321_v30 }
 0xd93   : > { %v4356_v0 = vpop.f32.mrb[55].mxu1 }
 0xd94   : > { %v3636_v14 = vadd.f32 %v4354_v45, %v3579_v47  ;;  %v3582_v63 = vadd.f32 %v4323_v11, %v4179_v60  ;;  %v4357_v1 = vadd.f32 %v4356_v0, %v4355_v9 }
 0xd96   : > { %v3659_v34 = vmul.f32 %v4212_v57, %v3636_v14  ;;  %v3639_v36 = vadd.f32 %v4357_v1, %v3582_v63  ;;  %v4324_v13 = vpop.f32.mrb[56].mxu0 }
 0xd97   : > { %v4325_v61 = vpop.f32.mrb[57].mxu0 }
 0xd98   : > { %v6632_v17 = vadd.f32 %v3659_v34, %v6272_v50  ;;  %v3660_v33 = vmul.f32 %v4212_v57, %v3639_v36  ;;  %v4358_v37 = vpop.f32.mrb[56].mxu1  ;;  %v4326_v41 = vadd.f32 %v4325_v61, %v4324_v13  ;;  %v4327_v10 = vpop.f32.mrb[58].mxu0 }
 0xd99   : > { %v4359_v48 = vpop.f32.mrb[57].mxu1  ;;  %v4328_v18 = vpop.f32.mrb[59].mxu0 }
 0xd9a   : > { %v6635_v35 = vadd.f32 %v3660_v33, %v6288_v59  ;;  %v3587_v23 = vadd.f32 %v4326_v41, %v4179_v60  ;;  %v4360_v38 = vadd.f32 %v4359_v48, %v4358_v37  ;;  %v4361_v32 = vpop.f32.mrb[58].mxu1  ;;  %v4329_v40 = vadd.f32 %v4328_v18, %v4327_v10  ;;  %3679 = vadd.xlane.f32.xlu1 (!%p4213_p5), %v6632_v17  ;;  %v4214_v37 = vld [vmem:[%s6843_s7] ss:$0 sm:$0xff] (!%p4213_p5) }
 0xd9b   : > { %v4362_v53 = vpop.f32.mrb[59].mxu1  ;;  %v4215_v48 = vld [vmem:[%s6844_s4] ss:$0 sm:$0xff] (!%p4213_p5) }
 0xd9c   : > { %v3644_v16 = vadd.f32 %v4360_v38, %v3587_v23  ;;  %v3590_v31 = vadd.f32 %v4329_v40, %v4179_v60  ;;  %v4363_v4 = vadd.f32 %v4362_v53, %v4361_v32  ;;  %3672 = sbr.rel (%p4213_p5) target bundleno = 3804 (0xedc), region = 148 }
 0xd9d   : > { %v3676_v59 = vpop.xlane.xlu0 (!%p4213_p5), %3675 }
 0xd9e   : > { %v3661_v3 = vmul.f32 %v4212_v57, %v3644_v16  ;;  %v3647_v50 = vadd.f32 %v4363_v4, %v3590_v31  ;;  %3681 = vadd.xlane.f32.xlu1 (!%p4213_p5), %v6635_v35  ;;  %v3687_v60 = vmul.f32 (!%p4213_p5), 0.0078125, %v3676_v59 }
 0xda0   : > { %v6638_v2 = vadd.f32 %v3661_v3, %v6292_v51  ;;  %v3662_v54 = vmul.f32 %v4212_v57, %v3647_v50  ;;  %v3693_v26 = vsub.f32 (!%p4213_p5), %v6626_v12, %v3687_v60 }
 0xda1   : > { %v3678_v62 = vpop.xlane.xlu0 (!%p4213_p5), %3677 }
 0xda2   : > { %v6641_v27 = vadd.f32 %v3662_v54, %v6298_v29  ;;  %3683 = vadd.xlane.f32.xlu0 (!%p4213_p5), %v6638_v2  ;;  %v3688_v5 = vmul.f32 (!%p4213_p5), 0.0078125, %v3678_v62  ;;  %v3699_v28 = vmul.f32 (!%p4213_p5), %v3693_v26, %v3693_v26 }
 0xda4   : > { %3685 = vadd.xlane.f32.xlu1 %v6641_v27  ;;  %v3694_v44 = vsub.f32 %v6629_v55, %v3688_v5 }
 0xda6   : > { %3705 = vadd.xlane.f32.xlu0 %v3699_v28  ;;  %v3700_v19 = vmul.f32 %v3694_v44, %v3694_v44 }
 0xda8   : > { %3707 = vadd.xlane.f32.xlu1 %v3700_v19 }
 0xe27   : > { %v3680_v51 = vpop.xlane.xlu1 %3679 }
 0xe28   : > { %v3689_v29 = vmul.f32 0.0078125, %v3680_v51 }
 0xe2a   : > { %v3695_v39 = vsub.f32 %v6632_v17, %v3689_v29 }
 0xe2b   : > { %v3682_v42 = vpop.xlane.xlu1 %3681 }
 0xe2c   : > { %v3690_v46 = vmul.f32 0.0078125, %v3682_v42  ;;  %v3701_v25 = vmul.f32 %v3695_v39, %v3695_v39 }
 0xe2e   : > { %v3696_v43 = vsub.f32 %v6635_v35, %v3690_v46  ;;  %3709 = vadd.xlane.f32.xlu0 %v3701_v25 }
 0xe2f   : > { %v3684_v57 = vpop.xlane.xlu0 %3683 }
 0xe30   : > { %v3691_v22 = vmul.f32 0.0078125, %v3684_v57  ;;  %v3702_v49 = vmul.f32 %v3696_v43, %v3696_v43 }
 0xe31   : > { %v3686_v21 = vpop.xlane.xlu1 %3685 }
 0xe32   : > { %v3692_v6 = vmul.f32 0.0078125, %v3686_v21  ;;  %v3697_v15 = vsub.f32 %v6638_v2, %v3691_v22  ;;  %3711 = vadd.xlane.f32.xlu1 %v3702_v49 }
 0xe33   : > { %v3706_v7 = vpop.xlane.xlu0 %3705 }
 0xe34   : > { %v3698_v20 = vsub.f32 %v6641_v27, %v3692_v6  ;;  %v3703_v8 = vmul.f32 %v3697_v15, %v3697_v15  ;;  %v3717_v56 = vmul.f32 0.0078125, %v3706_v7 }
 0xe35   : > { %v3708_v52 = vpop.xlane.xlu1 %3707 }
 0xe36   : > { %3713 = vadd.xlane.f32.xlu0 %v3703_v8  ;;  %v3704_v58 = vmul.f32 %v3698_v20, %v3698_v20  ;;  %v3723_v30 = vadd.f32 1e-06, %v3717_v56  ;;  %v3718_v47 = vmul.f32 0.0078125, %v3708_v52 }
 0xe38   : > { %3715 = vadd.xlane.f32.xlu1 %v3704_v58  ;;  %4950 = vrsqrt.f32 %v3723_v30  ;;  %v3724_v9 = vadd.f32 1e-06, %v3718_v47 }
 0xe3a   : > { %4952 = vrsqrt.f32 %v3724_v9 }
 0xe42   : > { %v4951_v33 = vpop.eup %4950 }
 0xe43   : > { %v3735_v10 = vmul.f32 %v4951_v33, %v3693_v26 }
 0xe44   : > { %v4953_v23 = vpop.eup %4952 }
 0xe45   : > { %v3747_v18 = vmul.f32 %v4214_v37, %v3735_v10  ;;  %v3736_v40 = vmul.f32 %v4953_v23, %v3694_v44 }
 0xe47   : > { %v3759_v32 = vadd.f32 %v4215_v48, %v3747_v18  ;;  %v3748_v16 = vmul.f32 %v4214_v37, %v3736_v40 }
 0xe49   : > { %3765 = vst [vmem:[#allocation17] sm:$0xff] %v3759_v32  ;;  %v3760_v50 = vadd.f32 %v4215_v48, %v3748_v16 }
 0xe4b   : > { %3766 = vst [vmem:[#allocation17 + $0x8] sm:$0xff] %v3760_v50 }
 0xebb   : > { %v3710_v24 = vpop.xlane.xlu0 %3709 }
 0xebc   : > { %v3719_v45 = vmul.f32 0.0078125, %v3710_v24 }
 0xebe   : > { %v3725_v11 = vadd.f32 1e-06, %v3719_v45 }
 0xebf   : > { %v3712_v0 = vpop.xlane.xlu1 %3711 }
 0xec0   : > { %v3720_v63 = vmul.f32 0.0078125, %v3712_v0  ;;  %4954 = vrsqrt.f32 %v3725_v11 }
 0xec2   : > { %v3726_v34 = vadd.f32 1e-06, %v3720_v63 }
 0xec3   : > { %v3714_v14 = vpop.xlane.xlu0 %3713 }
 0xec4   : > { %v3721_v1 = vmul.f32 0.0078125, %v3714_v14  ;;  %4956 = vrsqrt.f32 %v3726_v34 }
 0xec5   : > { %v3716_v13 = vpop.xlane.xlu1 %3715 }
 0xec6   : > { %v3727_v36 = vadd.f32 1e-06, %v3721_v1  ;;  %v3722_v61 = vmul.f32 0.0078125, %v3716_v13 }
 0xec8   : > { %4958 = vrsqrt.f32 %v3727_v36  ;;  %v3728_v41 = vadd.f32 1e-06, %v3722_v61 }
 0xeca   : > { %4960 = vrsqrt.f32 %v3728_v41  ;;  %v4955_v38 = vpop.eup %4954 }
 0xecb   : > { %v3737_v53 = vmul.f32 %v4955_v38, %v3695_v39 }
 0xecd   : > { %v3749_v4 = vmul.f32 %v4214_v37, %v3737_v53 }
 0xece   : > { %v4957_v31 = vpop.eup %4956 }
 0xecf   : > { %v3738_v54 = vmul.f32 %v4957_v31, %v3696_v43  ;;  %v3761_v59 = vadd.f32 %v4215_v48, %v3749_v4 }
 0xed1   : > { %v3750_v60 = vmul.f32 %v4214_v37, %v3738_v54  ;;  %3767 = vst [vmem:[#allocation17 + $0x10] sm:$0xff] %v3761_v59 }
 0xed2   : > { %v4959_v3 = vpop.eup %4958 }
 0xed3   : > { %v3739_v51 = vmul.f32 %v4959_v3, %v3697_v15  ;;  %v3762_v62 = vadd.f32 %v4215_v48, %v3750_v60 }
 0xed4   : > { %v4961_v29 = vpop.eup %4960 }
 0xed5   : > { %v3751_v26 = vmul.f32 %v4214_v37, %v3739_v51  ;;  %v3740_v42 = vmul.f32 %v4961_v29, %v3698_v20  ;;  %3768 = vst [vmem:[#allocation17 + $0x18] sm:$0xff] %v3762_v62 }
 0xed7   : > { %v3763_v5 = vadd.f32 %v4215_v48, %v3751_v26  ;;  %v3752_v28 = vmul.f32 %v4214_v37, %v3740_v42 }
 0xed9   : > { %3769 = vst [vmem:[#allocation17 + $0x20] sm:$0xff] %v3763_v5  ;;  %v3764_v39 = vadd.f32 %v4215_v48, %v3752_v28 }
 0xedb   : > { %3770 = vst [vmem:[#allocation17 + $0x28] sm:$0xff] %v3764_v39 }
 0xedc PF: > { %p4216_p3 = scmp.eq.s32.totalorder %s5459_s29, 1 }
 0xedd   : > { %3775 = vst [vmem:[#allocation17] sm:$0xff] (!%p4216_p3), %v6626_v12  ;;  %3776 = vst [vmem:[#allocation17 + $0x8] sm:$0xff] (!%p4216_p3), %v6629_v55 }
 0xede   : > { %3774 = sbr.rel (%p4216_p3) target bundleno = 3813 (0xee5), region = 152  ;;  %3777 = vst [vmem:[#allocation17 + $0x10] sm:$0xff] (!%p4216_p3), %v6632_v17  ;;  %3778 = vst [vmem:[#allocation17 + $0x18] sm:$0xff] (!%p4216_p3), %v6635_v35 }
 0xedf   : > { %3779 = vst [vmem:[#allocation17 + $0x20] sm:$0xff] (!%p4216_p3), %v6638_v2  ;;  %3780 = vst [vmem:[#allocation17 + $0x28] sm:$0xff] (!%p4216_p3), %v6641_v27 }
 0xee5 PF: > { %s5325_s6 = smov [#allocation17]  }
 0xee6   : > { %s3787_s25 = sshll.u32 %s5325_s6, 4  ;;  %s3788_s25 = int_to_ptr.vmem [resolvable:$true] %s3787_s25 }
 0xee7   : > { %s5222_s20 = scalar_lea.vmem %s3788_s25, 768  ;;  %p5229_p11 = scmp.lt.s32.totalorder %s3788_s25, %s3788_s25 }
 0xee8   : > { %p5223_p13 = scmp.ne.s32.totalorder %s3788_s25, %s5222_s20  ;;  %p5230_p1 = scmp.lt.s32.totalorder %s5222_s20, %s5222_s20 }
 0xeea   : > { %p5224_p0 = pnand %p5223_p13, %p4216_p3  ;;  %p5231_p4 = por %p5230_p1, %p5229_p11 }
 0xeec   : > { %p5225_p9 = pneg %p5224_p0 }
 0xeee   : > { %p5232_p8 = pnand %p5231_p4, %p5225_p9 }
 0xef0   : > { %5235 = shalt.err (!%p5232_p8)
}
 0xef1   : > { %s6845_s0 = sld [smem:[#allocation49_spill]] }
 0xef7   : > { %s5236_s23 = scalar_lea.hbm %s6845_s0, 768 }
 0xef8   : > { %p5237_p7 = scmp.ne.s32.totalorder %s6845_s0, %s5236_s23  ;;  %p5242_p10 = scmp.lt.u32.totalorder %s5236_s23, %s6845_s0 }
 0xefa   : > { %p5238_p2 = pnand %p5237_p7, %p4216_p3 }
 0xefc   : > { %p5239_p12 = pneg %p5238_p2 }
 0xefe   : > { %p5244_p6 = pnand %p5242_p10, %p5239_p12 }
 0xf00   : > { %5247 = shalt.err (!%p5244_p6)
}
 0xf01   : > { %s5326_s21 = smov 128   ;;  %s5327_s9 = smov 8  }
 0xf02   : > { %4559 = dma.vmem_to_hbm [thread:$0]  (%p4216_p3), %s3788_s25, 768, %s6845_s0, [#allocation4], %s5326_s21, %s5326_s21, %s5327_s9  }
 0xf03   : > { %5285 = dma.done.wait (%p4216_p3), [#allocation4], 768  }
 0xf04   : > { %5287 = vsyncadd (%p4216_p3), [#allocation4], 4294966528 }
 0xf05 PF: > { %s6846_s27 = sld [smem:[#allocation26_spill]]  ;;  %s6847_s2 = sld [smem:[#allocation24_spill]] }
 0xf06   : > { %s6848_s25 = sld [smem:[#allocation25_spill]]  ;;  %s6849_s26 = sld [smem:[#allocation27_spill]] }
 0xf0b   : > { %p38_p5 = scmp.ge.s32.totalorder %s6846_s27, 4  }
 0xf0d   :  { %40 = sbr.rel (!%p38_p5) target bundleno = 31 (0x1f), region = 239 }
 0xf14   :  { %3803 = vsyncpa [#allocation3], 1 }
 0xf15   :  { %3805 = vsyncpa [#allocation3 + $0x1], 1 }
 0xf16   :  { %3806 = vsyncpa [#allocation6], 1 }
 0xf17   :  { %3807 = vsyncpa [#allocation9], 1 }
 0xf18   :  { %3808 = vsyncpa [#allocation12], 1 }
 0xf19   :  { %3810 = vsyncpa [#allocation12 + $0x1], 1 }
 0xf1a   :  { %3811 = vsyncpa [#allocation15], 1 }
 0xf1b   :  { %3813 = vsyncpa [#allocation15 + $0x1], 1 }
 0xf1c   :  { %3814 = vsyncpa [#allocation4], 1 }
 0xf1d   :  { %3816 = vsyncpa [#allocation4 + $0x1], 1 }

</bundles_post_ra>
